<compile_context>
chip_gen: v7x
topology: tpu7x:2x2x1
jax: 0.10.0
libtpu: 0.0.40
codegen_flags: <defaults>
</compile_context>

<pallas_src>
import jax
import jax.numpy as jnp
from jax.experimental import pallas as pl
from jax.experimental.pallas import tpu as pltpu

# Static model config (small shapes consistent with the module's constructor).
B = 2     # batch
T = 8     # input sequence length
F = 4     # num_features
H = 32    # hidden_size
NL = 2    # num_layers
OW = 4    # output_window
OD = 2    # output_dim (must be 2: decoder is seeded with src[:, -1, [0, 2]])
G = 4 * H  # 128 gate lanes (i, f, g, o) -> exactly one lane tile


def forecastnet_kernel(src_ref, dec_init_ref,
                       wih0_ref, whh0_ref, b0_ref,   # encoder layer 0 (ih batched outside loop)
                       we1_ref, be1_ref,             # encoder layer 1, stacked [wih; whh]
                       wd0_ref, bd0_ref,             # decoder layer 0, stacked [wih; whh]
                       wd1_ref, bd1_ref,             # decoder layer 1, stacked [wih; whh]
                       fcw_ref, fcb_ref,             # fc:   Linear(H, OD)
                       pw_ref, pb_ref,               # proj: Linear(OD, F)
                       out_ref):
    # Full-vreg activation: sigmoid everywhere, tanh only on the g-gate lane range.
    lane = jax.lax.broadcasted_iota(jnp.int32, (B, G), 1)
    g_mask = (lane >= 2 * H) & (lane < 3 * H)

    def cell_tail(gates, c):
        act = jnp.where(g_mask, jnp.tanh(gates), jax.nn.sigmoid(gates))
        i = act[:, 0 * H:1 * H]
        f = act[:, 1 * H:2 * H]
        g = act[:, 2 * H:3 * H]
        o = act[:, 3 * H:4 * H]
        c_new = f * c + i * g
        h_new = o * jnp.tanh(c_new)
        return h_new, c_new

    src = src_ref[...]  # (B, T, F)

    # Encoder layer-0 input projections for ALL timesteps in one batched matmul
    # (hoisted off the serial recurrence chain).
    ih0 = jnp.dot(src.reshape(B * T, F), wih0_ref[...],
                  preferred_element_type=jnp.float32).reshape(B, T, G)

    h0 = jnp.zeros((B, H), jnp.float32)
    c0 = jnp.zeros((B, H), jnp.float32)
    h1 = jnp.zeros((B, H), jnp.float32)
    c1 = jnp.zeros((B, H), jnp.float32)

    # ---- Encoder: NL-layer LSTM over the source sequence (fully unrolled) ----
    for t in range(T):
        # layer 0: only the recurrent matmul sits on the serial chain
        g0 = ih0[:, t, :] + jnp.dot(h0, whh0_ref[...],
                                    preferred_element_type=jnp.float32) + b0_ref[...]
        h0, c0 = cell_tail(g0, c0)
        # layer 1: fused [x, h] @ [wih; whh]
        g1 = jnp.dot(jnp.concatenate([h0, h1], axis=1), we1_ref[...],
                     preferred_element_type=jnp.float32) + be1_ref[...]
        h1, c1 = cell_tail(g1, c1)

    # ---- Decoder: autoregressive rollout (teacher_forcing_ratio = 0.0) ----
    dec_in = dec_init_ref[...]  # (B, OD)
    pw = pw_ref[...]            # (OD, F)
    pb = pb_ref[...]            # (1, F)
    preds = []
    for _ in range(OW):
        # proj (OD=2 -> F=4) as VPU FMAs — too tiny to be worth an MXU round trip.
        x = pb
        for k in range(OD):
            x = x + dec_in[:, k:k + 1] * pw[k:k + 1, :]
        g0 = jnp.dot(jnp.concatenate([x, h0], axis=1), wd0_ref[...],
                     preferred_element_type=jnp.float32) + bd0_ref[...]
        h0, c0 = cell_tail(g0, c0)
        g1 = jnp.dot(jnp.concatenate([h0, h1], axis=1), wd1_ref[...],
                     preferred_element_type=jnp.float32) + bd1_ref[...]
        h1, c1 = cell_tail(g1, c1)
        pred = jnp.dot(h1, fcw_ref[...], preferred_element_type=jnp.float32) + fcb_ref[...]
        preds.append(pred)
        dec_in = pred  # always feed back the prediction

    # Single lane-packed store instead of OW tiny masked stores.
    out_ref[...] = jnp.concatenate(preds, axis=1)  # (B, OW * OD)


def forecastnet_forward(src, params):
    (e0_wih, e0_whh, e0_b, e1_wih, e1_whh, e1_b,
     d0_wih, d0_whh, d0_b, d1_wih, d1_whh, d1_b,
     fc_w_t, fc_b, proj_w_t, proj_b) = params

    # Fuse per-cell gate matmuls: stack [wih; whh] for every layer whose input
    # sits on the serial chain (encoder layer 1, both decoder layers).
    we1 = jnp.concatenate([e1_wih, e1_whh], axis=0)   # (2H, 4H)
    wd0 = jnp.concatenate([d0_wih, d0_whh], axis=0)   # (F+H, 4H)
    wd1 = jnp.concatenate([d1_wih, d1_whh], axis=0)   # (2H, 4H)

    # Mirrors `src[:, -1:, :][:, :, [0, 2]]` (feature gather done in the glue).
    dec_init = src[:, -1, :][:, jnp.array([0, 2])]    # (B, OD)

    args = (src, dec_init,
            e0_wih, e0_whh, e0_b,
            we1, e1_b,
            wd0, d0_b,
            wd1, d1_b,
            fc_w_t, fc_b, proj_w_t, proj_b)
    vmem = pl.BlockSpec(memory_space=pltpu.MemorySpace.VMEM)
    out_flat = pl.pallas_call(
        forecastnet_kernel,
        out_shape=jax.ShapeDtypeStruct((B, OW * OD), jnp.float32),
        in_specs=[vmem] * len(args),
        out_specs=vmem,
    )(*args)
    return out_flat.reshape(B, OW, OD)


def reference_forward(src, params):
    """Pure-JAX reference with the straightforward (PyTorch-style) math:
    separate ih/hh matmuls, per-gate slices, proj via matmul."""
    (e0_wih, e0_whh, e0_b, e1_wih, e1_whh, e1_b,
     d0_wih, d0_whh, d0_b, d1_wih, d1_whh, d1_b,
     fc_w_t, fc_b, proj_w_t, proj_b) = params
    enc = [(e0_wih, e0_whh, e0_b), (e1_wih, e1_whh, e1_b)]
    dec = [(d0_wih, d0_whh, d0_b), (d1_wih, d1_whh, d1_b)]

    def cell(x, h, c, wih_t, whh_t, b):
        gates = x @ wih_t + h @ whh_t + b
        i = jax.nn.sigmoid(gates[:, 0 * H:1 * H])
        f = jax.nn.sigmoid(gates[:, 1 * H:2 * H])
        g = jnp.tanh(gates[:, 2 * H:3 * H])
        o = jax.nn.sigmoid(gates[:, 3 * H:4 * H])
        c_new = f * c + i * g
        return o * jnp.tanh(c_new), c_new

    h = [jnp.zeros((B, H), jnp.float32) for _ in range(NL)]
    c = [jnp.zeros((B, H), jnp.float32) for _ in range(NL)]
    for t in range(T):
        x = src[:, t, :]
        for l in range(NL):
            h[l], c[l] = cell(x, h[l], c[l], *enc[l])
            x = h[l]

    dec_in = src[:, -1, :][:, jnp.array([0, 2])]
    outs = []
    for _ in range(OW):
        x = dec_in @ proj_w_t + proj_b
        for l in range(NL):
            h[l], c[l] = cell(x, h[l], c[l], *dec[l])
            x = h[l]
        pred = x @ fc_w_t + fc_b
        outs.append(pred)
        dec_in = pred
    return jnp.stack(outs, axis=1)


def _uniform(key, shape, scale):
    return jax.random.uniform(key, shape, jnp.float32, -scale, scale)


def init_params(key):
    """Deterministic params, PyTorch-style uniform(-1/sqrt(fan), 1/sqrt(fan)).
    Returns the raw (unstacked) per-layer (wih_t, whh_t, b_ih+b_hh) triples."""
    keys = iter(jax.random.split(key, 64))
    k_lstm = 1.0 / (H ** 0.5)
    params = []
    for _lstm in range(2):               # encoder, then decoder
        for l in range(NL):
            in_dim = F if l == 0 else H
            wih_t = _uniform(next(keys), (in_dim, 4 * H), k_lstm)
            whh_t = _uniform(next(keys), (H, 4 * H), k_lstm)
            b_ih = _uniform(next(keys), (1, 4 * H), k_lstm)
            b_hh = _uniform(next(keys), (1, 4 * H), k_lstm)
            params += [wih_t, whh_t, b_ih + b_hh]
    k_fc = 1.0 / (H ** 0.5)              # fc: Linear(H, OD)
    params.append(_uniform(next(keys), (H, OD), k_fc))
    params.append(_uniform(next(keys), (1, OD), k_fc))
    k_pr = 1.0 / (OD ** 0.5)             # proj: Linear(OD, F)
    params.append(_uniform(next(keys), (OD, F), k_pr))
    params.append(_uniform(next(keys), (1, F), k_pr))
    return params


if __name__ == "__main__":
    root = jax.random.PRNGKey(0)
    k_src, k_par = jax.random.split(root)
    src = jax.random.normal(k_src, (B, T, F), jnp.float32)
    params = init_params(k_par)

    out = forecastnet_forward(src, params)
    out = jax.block_until_ready(out)

    ref = reference_forward(src, params)
    assert out.shape == (B, OW, OD)
    assert bool(jnp.allclose(out, ref, atol=1e-3, rtol=1e-3)), "mismatch vs JAX reference"

    print("KERNEL_OK")
</pallas_src>

<mosaic_0001>
module attributes {stable_mosaic.version = 11 : i64} {
  func.func @forecastnet_kernel(%arg0: memref<2x8x4xf32, #tpu.memory_space<vmem>>, %arg1: memref<2x2xf32, #tpu.memory_space<vmem>>, %arg2: memref<4x128xf32, #tpu.memory_space<vmem>>, %arg3: memref<32x128xf32, #tpu.memory_space<vmem>>, %arg4: memref<1x128xf32, #tpu.memory_space<vmem>>, %arg5: memref<64x128xf32, #tpu.memory_space<vmem>>, %arg6: memref<1x128xf32, #tpu.memory_space<vmem>>, %arg7: memref<36x128xf32, #tpu.memory_space<vmem>>, %arg8: memref<1x128xf32, #tpu.memory_space<vmem>>, %arg9: memref<64x128xf32, #tpu.memory_space<vmem>>, %arg10: memref<1x128xf32, #tpu.memory_space<vmem>>, %arg11: memref<32x2xf32, #tpu.memory_space<vmem>>, %arg12: memref<1x2xf32, #tpu.memory_space<vmem>>, %arg13: memref<2x4xf32, #tpu.memory_space<vmem>>, %arg14: memref<1x4xf32, #tpu.memory_space<vmem>>, %arg15: memref<2x8xf32, #tpu.memory_space<vmem>>) attributes {dimension_semantics = [], scalar_prefetch = 0 : i64, scratch_operands = 0 : i64, tpu.core_type = #tpu.core_type<tc>} {
    %0 = tpu.iota {dimensions = array<i32: 1>} : vector<2x128xi32>
    %c64_i32 = arith.constant 64 : i32
    %1 = vector.broadcast %c64_i32 : i32 to vector<2x128xi32>
    %2 = arith.cmpi sge, %0, %1 : vector<2x128xi32>
    %c96_i32 = arith.constant 96 : i32
    %3 = vector.broadcast %c96_i32 : i32 to vector<2x128xi32>
    %4 = arith.cmpi slt, %0, %3 : vector<2x128xi32>
    %5 = arith.andi %2, %4 : vector<2x128xi1>
    %c0 = arith.constant 0 : index
    %c0_0 = arith.constant 0 : index
    %c0_1 = arith.constant 0 : index
    %6 = vector.load %arg0[%c0, %c0_0, %c0_1] : memref<2x8x4xf32, #tpu.memory_space<vmem>>, vector<2x8x4xf32>
    %7 = vector.shape_cast %6 : vector<2x8x4xf32> to vector<16x4xf32>
    %c0_2 = arith.constant 0 : index
    %c0_3 = arith.constant 0 : index
    %8 = vector.load %arg2[%c0_2, %c0_3] : memref<4x128xf32, #tpu.memory_space<vmem>>, vector<4x128xf32>
    %cst = arith.constant dense<0.000000e+00> : vector<16x128xf32>
    %9 = tpu.matmul %7, %8, %cst {dimension_numbers = #tpu.dot_dimension_numbers<[1], [0], [0], [1], [0, 0, 1, 1], [], []>} : vector<16x4xf32>, vector<4x128xf32>, vector<16x128xf32> -> vector<16x128xf32>
    %10 = vector.shape_cast %9 : vector<16x128xf32> to vector<2x8x128xf32>
    %cst_4 = arith.constant 0.000000e+00 : f32
    %11 = vector.broadcast %cst_4 : f32 to vector<2x32xf32>
    %cst_5 = arith.constant 0.000000e+00 : f32
    %12 = vector.broadcast %cst_5 : f32 to vector<2x32xf32>
    %cst_6 = arith.constant 0.000000e+00 : f32
    %13 = vector.broadcast %cst_6 : f32 to vector<2x32xf32>
    %cst_7 = arith.constant 0.000000e+00 : f32
    %14 = vector.broadcast %cst_7 : f32 to vector<2x32xf32>
    %15 = vector.extract_strided_slice %10 {offsets = [0, 0, 0], sizes = [2, 1, 128], strides = [1, 1, 1]} : vector<2x8x128xf32> to vector<2x1x128xf32>
    %16 = vector.shape_cast %15 : vector<2x1x128xf32> to vector<2x128xf32>
    %c0_8 = arith.constant 0 : index
    %c0_9 = arith.constant 0 : index
    %17 = vector.load %arg3[%c0_8, %c0_9] : memref<32x128xf32, #tpu.memory_space<vmem>>, vector<32x128xf32>
    %cst_10 = arith.constant dense<0.000000e+00> : vector<2x128xf32>
    %18 = tpu.matmul %11, %17, %cst_10 {dimension_numbers = #tpu.dot_dimension_numbers<[1], [0], [0], [1], [0, 0, 1, 1], [], []>} : vector<2x32xf32>, vector<32x128xf32>, vector<2x128xf32> -> vector<2x128xf32>
    %19 = arith.addf %16, %18 : vector<2x128xf32>
    %c0_11 = arith.constant 0 : index
    %c0_12 = arith.constant 0 : index
    %20 = vector.load %arg4[%c0_11, %c0_12] : memref<1x128xf32, #tpu.memory_space<vmem>>, vector<1x128xf32>
    %21 = vector.broadcast %20 : vector<1x128xf32> to vector<2x128xf32>
    %22 = arith.addf %19, %21 : vector<2x128xf32>
    %23 = math.tanh %22 : vector<2x128xf32>
    %24 = arith.negf %22 : vector<2x128xf32>
    %25 = math.exp %24 : vector<2x128xf32>
    %cst_13 = arith.constant 1.000000e+00 : f32
    %26 = vector.broadcast %cst_13 : f32 to vector<2x128xf32>
    %27 = arith.addf %26, %25 : vector<2x128xf32>
    %28 = arith.divf %26, %27 : vector<2x128xf32>
    %29 = arith.select %5, %23, %28 : vector<2x128xi1>, vector<2x128xf32>
    %30 = vector.extract_strided_slice %29 {offsets = [0, 0], sizes = [2, 32], strides = [1, 1]} : vector<2x128xf32> to vector<2x32xf32>
    %31 = vector.extract_strided_slice %29 {offsets = [0, 32], sizes = [2, 32], strides = [1, 1]} : vector<2x128xf32> to vector<2x32xf32>
    %32 = vector.extract_strided_slice %29 {offsets = [0, 64], sizes = [2, 32], strides = [1, 1]} : vector<2x128xf32> to vector<2x32xf32>
    %33 = vector.extract_strided_slice %29 {offsets = [0, 96], sizes = [2, 32], strides = [1, 1]} : vector<2x128xf32> to vector<2x32xf32>
    %34 = arith.mulf %31, %12 : vector<2x32xf32>
    %35 = arith.mulf %30, %32 : vector<2x32xf32>
    %36 = arith.addf %34, %35 : vector<2x32xf32>
    %37 = math.tanh %36 : vector<2x32xf32>
    %38 = arith.mulf %33, %37 : vector<2x32xf32>
    %39 = tpu.concatenate %38, %13 in 1 : vector<2x32xf32>, vector<2x32xf32> -> vector<2x64xf32>
    %c0_14 = arith.constant 0 : index
    %c0_15 = arith.constant 0 : index
    %40 = vector.load %arg5[%c0_14, %c0_15] : memref<64x128xf32, #tpu.memory_space<vmem>>, vector<64x128xf32>
    %cst_16 = arith.constant dense<0.000000e+00> : vector<2x128xf32>
    %41 = tpu.matmul %39, %40, %cst_16 {dimension_numbers = #tpu.dot_dimension_numbers<[1], [0], [0], [1], [0, 0, 1, 1], [], []>} : vector<2x64xf32>, vector<64x128xf32>, vector<2x128xf32> -> vector<2x128xf32>
    %c0_17 = arith.constant 0 : index
    %c0_18 = arith.constant 0 : index
    %42 = vector.load %arg6[%c0_17, %c0_18] : memref<1x128xf32, #tpu.memory_space<vmem>>, vector<1x128xf32>
    %43 = vector.broadcast %42 : vector<1x128xf32> to vector<2x128xf32>
    %44 = arith.addf %41, %43 : vector<2x128xf32>
    %45 = math.tanh %44 : vector<2x128xf32>
    %46 = arith.negf %44 : vector<2x128xf32>
    %47 = math.exp %46 : vector<2x128xf32>
    %cst_19 = arith.constant 1.000000e+00 : f32
    %48 = vector.broadcast %cst_19 : f32 to vector<2x128xf32>
    %49 = arith.addf %48, %47 : vector<2x128xf32>
    %50 = arith.divf %48, %49 : vector<2x128xf32>
    %51 = arith.select %5, %45, %50 : vector<2x128xi1>, vector<2x128xf32>
    %52 = vector.extract_strided_slice %51 {offsets = [0, 0], sizes = [2, 32], strides = [1, 1]} : vector<2x128xf32> to vector<2x32xf32>
    %53 = vector.extract_strided_slice %51 {offsets = [0, 32], sizes = [2, 32], strides = [1, 1]} : vector<2x128xf32> to vector<2x32xf32>
    %54 = vector.extract_strided_slice %51 {offsets = [0, 64], sizes = [2, 32], strides = [1, 1]} : vector<2x128xf32> to vector<2x32xf32>
    %55 = vector.extract_strided_slice %51 {offsets = [0, 96], sizes = [2, 32], strides = [1, 1]} : vector<2x128xf32> to vector<2x32xf32>
    %56 = arith.mulf %53, %14 : vector<2x32xf32>
    %57 = arith.mulf %52, %54 : vector<2x32xf32>
    %58 = arith.addf %56, %57 : vector<2x32xf32>
    %59 = math.tanh %58 : vector<2x32xf32>
    %60 = arith.mulf %55, %59 : vector<2x32xf32>
    %61 = vector.extract_strided_slice %10 {offsets = [0, 1, 0], sizes = [2, 1, 128], strides = [1, 1, 1]} : vector<2x8x128xf32> to vector<2x1x128xf32>
    %62 = vector.shape_cast %61 : vector<2x1x128xf32> to vector<2x128xf32>
    %c0_20 = arith.constant 0 : index
    %c0_21 = arith.constant 0 : index
    %63 = vector.load %arg3[%c0_20, %c0_21] : memref<32x128xf32, #tpu.memory_space<vmem>>, vector<32x128xf32>
    %cst_22 = arith.constant dense<0.000000e+00> : vector<2x128xf32>
    %64 = tpu.matmul %38, %63, %cst_22 {dimension_numbers = #tpu.dot_dimension_numbers<[1], [0], [0], [1], [0, 0, 1, 1], [], []>} : vector<2x32xf32>, vector<32x128xf32>, vector<2x128xf32> -> vector<2x128xf32>
    %65 = arith.addf %62, %64 : vector<2x128xf32>
    %c0_23 = arith.constant 0 : index
    %c0_24 = arith.constant 0 : index
    %66 = vector.load %arg4[%c0_23, %c0_24] : memref<1x128xf32, #tpu.memory_space<vmem>>, vector<1x128xf32>
    %67 = vector.broadcast %66 : vector<1x128xf32> to vector<2x128xf32>
    %68 = arith.addf %65, %67 : vector<2x128xf32>
    %69 = math.tanh %68 : vector<2x128xf32>
    %70 = arith.negf %68 : vector<2x128xf32>
    %71 = math.exp %70 : vector<2x128xf32>
    %cst_25 = arith.constant 1.000000e+00 : f32
    %72 = vector.broadcast %cst_25 : f32 to vector<2x128xf32>
    %73 = arith.addf %72, %71 : vector<2x128xf32>
    %74 = arith.divf %72, %73 : vector<2x128xf32>
    %75 = arith.select %5, %69, %74 : vector<2x128xi1>, vector<2x128xf32>
    %76 = vector.extract_strided_slice %75 {offsets = [0, 0], sizes = [2, 32], strides = [1, 1]} : vector<2x128xf32> to vector<2x32xf32>
    %77 = vector.extract_strided_slice %75 {offsets = [0, 32], sizes = [2, 32], strides = [1, 1]} : vector<2x128xf32> to vector<2x32xf32>
    %78 = vector.extract_strided_slice %75 {offsets = [0, 64], sizes = [2, 32], strides = [1, 1]} : vector<2x128xf32> to vector<2x32xf32>
    %79 = vector.extract_strided_slice %75 {offsets = [0, 96], sizes = [2, 32], strides = [1, 1]} : vector<2x128xf32> to vector<2x32xf32>
    %80 = arith.mulf %77, %36 : vector<2x32xf32>
    %81 = arith.mulf %76, %78 : vector<2x32xf32>
    %82 = arith.addf %80, %81 : vector<2x32xf32>
    %83 = math.tanh %82 : vector<2x32xf32>
    %84 = arith.mulf %79, %83 : vector<2x32xf32>
    %85 = tpu.concatenate %84, %60 in 1 : vector<2x32xf32>, vector<2x32xf32> -> vector<2x64xf32>
    %c0_26 = arith.constant 0 : index
    %c0_27 = arith.constant 0 : index
    %86 = vector.load %arg5[%c0_26, %c0_27] : memref<64x128xf32, #tpu.memory_space<vmem>>, vector<64x128xf32>
    %cst_28 = arith.constant dense<0.000000e+00> : vector<2x128xf32>
    %87 = tpu.matmul %85, %86, %cst_28 {dimension_numbers = #tpu.dot_dimension_numbers<[1], [0], [0], [1], [0, 0, 1, 1], [], []>} : vector<2x64xf32>, vector<64x128xf32>, vector<2x128xf32> -> vector<2x128xf32>
    %c0_29 = arith.constant 0 : index
    %c0_30 = arith.constant 0 : index
    %88 = vector.load %arg6[%c0_29, %c0_30] : memref<1x128xf32, #tpu.memory_space<vmem>>, vector<1x128xf32>
    %89 = vector.broadcast %88 : vector<1x128xf32> to vector<2x128xf32>
    %90 = arith.addf %87, %89 : vector<2x128xf32>
    %91 = math.tanh %90 : vector<2x128xf32>
    %92 = arith.negf %90 : vector<2x128xf32>
    %93 = math.exp %92 : vector<2x128xf32>
    %cst_31 = arith.constant 1.000000e+00 : f32
    %94 = vector.broadcast %cst_31 : f32 to vector<2x128xf32>
    %95 = arith.addf %94, %93 : vector<2x128xf32>
    %96 = arith.divf %94, %95 : vector<2x128xf32>
    %97 = arith.select %5, %91, %96 : vector<2x128xi1>, vector<2x128xf32>
    %98 = vector.extract_strided_slice %97 {offsets = [0, 0], sizes = [2, 32], strides = [1, 1]} : vector<2x128xf32> to vector<2x32xf32>
    %99 = vector.extract_strided_slice %97 {offsets = [0, 32], sizes = [2, 32], strides = [1, 1]} : vector<2x128xf32> to vector<2x32xf32>
    %100 = vector.extract_strided_slice %97 {offsets = [0, 64], sizes = [2, 32], strides = [1, 1]} : vector<2x128xf32> to vector<2x32xf32>
    %101 = vector.extract_strided_slice %97 {offsets = [0, 96], sizes = [2, 32], strides = [1, 1]} : vector<2x128xf32> to vector<2x32xf32>
    %102 = arith.mulf %99, %58 : vector<2x32xf32>
    %103 = arith.mulf %98, %100 : vector<2x32xf32>
    %104 = arith.addf %102, %103 : vector<2x32xf32>
    %105 = math.tanh %104 : vector<2x32xf32>
    %106 = arith.mulf %101, %105 : vector<2x32xf32>
    %107 = vector.extract_strided_slice %10 {offsets = [0, 2, 0], sizes = [2, 1, 128], strides = [1, 1, 1]} : vector<2x8x128xf32> to vector<2x1x128xf32>
    %108 = vector.shape_cast %107 : vector<2x1x128xf32> to vector<2x128xf32>
    %c0_32 = arith.constant 0 : index
    %c0_33 = arith.constant 0 : index
    %109 = vector.load %arg3[%c0_32, %c0_33] : memref<32x128xf32, #tpu.memory_space<vmem>>, vector<32x128xf32>
    %cst_34 = arith.constant dense<0.000000e+00> : vector<2x128xf32>
    %110 = tpu.matmul %84, %109, %cst_34 {dimension_numbers = #tpu.dot_dimension_numbers<[1], [0], [0], [1], [0, 0, 1, 1], [], []>} : vector<2x32xf32>, vector<32x128xf32>, vector<2x128xf32> -> vector<2x128xf32>
    %111 = arith.addf %108, %110 : vector<2x128xf32>
    %c0_35 = arith.constant 0 : index
    %c0_36 = arith.constant 0 : index
    %112 = vector.load %arg4[%c0_35, %c0_36] : memref<1x128xf32, #tpu.memory_space<vmem>>, vector<1x128xf32>
    %113 = vector.broadcast %112 : vector<1x128xf32> to vector<2x128xf32>
    %114 = arith.addf %111, %113 : vector<2x128xf32>
    %115 = math.tanh %114 : vector<2x128xf32>
    %116 = arith.negf %114 : vector<2x128xf32>
    %117 = math.exp %116 : vector<2x128xf32>
    %cst_37 = arith.constant 1.000000e+00 : f32
    %118 = vector.broadcast %cst_37 : f32 to vector<2x128xf32>
    %119 = arith.addf %118, %117 : vector<2x128xf32>
    %120 = arith.divf %118, %119 : vector<2x128xf32>
    %121 = arith.select %5, %115, %120 : vector<2x128xi1>, vector<2x128xf32>
    %122 = vector.extract_strided_slice %121 {offsets = [0, 0], sizes = [2, 32], strides = [1, 1]} : vector<2x128xf32> to vector<2x32xf32>
    %123 = vector.extract_strided_slice %121 {offsets = [0, 32], sizes = [2, 32], strides = [1, 1]} : vector<2x128xf32> to vector<2x32xf32>
    %124 = vector.extract_strided_slice %121 {offsets = [0, 64], sizes = [2, 32], strides = [1, 1]} : vector<2x128xf32> to vector<2x32xf32>
    %125 = vector.extract_strided_slice %121 {offsets = [0, 96], sizes = [2, 32], strides = [1, 1]} : vector<2x128xf32> to vector<2x32xf32>
    %126 = arith.mulf %123, %82 : vector<2x32xf32>
    %127 = arith.mulf %122, %124 : vector<2x32xf32>
    %128 = arith.addf %126, %127 : vector<2x32xf32>
    %129 = math.tanh %128 : vector<2x32xf32>
    %130 = arith.mulf %125, %129 : vector<2x32xf32>
    %131 = tpu.concatenate %130, %106 in 1 : vector<2x32xf32>, vector<2x32xf32> -> vector<2x64xf32>
    %c0_38 = arith.constant 0 : index
    %c0_39 = arith.constant 0 : index
    %132 = vector.load %arg5[%c0_38, %c0_39] : memref<64x128xf32, #tpu.memory_space<vmem>>, vector<64x128xf32>
    %cst_40 = arith.constant dense<0.000000e+00> : vector<2x128xf32>
    %133 = tpu.matmul %131, %132, %cst_40 {dimension_numbers = #tpu.dot_dimension_numbers<[1], [0], [0], [1], [0, 0, 1, 1], [], []>} : vector<2x64xf32>, vector<64x128xf32>, vector<2x128xf32> -> vector<2x128xf32>
    %c0_41 = arith.constant 0 : index
    %c0_42 = arith.constant 0 : index
    %134 = vector.load %arg6[%c0_41, %c0_42] : memref<1x128xf32, #tpu.memory_space<vmem>>, vector<1x128xf32>
    %135 = vector.broadcast %134 : vector<1x128xf32> to vector<2x128xf32>
    %136 = arith.addf %133, %135 : vector<2x128xf32>
    %137 = math.tanh %136 : vector<2x128xf32>
    %138 = arith.negf %136 : vector<2x128xf32>
    %139 = math.exp %138 : vector<2x128xf32>
    %cst_43 = arith.constant 1.000000e+00 : f32
    %140 = vector.broadcast %cst_43 : f32 to vector<2x128xf32>
    %141 = arith.addf %140, %139 : vector<2x128xf32>
    %142 = arith.divf %140, %141 : vector<2x128xf32>
    %143 = arith.select %5, %137, %142 : vector<2x128xi1>, vector<2x128xf32>
    %144 = vector.extract_strided_slice %143 {offsets = [0, 0], sizes = [2, 32], strides = [1, 1]} : vector<2x128xf32> to vector<2x32xf32>
    %145 = vector.extract_strided_slice %143 {offsets = [0, 32], sizes = [2, 32], strides = [1, 1]} : vector<2x128xf32> to vector<2x32xf32>
    %146 = vector.extract_strided_slice %143 {offsets = [0, 64], sizes = [2, 32], strides = [1, 1]} : vector<2x128xf32> to vector<2x32xf32>
    %147 = vector.extract_strided_slice %143 {offsets = [0, 96], sizes = [2, 32], strides = [1, 1]} : vector<2x128xf32> to vector<2x32xf32>
    %148 = arith.mulf %145, %104 : vector<2x32xf32>
    %149 = arith.mulf %144, %146 : vector<2x32xf32>
    %150 = arith.addf %148, %149 : vector<2x32xf32>
    %151 = math.tanh %150 : vector<2x32xf32>
    %152 = arith.mulf %147, %151 : vector<2x32xf32>
    %153 = vector.extract_strided_slice %10 {offsets = [0, 3, 0], sizes = [2, 1, 128], strides = [1, 1, 1]} : vector<2x8x128xf32> to vector<2x1x128xf32>
    %154 = vector.shape_cast %153 : vector<2x1x128xf32> to vector<2x128xf32>
    %c0_44 = arith.constant 0 : index
    %c0_45 = arith.constant 0 : index
    %155 = vector.load %arg3[%c0_44, %c0_45] : memref<32x128xf32, #tpu.memory_space<vmem>>, vector<32x128xf32>
    %cst_46 = arith.constant dense<0.000000e+00> : vector<2x128xf32>
    %156 = tpu.matmul %130, %155, %cst_46 {dimension_numbers = #tpu.dot_dimension_numbers<[1], [0], [0], [1], [0, 0, 1, 1], [], []>} : vector<2x32xf32>, vector<32x128xf32>, vector<2x128xf32> -> vector<2x128xf32>
    %157 = arith.addf %154, %156 : vector<2x128xf32>
    %c0_47 = arith.constant 0 : index
    %c0_48 = arith.constant 0 : index
    %158 = vector.load %arg4[%c0_47, %c0_48] : memref<1x128xf32, #tpu.memory_space<vmem>>, vector<1x128xf32>
    %159 = vector.broadcast %158 : vector<1x128xf32> to vector<2x128xf32>
    %160 = arith.addf %157, %159 : vector<2x128xf32>
    %161 = math.tanh %160 : vector<2x128xf32>
    %162 = arith.negf %160 : vector<2x128xf32>
    %163 = math.exp %162 : vector<2x128xf32>
    %cst_49 = arith.constant 1.000000e+00 : f32
    %164 = vector.broadcast %cst_49 : f32 to vector<2x128xf32>
    %165 = arith.addf %164, %163 : vector<2x128xf32>
    %166 = arith.divf %164, %165 : vector<2x128xf32>
    %167 = arith.select %5, %161, %166 : vector<2x128xi1>, vector<2x128xf32>
    %168 = vector.extract_strided_slice %167 {offsets = [0, 0], sizes = [2, 32], strides = [1, 1]} : vector<2x128xf32> to vector<2x32xf32>
    %169 = vector.extract_strided_slice %167 {offsets = [0, 32], sizes = [2, 32], strides = [1, 1]} : vector<2x128xf32> to vector<2x32xf32>
    %170 = vector.extract_strided_slice %167 {offsets = [0, 64], sizes = [2, 32], strides = [1, 1]} : vector<2x128xf32> to vector<2x32xf32>
    %171 = vector.extract_strided_slice %167 {offsets = [0, 96], sizes = [2, 32], strides = [1, 1]} : vector<2x128xf32> to vector<2x32xf32>
    %172 = arith.mulf %169, %128 : vector<2x32xf32>
    %173 = arith.mulf %168, %170 : vector<2x32xf32>
    %174 = arith.addf %172, %173 : vector<2x32xf32>
    %175 = math.tanh %174 : vector<2x32xf32>
    %176 = arith.mulf %171, %175 : vector<2x32xf32>
    %177 = tpu.concatenate %176, %152 in 1 : vector<2x32xf32>, vector<2x32xf32> -> vector<2x64xf32>
    %c0_50 = arith.constant 0 : index
    %c0_51 = arith.constant 0 : index
    %178 = vector.load %arg5[%c0_50, %c0_51] : memref<64x128xf32, #tpu.memory_space<vmem>>, vector<64x128xf32>
    %cst_52 = arith.constant dense<0.000000e+00> : vector<2x128xf32>
    %179 = tpu.matmul %177, %178, %cst_52 {dimension_numbers = #tpu.dot_dimension_numbers<[1], [0], [0], [1], [0, 0, 1, 1], [], []>} : vector<2x64xf32>, vector<64x128xf32>, vector<2x128xf32> -> vector<2x128xf32>
    %c0_53 = arith.constant 0 : index
    %c0_54 = arith.constant 0 : index
    %180 = vector.load %arg6[%c0_53, %c0_54] : memref<1x128xf32, #tpu.memory_space<vmem>>, vector<1x128xf32>
    %181 = vector.broadcast %180 : vector<1x128xf32> to vector<2x128xf32>
    %182 = arith.addf %179, %181 : vector<2x128xf32>
    %183 = math.tanh %182 : vector<2x128xf32>
    %184 = arith.negf %182 : vector<2x128xf32>
    %185 = math.exp %184 : vector<2x128xf32>
    %cst_55 = arith.constant 1.000000e+00 : f32
    %186 = vector.broadcast %cst_55 : f32 to vector<2x128xf32>
    %187 = arith.addf %186, %185 : vector<2x128xf32>
    %188 = arith.divf %186, %187 : vector<2x128xf32>
    %189 = arith.select %5, %183, %188 : vector<2x128xi1>, vector<2x128xf32>
    %190 = vector.extract_strided_slice %189 {offsets = [0, 0], sizes = [2, 32], strides = [1, 1]} : vector<2x128xf32> to vector<2x32xf32>
    %191 = vector.extract_strided_slice %189 {offsets = [0, 32], sizes = [2, 32], strides = [1, 1]} : vector<2x128xf32> to vector<2x32xf32>
    %192 = vector.extract_strided_slice %189 {offsets = [0, 64], sizes = [2, 32], strides = [1, 1]} : vector<2x128xf32> to vector<2x32xf32>
    %193 = vector.extract_strided_slice %189 {offsets = [0, 96], sizes = [2, 32], strides = [1, 1]} : vector<2x128xf32> to vector<2x32xf32>
    %194 = arith.mulf %191, %150 : vector<2x32xf32>
    %195 = arith.mulf %190, %192 : vector<2x32xf32>
    %196 = arith.addf %194, %195 : vector<2x32xf32>
    %197 = math.tanh %196 : vector<2x32xf32>
    %198 = arith.mulf %193, %197 : vector<2x32xf32>
    %199 = vector.extract_strided_slice %10 {offsets = [0, 4, 0], sizes = [2, 1, 128], strides = [1, 1, 1]} : vector<2x8x128xf32> to vector<2x1x128xf32>
    %200 = vector.shape_cast %199 : vector<2x1x128xf32> to vector<2x128xf32>
    %c0_56 = arith.constant 0 : index
    %c0_57 = arith.constant 0 : index
    %201 = vector.load %arg3[%c0_56, %c0_57] : memref<32x128xf32, #tpu.memory_space<vmem>>, vector<32x128xf32>
    %cst_58 = arith.constant dense<0.000000e+00> : vector<2x128xf32>
    %202 = tpu.matmul %176, %201, %cst_58 {dimension_numbers = #tpu.dot_dimension_numbers<[1], [0], [0], [1], [0, 0, 1, 1], [], []>} : vector<2x32xf32>, vector<32x128xf32>, vector<2x128xf32> -> vector<2x128xf32>
    %203 = arith.addf %200, %202 : vector<2x128xf32>
    %c0_59 = arith.constant 0 : index
    %c0_60 = arith.constant 0 : index
    %204 = vector.load %arg4[%c0_59, %c0_60] : memref<1x128xf32, #tpu.memory_space<vmem>>, vector<1x128xf32>
    %205 = vector.broadcast %204 : vector<1x128xf32> to vector<2x128xf32>
    %206 = arith.addf %203, %205 : vector<2x128xf32>
    %207 = math.tanh %206 : vector<2x128xf32>
    %208 = arith.negf %206 : vector<2x128xf32>
    %209 = math.exp %208 : vector<2x128xf32>
    %cst_61 = arith.constant 1.000000e+00 : f32
    %210 = vector.broadcast %cst_61 : f32 to vector<2x128xf32>
    %211 = arith.addf %210, %209 : vector<2x128xf32>
    %212 = arith.divf %210, %211 : vector<2x128xf32>
    %213 = arith.select %5, %207, %212 : vector<2x128xi1>, vector<2x128xf32>
    %214 = vector.extract_strided_slice %213 {offsets = [0, 0], sizes = [2, 32], strides = [1, 1]} : vector<2x128xf32> to vector<2x32xf32>
    %215 = vector.extract_strided_slice %213 {offsets = [0, 32], sizes = [2, 32], strides = [1, 1]} : vector<2x128xf32> to vector<2x32xf32>
    %216 = vector.extract_strided_slice %213 {offsets = [0, 64], sizes = [2, 32], strides = [1, 1]} : vector<2x128xf32> to vector<2x32xf32>
    %217 = vector.extract_strided_slice %213 {offsets = [0, 96], sizes = [2, 32], strides = [1, 1]} : vector<2x128xf32> to vector<2x32xf32>
    %218 = arith.mulf %215, %174 : vector<2x32xf32>
    %219 = arith.mulf %214, %216 : vector<2x32xf32>
    %220 = arith.addf %218, %219 : vector<2x32xf32>
    %221 = math.tanh %220 : vector<2x32xf32>
    %222 = arith.mulf %217, %221 : vector<2x32xf32>
    %223 = tpu.concatenate %222, %198 in 1 : vector<2x32xf32>, vector<2x32xf32> -> vector<2x64xf32>
    %c0_62 = arith.constant 0 : index
    %c0_63 = arith.constant 0 : index
    %224 = vector.load %arg5[%c0_62, %c0_63] : memref<64x128xf32, #tpu.memory_space<vmem>>, vector<64x128xf32>
    %cst_64 = arith.constant dense<0.000000e+00> : vector<2x128xf32>
    %225 = tpu.matmul %223, %224, %cst_64 {dimension_numbers = #tpu.dot_dimension_numbers<[1], [0], [0], [1], [0, 0, 1, 1], [], []>} : vector<2x64xf32>, vector<64x128xf32>, vector<2x128xf32> -> vector<2x128xf32>
    %c0_65 = arith.constant 0 : index
    %c0_66 = arith.constant 0 : index
    %226 = vector.load %arg6[%c0_65, %c0_66] : memref<1x128xf32, #tpu.memory_space<vmem>>, vector<1x128xf32>
    %227 = vector.broadcast %226 : vector<1x128xf32> to vector<2x128xf32>
    %228 = arith.addf %225, %227 : vector<2x128xf32>
    %229 = math.tanh %228 : vector<2x128xf32>
    %230 = arith.negf %228 : vector<2x128xf32>
    %231 = math.exp %230 : vector<2x128xf32>
    %cst_67 = arith.constant 1.000000e+00 : f32
    %232 = vector.broadcast %cst_67 : f32 to vector<2x128xf32>
    %233 = arith.addf %232, %231 : vector<2x128xf32>
    %234 = arith.divf %232, %233 : vector<2x128xf32>
    %235 = arith.select %5, %229, %234 : vector<2x128xi1>, vector<2x128xf32>
    %236 = vector.extract_strided_slice %235 {offsets = [0, 0], sizes = [2, 32], strides = [1, 1]} : vector<2x128xf32> to vector<2x32xf32>
    %237 = vector.extract_strided_slice %235 {offsets = [0, 32], sizes = [2, 32], strides = [1, 1]} : vector<2x128xf32> to vector<2x32xf32>
    %238 = vector.extract_strided_slice %235 {offsets = [0, 64], sizes = [2, 32], strides = [1, 1]} : vector<2x128xf32> to vector<2x32xf32>
    %239 = vector.extract_strided_slice %235 {offsets = [0, 96], sizes = [2, 32], strides = [1, 1]} : vector<2x128xf32> to vector<2x32xf32>
    %240 = arith.mulf %237, %196 : vector<2x32xf32>
    %241 = arith.mulf %236, %238 : vector<2x32xf32>
    %242 = arith.addf %240, %241 : vector<2x32xf32>
    %243 = math.tanh %242 : vector<2x32xf32>
    %244 = arith.mulf %239, %243 : vector<2x32xf32>
    %245 = vector.extract_strided_slice %10 {offsets = [0, 5, 0], sizes = [2, 1, 128], strides = [1, 1, 1]} : vector<2x8x128xf32> to vector<2x1x128xf32>
    %246 = vector.shape_cast %245 : vector<2x1x128xf32> to vector<2x128xf32>
    %c0_68 = arith.constant 0 : index
    %c0_69 = arith.constant 0 : index
    %247 = vector.load %arg3[%c0_68, %c0_69] : memref<32x128xf32, #tpu.memory_space<vmem>>, vector<32x128xf32>
    %cst_70 = arith.constant dense<0.000000e+00> : vector<2x128xf32>
    %248 = tpu.matmul %222, %247, %cst_70 {dimension_numbers = #tpu.dot_dimension_numbers<[1], [0], [0], [1], [0, 0, 1, 1], [], []>} : vector<2x32xf32>, vector<32x128xf32>, vector<2x128xf32> -> vector<2x128xf32>
    %249 = arith.addf %246, %248 : vector<2x128xf32>
    %c0_71 = arith.constant 0 : index
    %c0_72 = arith.constant 0 : index
    %250 = vector.load %arg4[%c0_71, %c0_72] : memref<1x128xf32, #tpu.memory_space<vmem>>, vector<1x128xf32>
    %251 = vector.broadcast %250 : vector<1x128xf32> to vector<2x128xf32>
    %252 = arith.addf %249, %251 : vector<2x128xf32>
    %253 = math.tanh %252 : vector<2x128xf32>
    %254 = arith.negf %252 : vector<2x128xf32>
    %255 = math.exp %254 : vector<2x128xf32>
    %cst_73 = arith.constant 1.000000e+00 : f32
    %256 = vector.broadcast %cst_73 : f32 to vector<2x128xf32>
    %257 = arith.addf %256, %255 : vector<2x128xf32>
    %258 = arith.divf %256, %257 : vector<2x128xf32>
    %259 = arith.select %5, %253, %258 : vector<2x128xi1>, vector<2x128xf32>
    %260 = vector.extract_strided_slice %259 {offsets = [0, 0], sizes = [2, 32], strides = [1, 1]} : vector<2x128xf32> to vector<2x32xf32>
    %261 = vector.extract_strided_slice %259 {offsets = [0, 32], sizes = [2, 32], strides = [1, 1]} : vector<2x128xf32> to vector<2x32xf32>
    %262 = vector.extract_strided_slice %259 {offsets = [0, 64], sizes = [2, 32], strides = [1, 1]} : vector<2x128xf32> to vector<2x32xf32>
    %263 = vector.extract_strided_slice %259 {offsets = [0, 96], sizes = [2, 32], strides = [1, 1]} : vector<2x128xf32> to vector<2x32xf32>
    %264 = arith.mulf %261, %220 : vector<2x32xf32>
    %265 = arith.mulf %260, %262 : vector<2x32xf32>
    %266 = arith.addf %264, %265 : vector<2x32xf32>
    %267 = math.tanh %266 : vector<2x32xf32>
    %268 = arith.mulf %263, %267 : vector<2x32xf32>
    %269 = tpu.concatenate %268, %244 in 1 : vector<2x32xf32>, vector<2x32xf32> -> vector<2x64xf32>
    %c0_74 = arith.constant 0 : index
    %c0_75 = arith.constant 0 : index
    %270 = vector.load %arg5[%c0_74, %c0_75] : memref<64x128xf32, #tpu.memory_space<vmem>>, vector<64x128xf32>
    %cst_76 = arith.constant dense<0.000000e+00> : vector<2x128xf32>
    %271 = tpu.matmul %269, %270, %cst_76 {dimension_numbers = #tpu.dot_dimension_numbers<[1], [0], [0], [1], [0, 0, 1, 1], [], []>} : vector<2x64xf32>, vector<64x128xf32>, vector<2x128xf32> -> vector<2x128xf32>
    %c0_77 = arith.constant 0 : index
    %c0_78 = arith.constant 0 : index
    %272 = vector.load %arg6[%c0_77, %c0_78] : memref<1x128xf32, #tpu.memory_space<vmem>>, vector<1x128xf32>
    %273 = vector.broadcast %272 : vector<1x128xf32> to vector<2x128xf32>
    %274 = arith.addf %271, %273 : vector<2x128xf32>
    %275 = math.tanh %274 : vector<2x128xf32>
    %276 = arith.negf %274 : vector<2x128xf32>
    %277 = math.exp %276 : vector<2x128xf32>
    %cst_79 = arith.constant 1.000000e+00 : f32
    %278 = vector.broadcast %cst_79 : f32 to vector<2x128xf32>
    %279 = arith.addf %278, %277 : vector<2x128xf32>
    %280 = arith.divf %278, %279 : vector<2x128xf32>
    %281 = arith.select %5, %275, %280 : vector<2x128xi1>, vector<2x128xf32>
    %282 = vector.extract_strided_slice %281 {offsets = [0, 0], sizes = [2, 32], strides = [1, 1]} : vector<2x128xf32> to vector<2x32xf32>
    %283 = vector.extract_strided_slice %281 {offsets = [0, 32], sizes = [2, 32], strides = [1, 1]} : vector<2x128xf32> to vector<2x32xf32>
    %284 = vector.extract_strided_slice %281 {offsets = [0, 64], sizes = [2, 32], strides = [1, 1]} : vector<2x128xf32> to vector<2x32xf32>
    %285 = vector.extract_strided_slice %281 {offsets = [0, 96], sizes = [2, 32], strides = [1, 1]} : vector<2x128xf32> to vector<2x32xf32>
    %286 = arith.mulf %283, %242 : vector<2x32xf32>
    %287 = arith.mulf %282, %284 : vector<2x32xf32>
    %288 = arith.addf %286, %287 : vector<2x32xf32>
    %289 = math.tanh %288 : vector<2x32xf32>
    %290 = arith.mulf %285, %289 : vector<2x32xf32>
    %291 = vector.extract_strided_slice %10 {offsets = [0, 6, 0], sizes = [2, 1, 128], strides = [1, 1, 1]} : vector<2x8x128xf32> to vector<2x1x128xf32>
    %292 = vector.shape_cast %291 : vector<2x1x128xf32> to vector<2x128xf32>
    %c0_80 = arith.constant 0 : index
    %c0_81 = arith.constant 0 : index
    %293 = vector.load %arg3[%c0_80, %c0_81] : memref<32x128xf32, #tpu.memory_space<vmem>>, vector<32x128xf32>
    %cst_82 = arith.constant dense<0.000000e+00> : vector<2x128xf32>
    %294 = tpu.matmul %268, %293, %cst_82 {dimension_numbers = #tpu.dot_dimension_numbers<[1], [0], [0], [1], [0, 0, 1, 1], [], []>} : vector<2x32xf32>, vector<32x128xf32>, vector<2x128xf32> -> vector<2x128xf32>
    %295 = arith.addf %292, %294 : vector<2x128xf32>
    %c0_83 = arith.constant 0 : index
    %c0_84 = arith.constant 0 : index
    %296 = vector.load %arg4[%c0_83, %c0_84] : memref<1x128xf32, #tpu.memory_space<vmem>>, vector<1x128xf32>
    %297 = vector.broadcast %296 : vector<1x128xf32> to vector<2x128xf32>
    %298 = arith.addf %295, %297 : vector<2x128xf32>
    %299 = math.tanh %298 : vector<2x128xf32>
    %300 = arith.negf %298 : vector<2x128xf32>
    %301 = math.exp %300 : vector<2x128xf32>
    %cst_85 = arith.constant 1.000000e+00 : f32
    %302 = vector.broadcast %cst_85 : f32 to vector<2x128xf32>
    %303 = arith.addf %302, %301 : vector<2x128xf32>
    %304 = arith.divf %302, %303 : vector<2x128xf32>
    %305 = arith.select %5, %299, %304 : vector<2x128xi1>, vector<2x128xf32>
    %306 = vector.extract_strided_slice %305 {offsets = [0, 0], sizes = [2, 32], strides = [1, 1]} : vector<2x128xf32> to vector<2x32xf32>
    %307 = vector.extract_strided_slice %305 {offsets = [0, 32], sizes = [2, 32], strides = [1, 1]} : vector<2x128xf32> to vector<2x32xf32>
    %308 = vector.extract_strided_slice %305 {offsets = [0, 64], sizes = [2, 32], strides = [1, 1]} : vector<2x128xf32> to vector<2x32xf32>
    %309 = vector.extract_strided_slice %305 {offsets = [0, 96], sizes = [2, 32], strides = [1, 1]} : vector<2x128xf32> to vector<2x32xf32>
    %310 = arith.mulf %307, %266 : vector<2x32xf32>
    %311 = arith.mulf %306, %308 : vector<2x32xf32>
    %312 = arith.addf %310, %311 : vector<2x32xf32>
    %313 = math.tanh %312 : vector<2x32xf32>
    %314 = arith.mulf %309, %313 : vector<2x32xf32>
    %315 = tpu.concatenate %314, %290 in 1 : vector<2x32xf32>, vector<2x32xf32> -> vector<2x64xf32>
    %c0_86 = arith.constant 0 : index
    %c0_87 = arith.constant 0 : index
    %316 = vector.load %arg5[%c0_86, %c0_87] : memref<64x128xf32, #tpu.memory_space<vmem>>, vector<64x128xf32>
    %cst_88 = arith.constant dense<0.000000e+00> : vector<2x128xf32>
    %317 = tpu.matmul %315, %316, %cst_88 {dimension_numbers = #tpu.dot_dimension_numbers<[1], [0], [0], [1], [0, 0, 1, 1], [], []>} : vector<2x64xf32>, vector<64x128xf32>, vector<2x128xf32> -> vector<2x128xf32>
    %c0_89 = arith.constant 0 : index
    %c0_90 = arith.constant 0 : index
    %318 = vector.load %arg6[%c0_89, %c0_90] : memref<1x128xf32, #tpu.memory_space<vmem>>, vector<1x128xf32>
    %319 = vector.broadcast %318 : vector<1x128xf32> to vector<2x128xf32>
    %320 = arith.addf %317, %319 : vector<2x128xf32>
    %321 = math.tanh %320 : vector<2x128xf32>
    %322 = arith.negf %320 : vector<2x128xf32>
    %323 = math.exp %322 : vector<2x128xf32>
    %cst_91 = arith.constant 1.000000e+00 : f32
    %324 = vector.broadcast %cst_91 : f32 to vector<2x128xf32>
    %325 = arith.addf %324, %323 : vector<2x128xf32>
    %326 = arith.divf %324, %325 : vector<2x128xf32>
    %327 = arith.select %5, %321, %326 : vector<2x128xi1>, vector<2x128xf32>
    %328 = vector.extract_strided_slice %327 {offsets = [0, 0], sizes = [2, 32], strides = [1, 1]} : vector<2x128xf32> to vector<2x32xf32>
    %329 = vector.extract_strided_slice %327 {offsets = [0, 32], sizes = [2, 32], strides = [1, 1]} : vector<2x128xf32> to vector<2x32xf32>
    %330 = vector.extract_strided_slice %327 {offsets = [0, 64], sizes = [2, 32], strides = [1, 1]} : vector<2x128xf32> to vector<2x32xf32>
    %331 = vector.extract_strided_slice %327 {offsets = [0, 96], sizes = [2, 32], strides = [1, 1]} : vector<2x128xf32> to vector<2x32xf32>
    %332 = arith.mulf %329, %288 : vector<2x32xf32>
    %333 = arith.mulf %328, %330 : vector<2x32xf32>
    %334 = arith.addf %332, %333 : vector<2x32xf32>
    %335 = math.tanh %334 : vector<2x32xf32>
    %336 = arith.mulf %331, %335 : vector<2x32xf32>
    %337 = vector.extract_strided_slice %10 {offsets = [0, 7, 0], sizes = [2, 1, 128], strides = [1, 1, 1]} : vector<2x8x128xf32> to vector<2x1x128xf32>
    %338 = vector.shape_cast %337 : vector<2x1x128xf32> to vector<2x128xf32>
    %c0_92 = arith.constant 0 : index
    %c0_93 = arith.constant 0 : index
    %339 = vector.load %arg3[%c0_92, %c0_93] : memref<32x128xf32, #tpu.memory_space<vmem>>, vector<32x128xf32>
    %cst_94 = arith.constant dense<0.000000e+00> : vector<2x128xf32>
    %340 = tpu.matmul %314, %339, %cst_94 {dimension_numbers = #tpu.dot_dimension_numbers<[1], [0], [0], [1], [0, 0, 1, 1], [], []>} : vector<2x32xf32>, vector<32x128xf32>, vector<2x128xf32> -> vector<2x128xf32>
    %341 = arith.addf %338, %340 : vector<2x128xf32>
    %c0_95 = arith.constant 0 : index
    %c0_96 = arith.constant 0 : index
    %342 = vector.load %arg4[%c0_95, %c0_96] : memref<1x128xf32, #tpu.memory_space<vmem>>, vector<1x128xf32>
    %343 = vector.broadcast %342 : vector<1x128xf32> to vector<2x128xf32>
    %344 = arith.addf %341, %343 : vector<2x128xf32>
    %345 = math.tanh %344 : vector<2x128xf32>
    %346 = arith.negf %344 : vector<2x128xf32>
    %347 = math.exp %346 : vector<2x128xf32>
    %cst_97 = arith.constant 1.000000e+00 : f32
    %348 = vector.broadcast %cst_97 : f32 to vector<2x128xf32>
    %349 = arith.addf %348, %347 : vector<2x128xf32>
    %350 = arith.divf %348, %349 : vector<2x128xf32>
    %351 = arith.select %5, %345, %350 : vector<2x128xi1>, vector<2x128xf32>
    %352 = vector.extract_strided_slice %351 {offsets = [0, 0], sizes = [2, 32], strides = [1, 1]} : vector<2x128xf32> to vector<2x32xf32>
    %353 = vector.extract_strided_slice %351 {offsets = [0, 32], sizes = [2, 32], strides = [1, 1]} : vector<2x128xf32> to vector<2x32xf32>
    %354 = vector.extract_strided_slice %351 {offsets = [0, 64], sizes = [2, 32], strides = [1, 1]} : vector<2x128xf32> to vector<2x32xf32>
    %355 = vector.extract_strided_slice %351 {offsets = [0, 96], sizes = [2, 32], strides = [1, 1]} : vector<2x128xf32> to vector<2x32xf32>
    %356 = arith.mulf %353, %312 : vector<2x32xf32>
    %357 = arith.mulf %352, %354 : vector<2x32xf32>
    %358 = arith.addf %356, %357 : vector<2x32xf32>
    %359 = math.tanh %358 : vector<2x32xf32>
    %360 = arith.mulf %355, %359 : vector<2x32xf32>
    %361 = tpu.concatenate %360, %336 in 1 : vector<2x32xf32>, vector<2x32xf32> -> vector<2x64xf32>
    %c0_98 = arith.constant 0 : index
    %c0_99 = arith.constant 0 : index
    %362 = vector.load %arg5[%c0_98, %c0_99] : memref<64x128xf32, #tpu.memory_space<vmem>>, vector<64x128xf32>
    %cst_100 = arith.constant dense<0.000000e+00> : vector<2x128xf32>
    %363 = tpu.matmul %361, %362, %cst_100 {dimension_numbers = #tpu.dot_dimension_numbers<[1], [0], [0], [1], [0, 0, 1, 1], [], []>} : vector<2x64xf32>, vector<64x128xf32>, vector<2x128xf32> -> vector<2x128xf32>
    %c0_101 = arith.constant 0 : index
    %c0_102 = arith.constant 0 : index
    %364 = vector.load %arg6[%c0_101, %c0_102] : memref<1x128xf32, #tpu.memory_space<vmem>>, vector<1x128xf32>
    %365 = vector.broadcast %364 : vector<1x128xf32> to vector<2x128xf32>
    %366 = arith.addf %363, %365 : vector<2x128xf32>
    %367 = math.tanh %366 : vector<2x128xf32>
    %368 = arith.negf %366 : vector<2x128xf32>
    %369 = math.exp %368 : vector<2x128xf32>
    %cst_103 = arith.constant 1.000000e+00 : f32
    %370 = vector.broadcast %cst_103 : f32 to vector<2x128xf32>
    %371 = arith.addf %370, %369 : vector<2x128xf32>
    %372 = arith.divf %370, %371 : vector<2x128xf32>
    %373 = arith.select %5, %367, %372 : vector<2x128xi1>, vector<2x128xf32>
    %374 = vector.extract_strided_slice %373 {offsets = [0, 0], sizes = [2, 32], strides = [1, 1]} : vector<2x128xf32> to vector<2x32xf32>
    %375 = vector.extract_strided_slice %373 {offsets = [0, 32], sizes = [2, 32], strides = [1, 1]} : vector<2x128xf32> to vector<2x32xf32>
    %376 = vector.extract_strided_slice %373 {offsets = [0, 64], sizes = [2, 32], strides = [1, 1]} : vector<2x128xf32> to vector<2x32xf32>
    %377 = vector.extract_strided_slice %373 {offsets = [0, 96], sizes = [2, 32], strides = [1, 1]} : vector<2x128xf32> to vector<2x32xf32>
    %378 = arith.mulf %375, %334 : vector<2x32xf32>
    %379 = arith.mulf %374, %376 : vector<2x32xf32>
    %380 = arith.addf %378, %379 : vector<2x32xf32>
    %381 = math.tanh %380 : vector<2x32xf32>
    %382 = arith.mulf %377, %381 : vector<2x32xf32>
    %c0_104 = arith.constant 0 : index
    %c0_105 = arith.constant 0 : index
    %383 = vector.load %arg1[%c0_104, %c0_105] : memref<2x2xf32, #tpu.memory_space<vmem>>, vector<2x2xf32>
    %c0_106 = arith.constant 0 : index
    %c0_107 = arith.constant 0 : index
    %384 = vector.load %arg13[%c0_106, %c0_107] : memref<2x4xf32, #tpu.memory_space<vmem>>, vector<2x4xf32>
    %c0_108 = arith.constant 0 : index
    %c0_109 = arith.constant 0 : index
    %385 = vector.load %arg14[%c0_108, %c0_109] : memref<1x4xf32, #tpu.memory_space<vmem>>, vector<1x4xf32>
    %386 = vector.extract_strided_slice %383 {offsets = [0, 0], sizes = [2, 1], strides = [1, 1]} : vector<2x2xf32> to vector<2x1xf32>
    %387 = vector.extract_strided_slice %384 {offsets = [0, 0], sizes = [1, 4], strides = [1, 1]} : vector<2x4xf32> to vector<1x4xf32>
    %388 = vector.broadcast %386 : vector<2x1xf32> to vector<2x4xf32>
    %389 = vector.broadcast %387 : vector<1x4xf32> to vector<2x4xf32>
    %390 = arith.mulf %388, %389 : vector<2x4xf32>
    %391 = vector.broadcast %385 : vector<1x4xf32> to vector<2x4xf32>
    %392 = arith.addf %391, %390 : vector<2x4xf32>
    %393 = vector.extract_strided_slice %383 {offsets = [0, 1], sizes = [2, 1], strides = [1, 1]} : vector<2x2xf32> to vector<2x1xf32>
    %394 = vector.extract_strided_slice %384 {offsets = [1, 0], sizes = [1, 4], strides = [1, 1]} : vector<2x4xf32> to vector<1x4xf32>
    %395 = vector.broadcast %393 : vector<2x1xf32> to vector<2x4xf32>
    %396 = vector.broadcast %394 : vector<1x4xf32> to vector<2x4xf32>
    %397 = arith.mulf %395, %396 : vector<2x4xf32>
    %398 = arith.addf %392, %397 : vector<2x4xf32>
    %399 = tpu.concatenate %398, %360 in 1 : vector<2x4xf32>, vector<2x32xf32> -> vector<2x36xf32>
    %c0_110 = arith.constant 0 : index
    %c0_111 = arith.constant 0 : index
    %400 = vector.load %arg7[%c0_110, %c0_111] : memref<36x128xf32, #tpu.memory_space<vmem>>, vector<36x128xf32>
    %cst_112 = arith.constant dense<0.000000e+00> : vector<2x128xf32>
    %401 = tpu.matmul %399, %400, %cst_112 {dimension_numbers = #tpu.dot_dimension_numbers<[1], [0], [0], [1], [0, 0, 1, 1], [], []>} : vector<2x36xf32>, vector<36x128xf32>, vector<2x128xf32> -> vector<2x128xf32>
    %c0_113 = arith.constant 0 : index
    %c0_114 = arith.constant 0 : index
    %402 = vector.load %arg8[%c0_113, %c0_114] : memref<1x128xf32, #tpu.memory_space<vmem>>, vector<1x128xf32>
    %403 = vector.broadcast %402 : vector<1x128xf32> to vector<2x128xf32>
    %404 = arith.addf %401, %403 : vector<2x128xf32>
    %405 = math.tanh %404 : vector<2x128xf32>
    %406 = arith.negf %404 : vector<2x128xf32>
    %407 = math.exp %406 : vector<2x128xf32>
    %cst_115 = arith.constant 1.000000e+00 : f32
    %408 = vector.broadcast %cst_115 : f32 to vector<2x128xf32>
    %409 = arith.addf %408, %407 : vector<2x128xf32>
    %410 = arith.divf %408, %409 : vector<2x128xf32>
    %411 = arith.select %5, %405, %410 : vector<2x128xi1>, vector<2x128xf32>
    %412 = vector.extract_strided_slice %411 {offsets = [0, 0], sizes = [2, 32], strides = [1, 1]} : vector<2x128xf32> to vector<2x32xf32>
    %413 = vector.extract_strided_slice %411 {offsets = [0, 32], sizes = [2, 32], strides = [1, 1]} : vector<2x128xf32> to vector<2x32xf32>
    %414 = vector.extract_strided_slice %411 {offsets = [0, 64], sizes = [2, 32], strides = [1, 1]} : vector<2x128xf32> to vector<2x32xf32>
    %415 = vector.extract_strided_slice %411 {offsets = [0, 96], sizes = [2, 32], strides = [1, 1]} : vector<2x128xf32> to vector<2x32xf32>
    %416 = arith.mulf %413, %358 : vector<2x32xf32>
    %417 = arith.mulf %412, %414 : vector<2x32xf32>
    %418 = arith.addf %416, %417 : vector<2x32xf32>
    %419 = math.tanh %418 : vector<2x32xf32>
    %420 = arith.mulf %415, %419 : vector<2x32xf32>
    %421 = tpu.concatenate %420, %382 in 1 : vector<2x32xf32>, vector<2x32xf32> -> vector<2x64xf32>
    %c0_116 = arith.constant 0 : index
    %c0_117 = arith.constant 0 : index
    %422 = vector.load %arg9[%c0_116, %c0_117] : memref<64x128xf32, #tpu.memory_space<vmem>>, vector<64x128xf32>
    %cst_118 = arith.constant dense<0.000000e+00> : vector<2x128xf32>
    %423 = tpu.matmul %421, %422, %cst_118 {dimension_numbers = #tpu.dot_dimension_numbers<[1], [0], [0], [1], [0, 0, 1, 1], [], []>} : vector<2x64xf32>, vector<64x128xf32>, vector<2x128xf32> -> vector<2x128xf32>
    %c0_119 = arith.constant 0 : index
    %c0_120 = arith.constant 0 : index
    %424 = vector.load %arg10[%c0_119, %c0_120] : memref<1x128xf32, #tpu.memory_space<vmem>>, vector<1x128xf32>
    %425 = vector.broadcast %424 : vector<1x128xf32> to vector<2x128xf32>
    %426 = arith.addf %423, %425 : vector<2x128xf32>
    %427 = math.tanh %426 : vector<2x128xf32>
    %428 = arith.negf %426 : vector<2x128xf32>
    %429 = math.exp %428 : vector<2x128xf32>
    %cst_121 = arith.constant 1.000000e+00 : f32
    %430 = vector.broadcast %cst_121 : f32 to vector<2x128xf32>
    %431 = arith.addf %430, %429 : vector<2x128xf32>
    %432 = arith.divf %430, %431 : vector<2x128xf32>
    %433 = arith.select %5, %427, %432 : vector<2x128xi1>, vector<2x128xf32>
    %434 = vector.extract_strided_slice %433 {offsets = [0, 0], sizes = [2, 32], strides = [1, 1]} : vector<2x128xf32> to vector<2x32xf32>
    %435 = vector.extract_strided_slice %433 {offsets = [0, 32], sizes = [2, 32], strides = [1, 1]} : vector<2x128xf32> to vector<2x32xf32>
    %436 = vector.extract_strided_slice %433 {offsets = [0, 64], sizes = [2, 32], strides = [1, 1]} : vector<2x128xf32> to vector<2x32xf32>
    %437 = vector.extract_strided_slice %433 {offsets = [0, 96], sizes = [2, 32], strides = [1, 1]} : vector<2x128xf32> to vector<2x32xf32>
    %438 = arith.mulf %435, %380 : vector<2x32xf32>
    %439 = arith.mulf %434, %436 : vector<2x32xf32>
    %440 = arith.addf %438, %439 : vector<2x32xf32>
    %441 = math.tanh %440 : vector<2x32xf32>
    %442 = arith.mulf %437, %441 : vector<2x32xf32>
    %c0_122 = arith.constant 0 : index
    %c0_123 = arith.constant 0 : index
    %443 = vector.load %arg11[%c0_122, %c0_123] : memref<32x2xf32, #tpu.memory_space<vmem>>, vector<32x2xf32>
    %cst_124 = arith.constant dense<0.000000e+00> : vector<2x2xf32>
    %444 = tpu.matmul %442, %443, %cst_124 {dimension_numbers = #tpu.dot_dimension_numbers<[1], [0], [0], [1], [0, 0, 1, 1], [], []>} : vector<2x32xf32>, vector<32x2xf32>, vector<2x2xf32> -> vector<2x2xf32>
    %c0_125 = arith.constant 0 : index
    %c0_126 = arith.constant 0 : index
    %445 = vector.load %arg12[%c0_125, %c0_126] : memref<1x2xf32, #tpu.memory_space<vmem>>, vector<1x2xf32>
    %446 = vector.broadcast %445 : vector<1x2xf32> to vector<2x2xf32>
    %447 = arith.addf %444, %446 : vector<2x2xf32>
    %448 = vector.extract_strided_slice %447 {offsets = [0, 0], sizes = [2, 1], strides = [1, 1]} : vector<2x2xf32> to vector<2x1xf32>
    %449 = vector.extract_strided_slice %384 {offsets = [0, 0], sizes = [1, 4], strides = [1, 1]} : vector<2x4xf32> to vector<1x4xf32>
    %450 = vector.broadcast %448 : vector<2x1xf32> to vector<2x4xf32>
    %451 = vector.broadcast %449 : vector<1x4xf32> to vector<2x4xf32>
    %452 = arith.mulf %450, %451 : vector<2x4xf32>
    %453 = vector.broadcast %385 : vector<1x4xf32> to vector<2x4xf32>
    %454 = arith.addf %453, %452 : vector<2x4xf32>
    %455 = vector.extract_strided_slice %447 {offsets = [0, 1], sizes = [2, 1], strides = [1, 1]} : vector<2x2xf32> to vector<2x1xf32>
    %456 = vector.extract_strided_slice %384 {offsets = [1, 0], sizes = [1, 4], strides = [1, 1]} : vector<2x4xf32> to vector<1x4xf32>
    %457 = vector.broadcast %455 : vector<2x1xf32> to vector<2x4xf32>
    %458 = vector.broadcast %456 : vector<1x4xf32> to vector<2x4xf32>
    %459 = arith.mulf %457, %458 : vector<2x4xf32>
    %460 = arith.addf %454, %459 : vector<2x4xf32>
    %461 = tpu.concatenate %460, %420 in 1 : vector<2x4xf32>, vector<2x32xf32> -> vector<2x36xf32>
    %c0_127 = arith.constant 0 : index
    %c0_128 = arith.constant 0 : index
    %462 = vector.load %arg7[%c0_127, %c0_128] : memref<36x128xf32, #tpu.memory_space<vmem>>, vector<36x128xf32>
    %cst_129 = arith.constant dense<0.000000e+00> : vector<2x128xf32>
    %463 = tpu.matmul %461, %462, %cst_129 {dimension_numbers = #tpu.dot_dimension_numbers<[1], [0], [0], [1], [0, 0, 1, 1], [], []>} : vector<2x36xf32>, vector<36x128xf32>, vector<2x128xf32> -> vector<2x128xf32>
    %c0_130 = arith.constant 0 : index
    %c0_131 = arith.constant 0 : index
    %464 = vector.load %arg8[%c0_130, %c0_131] : memref<1x128xf32, #tpu.memory_space<vmem>>, vector<1x128xf32>
    %465 = vector.broadcast %464 : vector<1x128xf32> to vector<2x128xf32>
    %466 = arith.addf %463, %465 : vector<2x128xf32>
    %467 = math.tanh %466 : vector<2x128xf32>
    %468 = arith.negf %466 : vector<2x128xf32>
    %469 = math.exp %468 : vector<2x128xf32>
    %cst_132 = arith.constant 1.000000e+00 : f32
    %470 = vector.broadcast %cst_132 : f32 to vector<2x128xf32>
    %471 = arith.addf %470, %469 : vector<2x128xf32>
    %472 = arith.divf %470, %471 : vector<2x128xf32>
    %473 = arith.select %5, %467, %472 : vector<2x128xi1>, vector<2x128xf32>
    %474 = vector.extract_strided_slice %473 {offsets = [0, 0], sizes = [2, 32], strides = [1, 1]} : vector<2x128xf32> to vector<2x32xf32>
    %475 = vector.extract_strided_slice %473 {offsets = [0, 32], sizes = [2, 32], strides = [1, 1]} : vector<2x128xf32> to vector<2x32xf32>
    %476 = vector.extract_strided_slice %473 {offsets = [0, 64], sizes = [2, 32], strides = [1, 1]} : vector<2x128xf32> to vector<2x32xf32>
    %477 = vector.extract_strided_slice %473 {offsets = [0, 96], sizes = [2, 32], strides = [1, 1]} : vector<2x128xf32> to vector<2x32xf32>
    %478 = arith.mulf %475, %418 : vector<2x32xf32>
    %479 = arith.mulf %474, %476 : vector<2x32xf32>
    %480 = arith.addf %478, %479 : vector<2x32xf32>
    %481 = math.tanh %480 : vector<2x32xf32>
    %482 = arith.mulf %477, %481 : vector<2x32xf32>
    %483 = tpu.concatenate %482, %442 in 1 : vector<2x32xf32>, vector<2x32xf32> -> vector<2x64xf32>
    %c0_133 = arith.constant 0 : index
    %c0_134 = arith.constant 0 : index
    %484 = vector.load %arg9[%c0_133, %c0_134] : memref<64x128xf32, #tpu.memory_space<vmem>>, vector<64x128xf32>
    %cst_135 = arith.constant dense<0.000000e+00> : vector<2x128xf32>
    %485 = tpu.matmul %483, %484, %cst_135 {dimension_numbers = #tpu.dot_dimension_numbers<[1], [0], [0], [1], [0, 0, 1, 1], [], []>} : vector<2x64xf32>, vector<64x128xf32>, vector<2x128xf32> -> vector<2x128xf32>
    %c0_136 = arith.constant 0 : index
    %c0_137 = arith.constant 0 : index
    %486 = vector.load %arg10[%c0_136, %c0_137] : memref<1x128xf32, #tpu.memory_space<vmem>>, vector<1x128xf32>
    %487 = vector.broadcast %486 : vector<1x128xf32> to vector<2x128xf32>
    %488 = arith.addf %485, %487 : vector<2x128xf32>
    %489 = math.tanh %488 : vector<2x128xf32>
    %490 = arith.negf %488 : vector<2x128xf32>
    %491 = math.exp %490 : vector<2x128xf32>
    %cst_138 = arith.constant 1.000000e+00 : f32
    %492 = vector.broadcast %cst_138 : f32 to vector<2x128xf32>
    %493 = arith.addf %492, %491 : vector<2x128xf32>
    %494 = arith.divf %492, %493 : vector<2x128xf32>
    %495 = arith.select %5, %489, %494 : vector<2x128xi1>, vector<2x128xf32>
    %496 = vector.extract_strided_slice %495 {offsets = [0, 0], sizes = [2, 32], strides = [1, 1]} : vector<2x128xf32> to vector<2x32xf32>
    %497 = vector.extract_strided_slice %495 {offsets = [0, 32], sizes = [2, 32], strides = [1, 1]} : vector<2x128xf32> to vector<2x32xf32>
    %498 = vector.extract_strided_slice %495 {offsets = [0, 64], sizes = [2, 32], strides = [1, 1]} : vector<2x128xf32> to vector<2x32xf32>
    %499 = vector.extract_strided_slice %495 {offsets = [0, 96], sizes = [2, 32], strides = [1, 1]} : vector<2x128xf32> to vector<2x32xf32>
    %500 = arith.mulf %497, %440 : vector<2x32xf32>
    %501 = arith.mulf %496, %498 : vector<2x32xf32>
    %502 = arith.addf %500, %501 : vector<2x32xf32>
    %503 = math.tanh %502 : vector<2x32xf32>
    %504 = arith.mulf %499, %503 : vector<2x32xf32>
    %c0_139 = arith.constant 0 : index
    %c0_140 = arith.constant 0 : index
    %505 = vector.load %arg11[%c0_139, %c0_140] : memref<32x2xf32, #tpu.memory_space<vmem>>, vector<32x2xf32>
    %cst_141 = arith.constant dense<0.000000e+00> : vector<2x2xf32>
    %506 = tpu.matmul %504, %505, %cst_141 {dimension_numbers = #tpu.dot_dimension_numbers<[1], [0], [0], [1], [0, 0, 1, 1], [], []>} : vector<2x32xf32>, vector<32x2xf32>, vector<2x2xf32> -> vector<2x2xf32>
    %c0_142 = arith.constant 0 : index
    %c0_143 = arith.constant 0 : index
    %507 = vector.load %arg12[%c0_142, %c0_143] : memref<1x2xf32, #tpu.memory_space<vmem>>, vector<1x2xf32>
    %508 = vector.broadcast %507 : vector<1x2xf32> to vector<2x2xf32>
    %509 = arith.addf %506, %508 : vector<2x2xf32>
    %510 = vector.extract_strided_slice %509 {offsets = [0, 0], sizes = [2, 1], strides = [1, 1]} : vector<2x2xf32> to vector<2x1xf32>
    %511 = vector.extract_strided_slice %384 {offsets = [0, 0], sizes = [1, 4], strides = [1, 1]} : vector<2x4xf32> to vector<1x4xf32>
    %512 = vector.broadcast %510 : vector<2x1xf32> to vector<2x4xf32>
    %513 = vector.broadcast %511 : vector<1x4xf32> to vector<2x4xf32>
    %514 = arith.mulf %512, %513 : vector<2x4xf32>
    %515 = vector.broadcast %385 : vector<1x4xf32> to vector<2x4xf32>
    %516 = arith.addf %515, %514 : vector<2x4xf32>
    %517 = vector.extract_strided_slice %509 {offsets = [0, 1], sizes = [2, 1], strides = [1, 1]} : vector<2x2xf32> to vector<2x1xf32>
    %518 = vector.extract_strided_slice %384 {offsets = [1, 0], sizes = [1, 4], strides = [1, 1]} : vector<2x4xf32> to vector<1x4xf32>
    %519 = vector.broadcast %517 : vector<2x1xf32> to vector<2x4xf32>
    %520 = vector.broadcast %518 : vector<1x4xf32> to vector<2x4xf32>
    %521 = arith.mulf %519, %520 : vector<2x4xf32>
    %522 = arith.addf %516, %521 : vector<2x4xf32>
    %523 = tpu.concatenate %522, %482 in 1 : vector<2x4xf32>, vector<2x32xf32> -> vector<2x36xf32>
    %c0_144 = arith.constant 0 : index
    %c0_145 = arith.constant 0 : index
    %524 = vector.load %arg7[%c0_144, %c0_145] : memref<36x128xf32, #tpu.memory_space<vmem>>, vector<36x128xf32>
    %cst_146 = arith.constant dense<0.000000e+00> : vector<2x128xf32>
    %525 = tpu.matmul %523, %524, %cst_146 {dimension_numbers = #tpu.dot_dimension_numbers<[1], [0], [0], [1], [0, 0, 1, 1], [], []>} : vector<2x36xf32>, vector<36x128xf32>, vector<2x128xf32> -> vector<2x128xf32>
    %c0_147 = arith.constant 0 : index
    %c0_148 = arith.constant 0 : index
    %526 = vector.load %arg8[%c0_147, %c0_148] : memref<1x128xf32, #tpu.memory_space<vmem>>, vector<1x128xf32>
    %527 = vector.broadcast %526 : vector<1x128xf32> to vector<2x128xf32>
    %528 = arith.addf %525, %527 : vector<2x128xf32>
    %529 = math.tanh %528 : vector<2x128xf32>
    %530 = arith.negf %528 : vector<2x128xf32>
    %531 = math.exp %530 : vector<2x128xf32>
    %cst_149 = arith.constant 1.000000e+00 : f32
    %532 = vector.broadcast %cst_149 : f32 to vector<2x128xf32>
    %533 = arith.addf %532, %531 : vector<2x128xf32>
    %534 = arith.divf %532, %533 : vector<2x128xf32>
    %535 = arith.select %5, %529, %534 : vector<2x128xi1>, vector<2x128xf32>
    %536 = vector.extract_strided_slice %535 {offsets = [0, 0], sizes = [2, 32], strides = [1, 1]} : vector<2x128xf32> to vector<2x32xf32>
    %537 = vector.extract_strided_slice %535 {offsets = [0, 32], sizes = [2, 32], strides = [1, 1]} : vector<2x128xf32> to vector<2x32xf32>
    %538 = vector.extract_strided_slice %535 {offsets = [0, 64], sizes = [2, 32], strides = [1, 1]} : vector<2x128xf32> to vector<2x32xf32>
    %539 = vector.extract_strided_slice %535 {offsets = [0, 96], sizes = [2, 32], strides = [1, 1]} : vector<2x128xf32> to vector<2x32xf32>
    %540 = arith.mulf %537, %480 : vector<2x32xf32>
    %541 = arith.mulf %536, %538 : vector<2x32xf32>
    %542 = arith.addf %540, %541 : vector<2x32xf32>
    %543 = math.tanh %542 : vector<2x32xf32>
    %544 = arith.mulf %539, %543 : vector<2x32xf32>
    %545 = tpu.concatenate %544, %504 in 1 : vector<2x32xf32>, vector<2x32xf32> -> vector<2x64xf32>
    %c0_150 = arith.constant 0 : index
    %c0_151 = arith.constant 0 : index
    %546 = vector.load %arg9[%c0_150, %c0_151] : memref<64x128xf32, #tpu.memory_space<vmem>>, vector<64x128xf32>
    %cst_152 = arith.constant dense<0.000000e+00> : vector<2x128xf32>
    %547 = tpu.matmul %545, %546, %cst_152 {dimension_numbers = #tpu.dot_dimension_numbers<[1], [0], [0], [1], [0, 0, 1, 1], [], []>} : vector<2x64xf32>, vector<64x128xf32>, vector<2x128xf32> -> vector<2x128xf32>
    %c0_153 = arith.constant 0 : index
    %c0_154 = arith.constant 0 : index
    %548 = vector.load %arg10[%c0_153, %c0_154] : memref<1x128xf32, #tpu.memory_space<vmem>>, vector<1x128xf32>
    %549 = vector.broadcast %548 : vector<1x128xf32> to vector<2x128xf32>
    %550 = arith.addf %547, %549 : vector<2x128xf32>
    %551 = math.tanh %550 : vector<2x128xf32>
    %552 = arith.negf %550 : vector<2x128xf32>
    %553 = math.exp %552 : vector<2x128xf32>
    %cst_155 = arith.constant 1.000000e+00 : f32
    %554 = vector.broadcast %cst_155 : f32 to vector<2x128xf32>
    %555 = arith.addf %554, %553 : vector<2x128xf32>
    %556 = arith.divf %554, %555 : vector<2x128xf32>
    %557 = arith.select %5, %551, %556 : vector<2x128xi1>, vector<2x128xf32>
    %558 = vector.extract_strided_slice %557 {offsets = [0, 0], sizes = [2, 32], strides = [1, 1]} : vector<2x128xf32> to vector<2x32xf32>
    %559 = vector.extract_strided_slice %557 {offsets = [0, 32], sizes = [2, 32], strides = [1, 1]} : vector<2x128xf32> to vector<2x32xf32>
    %560 = vector.extract_strided_slice %557 {offsets = [0, 64], sizes = [2, 32], strides = [1, 1]} : vector<2x128xf32> to vector<2x32xf32>
    %561 = vector.extract_strided_slice %557 {offsets = [0, 96], sizes = [2, 32], strides = [1, 1]} : vector<2x128xf32> to vector<2x32xf32>
    %562 = arith.mulf %559, %502 : vector<2x32xf32>
    %563 = arith.mulf %558, %560 : vector<2x32xf32>
    %564 = arith.addf %562, %563 : vector<2x32xf32>
    %565 = math.tanh %564 : vector<2x32xf32>
    %566 = arith.mulf %561, %565 : vector<2x32xf32>
    %c0_156 = arith.constant 0 : index
    %c0_157 = arith.constant 0 : index
    %567 = vector.load %arg11[%c0_156, %c0_157] : memref<32x2xf32, #tpu.memory_space<vmem>>, vector<32x2xf32>
    %cst_158 = arith.constant dense<0.000000e+00> : vector<2x2xf32>
    %568 = tpu.matmul %566, %567, %cst_158 {dimension_numbers = #tpu.dot_dimension_numbers<[1], [0], [0], [1], [0, 0, 1, 1], [], []>} : vector<2x32xf32>, vector<32x2xf32>, vector<2x2xf32> -> vector<2x2xf32>
    %c0_159 = arith.constant 0 : index
    %c0_160 = arith.constant 0 : index
    %569 = vector.load %arg12[%c0_159, %c0_160] : memref<1x2xf32, #tpu.memory_space<vmem>>, vector<1x2xf32>
    %570 = vector.broadcast %569 : vector<1x2xf32> to vector<2x2xf32>
    %571 = arith.addf %568, %570 : vector<2x2xf32>
    %572 = vector.extract_strided_slice %571 {offsets = [0, 0], sizes = [2, 1], strides = [1, 1]} : vector<2x2xf32> to vector<2x1xf32>
    %573 = vector.extract_strided_slice %384 {offsets = [0, 0], sizes = [1, 4], strides = [1, 1]} : vector<2x4xf32> to vector<1x4xf32>
    %574 = vector.broadcast %572 : vector<2x1xf32> to vector<2x4xf32>
    %575 = vector.broadcast %573 : vector<1x4xf32> to vector<2x4xf32>
    %576 = arith.mulf %574, %575 : vector<2x4xf32>
    %577 = vector.broadcast %385 : vector<1x4xf32> to vector<2x4xf32>
    %578 = arith.addf %577, %576 : vector<2x4xf32>
    %579 = vector.extract_strided_slice %571 {offsets = [0, 1], sizes = [2, 1], strides = [1, 1]} : vector<2x2xf32> to vector<2x1xf32>
    %580 = vector.extract_strided_slice %384 {offsets = [1, 0], sizes = [1, 4], strides = [1, 1]} : vector<2x4xf32> to vector<1x4xf32>
    %581 = vector.broadcast %579 : vector<2x1xf32> to vector<2x4xf32>
    %582 = vector.broadcast %580 : vector<1x4xf32> to vector<2x4xf32>
    %583 = arith.mulf %581, %582 : vector<2x4xf32>
    %584 = arith.addf %578, %583 : vector<2x4xf32>
    %585 = tpu.concatenate %584, %544 in 1 : vector<2x4xf32>, vector<2x32xf32> -> vector<2x36xf32>
    %c0_161 = arith.constant 0 : index
    %c0_162 = arith.constant 0 : index
    %586 = vector.load %arg7[%c0_161, %c0_162] : memref<36x128xf32, #tpu.memory_space<vmem>>, vector<36x128xf32>
    %cst_163 = arith.constant dense<0.000000e+00> : vector<2x128xf32>
    %587 = tpu.matmul %585, %586, %cst_163 {dimension_numbers = #tpu.dot_dimension_numbers<[1], [0], [0], [1], [0, 0, 1, 1], [], []>} : vector<2x36xf32>, vector<36x128xf32>, vector<2x128xf32> -> vector<2x128xf32>
    %c0_164 = arith.constant 0 : index
    %c0_165 = arith.constant 0 : index
    %588 = vector.load %arg8[%c0_164, %c0_165] : memref<1x128xf32, #tpu.memory_space<vmem>>, vector<1x128xf32>
    %589 = vector.broadcast %588 : vector<1x128xf32> to vector<2x128xf32>
    %590 = arith.addf %587, %589 : vector<2x128xf32>
    %591 = math.tanh %590 : vector<2x128xf32>
    %592 = arith.negf %590 : vector<2x128xf32>
    %593 = math.exp %592 : vector<2x128xf32>
    %cst_166 = arith.constant 1.000000e+00 : f32
    %594 = vector.broadcast %cst_166 : f32 to vector<2x128xf32>
    %595 = arith.addf %594, %593 : vector<2x128xf32>
    %596 = arith.divf %594, %595 : vector<2x128xf32>
    %597 = arith.select %5, %591, %596 : vector<2x128xi1>, vector<2x128xf32>
    %598 = vector.extract_strided_slice %597 {offsets = [0, 0], sizes = [2, 32], strides = [1, 1]} : vector<2x128xf32> to vector<2x32xf32>
    %599 = vector.extract_strided_slice %597 {offsets = [0, 32], sizes = [2, 32], strides = [1, 1]} : vector<2x128xf32> to vector<2x32xf32>
    %600 = vector.extract_strided_slice %597 {offsets = [0, 64], sizes = [2, 32], strides = [1, 1]} : vector<2x128xf32> to vector<2x32xf32>
    %601 = vector.extract_strided_slice %597 {offsets = [0, 96], sizes = [2, 32], strides = [1, 1]} : vector<2x128xf32> to vector<2x32xf32>
    %602 = arith.mulf %599, %542 : vector<2x32xf32>
    %603 = arith.mulf %598, %600 : vector<2x32xf32>
    %604 = arith.addf %602, %603 : vector<2x32xf32>
    %605 = math.tanh %604 : vector<2x32xf32>
    %606 = arith.mulf %601, %605 : vector<2x32xf32>
    %607 = tpu.concatenate %606, %566 in 1 : vector<2x32xf32>, vector<2x32xf32> -> vector<2x64xf32>
    %c0_167 = arith.constant 0 : index
    %c0_168 = arith.constant 0 : index
    %608 = vector.load %arg9[%c0_167, %c0_168] : memref<64x128xf32, #tpu.memory_space<vmem>>, vector<64x128xf32>
    %cst_169 = arith.constant dense<0.000000e+00> : vector<2x128xf32>
    %609 = tpu.matmul %607, %608, %cst_169 {dimension_numbers = #tpu.dot_dimension_numbers<[1], [0], [0], [1], [0, 0, 1, 1], [], []>} : vector<2x64xf32>, vector<64x128xf32>, vector<2x128xf32> -> vector<2x128xf32>
    %c0_170 = arith.constant 0 : index
    %c0_171 = arith.constant 0 : index
    %610 = vector.load %arg10[%c0_170, %c0_171] : memref<1x128xf32, #tpu.memory_space<vmem>>, vector<1x128xf32>
    %611 = vector.broadcast %610 : vector<1x128xf32> to vector<2x128xf32>
    %612 = arith.addf %609, %611 : vector<2x128xf32>
    %613 = math.tanh %612 : vector<2x128xf32>
    %614 = arith.negf %612 : vector<2x128xf32>
    %615 = math.exp %614 : vector<2x128xf32>
    %cst_172 = arith.constant 1.000000e+00 : f32
    %616 = vector.broadcast %cst_172 : f32 to vector<2x128xf32>
    %617 = arith.addf %616, %615 : vector<2x128xf32>
    %618 = arith.divf %616, %617 : vector<2x128xf32>
    %619 = arith.select %5, %613, %618 : vector<2x128xi1>, vector<2x128xf32>
    %620 = vector.extract_strided_slice %619 {offsets = [0, 0], sizes = [2, 32], strides = [1, 1]} : vector<2x128xf32> to vector<2x32xf32>
    %621 = vector.extract_strided_slice %619 {offsets = [0, 32], sizes = [2, 32], strides = [1, 1]} : vector<2x128xf32> to vector<2x32xf32>
    %622 = vector.extract_strided_slice %619 {offsets = [0, 64], sizes = [2, 32], strides = [1, 1]} : vector<2x128xf32> to vector<2x32xf32>
    %623 = vector.extract_strided_slice %619 {offsets = [0, 96], sizes = [2, 32], strides = [1, 1]} : vector<2x128xf32> to vector<2x32xf32>
    %624 = arith.mulf %621, %564 : vector<2x32xf32>
    %625 = arith.mulf %620, %622 : vector<2x32xf32>
    %626 = arith.addf %624, %625 : vector<2x32xf32>
    %627 = math.tanh %626 : vector<2x32xf32>
    %628 = arith.mulf %623, %627 : vector<2x32xf32>
    %c0_173 = arith.constant 0 : index
    %c0_174 = arith.constant 0 : index
    %629 = vector.load %arg11[%c0_173, %c0_174] : memref<32x2xf32, #tpu.memory_space<vmem>>, vector<32x2xf32>
    %cst_175 = arith.constant dense<0.000000e+00> : vector<2x2xf32>
    %630 = tpu.matmul %628, %629, %cst_175 {dimension_numbers = #tpu.dot_dimension_numbers<[1], [0], [0], [1], [0, 0, 1, 1], [], []>} : vector<2x32xf32>, vector<32x2xf32>, vector<2x2xf32> -> vector<2x2xf32>
    %c0_176 = arith.constant 0 : index
    %c0_177 = arith.constant 0 : index
    %631 = vector.load %arg12[%c0_176, %c0_177] : memref<1x2xf32, #tpu.memory_space<vmem>>, vector<1x2xf32>
    %632 = vector.broadcast %631 : vector<1x2xf32> to vector<2x2xf32>
    %633 = arith.addf %630, %632 : vector<2x2xf32>
    %634 = tpu.concatenate %447, %509, %571, %633 in 1 : vector<2x2xf32>, vector<2x2xf32>, vector<2x2xf32>, vector<2x2xf32> -> vector<2x8xf32>
    %c0_178 = arith.constant 0 : index
    %c0_179 = arith.constant 0 : index
    %635 = vector.load %arg15[%c0_178, %c0_179] : memref<2x8xf32, #tpu.memory_space<vmem>>, vector<2x8xf32>
    tpu.vector_store %arg15[%c0_178, %c0_179], %634 {strides = array<i32>} : memref<2x8xf32, #tpu.memory_space<vmem>>, vector<2x8xf32>,
    return
  }
}

</mosaic_0001>

<bundles_post_ra>
// kernel: tpu_custom_call.1
= control target key start
LH: loop header
LB: loop body
LE: loop exit
PB: predicated region body
PF: predicated region fallthrough
CT: control target
= control target key end

     0   :  { %20 = vsyncpa [#allocation3], 0  ;;  %s5532_s0 = inlined_call_operand.vmem [shape: f32[2,8,4], index: 0, kind: input, shape index: {}]   ;;  %s5533_s1 = inlined_call_operand.vmem [shape: f32[2,2], index: 1, kind: input, shape index: {}]   ;;  %s5534_s2 = inlined_call_operand.vmem [shape: f32[4,128], index: 2, kind: input, shape index: {}]   ;;  %s5535_s3 = inlined_call_operand.hbm [shape: f32[32,128], index: 3, kind: input, shape index: {}]   ;;  %s5536_s4 = inlined_call_operand.vmem [shape: f32[1,128], index: 4, kind: input, shape index: {}]   ;;  %s5537_s5 = inlined_call_operand.vmem [shape: f32[64,128], index: 5, kind: input, shape index: {}]   ;;  %s5538_s6 = inlined_call_operand.vmem [shape: f32[1,128], index: 6, kind: input, shape index: {}]   ;;  %s5539_s7 = inlined_call_operand.hbm [shape: f32[36,128], index: 7, kind: input, shape index: {}]   ;;  %s5540_s8 = inlined_call_operand.vmem [shape: f32[1,128], index: 8, kind: input, shape index: {}]   ;;  %s5541_s9 = inlined_call_operand.hbm [shape: f32[64,128], index: 9, kind: input, shape index: {}]   ;;  %s5542_s10 = inlined_call_operand.vmem [shape: f32[1,128], index: 10, kind: input, shape index: {}]   ;;  %s5543_s11 = inlined_call_operand.vmem [shape: f32[32,2], index: 11, kind: input, shape index: {}]   ;;  %s5544_s12 = inlined_call_operand.vmem [shape: f32[1,2], index: 12, kind: input, shape index: {}]   ;;  %s5545_s13 = inlined_call_operand.vmem [shape: f32[2,4], index: 13, kind: input, shape index: {}]   ;;  %s5546_s14 = inlined_call_operand.vmem [shape: f32[1,4], index: 14, kind: input, shape index: {}]   ;;  %s5547_s15 = inlined_call_operand.hbm [shape: f32[2,8], index: 15, kind: output, shape index: {}]  }
   0x1   :  { %21 = vsyncpa [#allocation6], 0 }
   0x2   :  { %22 = vsyncpa [#allocation4], 0  ;;  %s4619_s18 = smov [#allocation5]   ;;  %s4620_s20 = smov [#allocation2]  }
   0x3   :  { %s52_s19 = sshll.u32 %s4619_s18, 4  ;;  %s34_s21 = sshll.u32 %s4620_s20, 4  ;;  %s53_s19 = int_to_ptr.vmem [resolvable:$true] %s52_s19  ;;  %s4716_s21 = int_to_ptr.vmem [resolvable:$true] %s34_s21 }
   0x4   :  { %s4525_s24 = scalar_lea.hbm %s5539_s7, 640 }
   0x5   :  { %p4526_p0 = scmp.ne.s32.totalorder %s5539_s7, %s4525_s24  ;;  %p4529_p1 = scmp.lt.u32.totalorder %s4525_s24, %s5539_s7 }
   0x7   :  { %p4531_p2 = pnand %p4529_p1, %p4526_p0 }
   0x9   :  { %4534 = shalt.err (!%p4531_p2)
}
   0xa   :  { %s4535_s29 = scalar_lea.vmem %s53_s19, 640  ;;  %p4540_p4 = scmp.lt.s32.totalorder %s53_s19, %s53_s19 }
   0xb   :  { %p4536_p3 = scmp.ne.s32.totalorder %s53_s19, %s4535_s29  ;;  %p4541_p5 = scmp.lt.s32.totalorder %s4535_s29, %s4535_s29 }
   0xd   :  { %p4542_p6 = por %p4541_p5, %p4540_p4 }
   0xf   :  { %p4543_p7 = pnand %p4542_p6, %p4536_p3 }
  0x11   :  { %4546 = shalt.err (!%p4543_p7)
}
  0x12   :  { %s4621_s30 = smov 128   ;;  %s4622_s16 = smov 8  }
  0x13   :  { %58 = dma.hbm_to_vmem [thread:$0]  %s5539_s7, 640, %s53_s19, [#allocation6], %s4621_s30, %s4621_s30, %s4622_s16  }
  0x14   :  { %s4547_s23 = scalar_lea.hbm %s5535_s3, 512 }
  0x15   :  { %p4548_p8 = scmp.ne.s32.totalorder %s5535_s3, %s4547_s23  ;;  %p4551_p9 = scmp.lt.u32.totalorder %s4547_s23, %s5535_s3 }
  0x17   :  { %p4553_p10 = pnand %p4551_p9, %p4548_p8 }
  0x19   :  { %4556 = shalt.err (!%p4553_p10)
}
  0x1a   :  { %s4557_s28 = scalar_lea.vmem %s4716_s21, 512  ;;  %p4562_p12 = scmp.lt.s32.totalorder %s4716_s21, %s4716_s21 }
  0x1b   :  { %p4558_p11 = scmp.ne.s32.totalorder %s4716_s21, %s4557_s28  ;;  %p4563_p13 = scmp.lt.s32.totalorder %s4557_s28, %s4557_s28 }
  0x1d   :  { %p4564_p0 = por %p4563_p13, %p4562_p12 }
  0x1f   :  { %p4565_p1 = pnand %p4564_p0, %p4558_p11 }
  0x21   :  { %4568 = shalt.err (!%p4565_p1)
}
  0x22   :  { %40 = dma.hbm_to_vmem [thread:$0]  %s5535_s3, 512, %s4716_s21, [#allocation3], %s4621_s30, %s4621_s30, %s4622_s16  }
  0x23   :  { %s4623_s29 = smov [#allocation7]   ;;  %s4569_s22 = scalar_lea.hbm %s5541_s9, 1024 }
  0x24   :  { %s66_s17 = sshll.u32 %s4623_s29, 4  ;;  %p4570_p2 = scmp.ne.s32.totalorder %s5541_s9, %s4569_s22  ;;  %s67_s17 = int_to_ptr.vmem [resolvable:$true] %s66_s17 }
  0x25   :  { %p4573_p3 = scmp.lt.u32.totalorder %s4569_s22, %s5541_s9 }
  0x27   :  { %p4575_p4 = pnand %p4573_p3, %p4570_p2 }
  0x29   :  { %4578 = shalt.err (!%p4575_p4)
}
  0x2a   :  { %s4579_s27 = scalar_lea.vmem %s67_s17, 1024  ;;  %p4584_p6 = scmp.lt.s32.totalorder %s67_s17, %s67_s17 }
  0x2b   :  { %p4580_p5 = scmp.ne.s32.totalorder %s67_s17, %s4579_s27  ;;  %p4585_p7 = scmp.lt.s32.totalorder %s4579_s27, %s4579_s27 }
  0x2d   :  { %p4586_p8 = por %p4585_p7, %p4584_p6 }
  0x2f   :  { %p4587_p9 = pnand %p4586_p8, %p4580_p5 }
  0x31   :  { %4590 = shalt.err (!%p4587_p9)
}
  0x32   :  { %72 = dma.hbm_to_vmem [thread:$0]  %s5541_s9, 1024, %s67_s17, [#allocation6], %s4621_s30, %s4621_s30, %s4622_s16  }
  0x33   :  { %4613 = dma.done.wait [#allocation3], 512  }
  0x34   :  { %4614 = vsyncadd [#allocation3], 4294966784 }
  0x35   :  { %4615 = dma.done.wait [#allocation6], 1664  }
  0x36   :  { %4616 = vsyncadd [#allocation6], 4294965632  ;;  %v4624_v0 = vmov 0.0|0.0   ;;  %vm4625_vm0 = vmmov 0   ;;  %v4626_v1 = vmov 0.0   ;;  %vm107_vm1 = vcmask 1043456  }
  0x37   :  { %4023 = vmatprep.subr.bf16.mxu1 %v4624_v0  ;;  %3619 = vmatprep.mubr.msk.f32.mxu1 %vm4625_vm0, %v4626_v1  ;;  %vm100_vm2 = vcmask 31744   ;;  %v186_v2 = vld [vmem:[#allocation2] sm:$0xff]  ;;  %v187_v3 = vld [vmem:[#allocation2 + $0x8] sm:$0xff]  ;;  %v99_v4 = vld [vmem:[%s5534_s2] sm:$0xf]  ;;  %vm296_vm3 = vcmask 1041409   ;;  %v92_v31 = vlaneseq }
  0x38   :  { %v4774_v5 = vpack.c.bf16 %v187_v3, %v186_v2  ;;  %3606 = vmatprep.subr.msk.mxu0 %vm107_vm1, %v99_v4  ;;  %v188_v6 = vld [vmem:[#allocation2 + $0x10] sm:$0xff]  ;;  %v189_v7 = vld [vmem:[#allocation2 + $0x18] sm:$0xff]  ;;  %s4627_s29 = smov 64   ;;  %s4628_s17 = smov 32   ;;  %v329_v46 = vld [vmem:[%s5537_s5 + $0x10] sm:$0xff]  ;;  %vm190_vm7 = vcmask 261120  }
  0x39   :  { %v97_v8 = vld [vmem:[%s5532_s0] sm:$0xff]  ;;  %3607 = vmatpush3.msk.msra.mxu0 %vm107_vm1, %v99_v4  ;;  %v98_v9 = vld [vmem:[%s5532_s0 + $0x8] sm:$0xff]  ;;  %v4786_v10 = vpack.c.bf16 %v189_v7, %v188_v6  ;;  %v93_v32 = vand.u32 127, %v92_v31  ;;  %v330_v48 = vld [vmem:[%s5537_s5 + $0x18] sm:$0xff]  ;;  %vm342_vm8 = vcmask 523264   ;;  %vm2108_vm9 = vcmask 293888  }
  0x3a   :  { %3608 = vmatprep.mubr.msk.f32.mxu0 %vm100_vm2, %v97_v8  ;;  %4025 = vmatpush3.bf16.msra.mxu1 %v4774_v5  ;;  %v4809_v14 = vld [vmem:[%s5536_s4] ss:$0 sm:$0xff]  ;;  %v328_v45 = vld [vmem:[%s5537_s5 + $0x8] sm:$0xff]  ;;  %v4844_v49 = vpack.c.bf16 %v330_v48, %v329_v46  ;;  %v333_v53 = vld [vmem:[%s5537_s5 + $0x30] sm:$0xff]  ;;  %s4634_s0 = smov 6   ;;  %vm3316_vm10 = vcmask 15360  }
  0x3b   :  { %3609 = vmatmul.mubr.msk.f32.vlgmr.msra.gmra.mrb[0].mxu0 %vm100_vm2, %v98_v9  ;;  %4026 = vmatprep.subr.bf16.mxu1 %v4624_v0  ;;  %vm94_vm4 = vcmp.ge.s32.totalorder %v93_v32, 64  ;;  %vm95_vm5 = vcmp.lt.s32.totalorder %v93_v32, 96  ;;  %v327_v44 = vld [vmem:[%s5537_s5] sm:$0xff]  ;;  %v332_v51 = vld [vmem:[%s5537_s5 + $0x28] sm:$0xff]  ;;  %v334_v54 = vld [vmem:[%s5537_s5 + $0x38] sm:$0xff]  ;;  %vm3319_vm11 = vcmask 48128  }
  0x3c   :  { %4029 = vmatprep.subr.bf16.mxu0 %v4624_v0  ;;  %3638 = vmatprep.mubr.msk.f32.mxu0 %vm4625_vm0, %v4626_v1  ;;  %vm4817_vm6 = vmand %vm94_vm4, %vm95_vm5  ;;  %v4838_v47 = vpack.c.bf16 %v328_v45, %v327_v44  ;;  %v331_v50 = vld [vmem:[%s5537_s5 + $0x20] sm:$0xff]  ;;  %v4865_v56 = vpack.c.bf16 %v334_v54, %v333_v53  ;;  %s4633_s5 = smov 4   ;;  %vm3321_vm12 = vcmask 58368  }
  0x3d   :  { %v4854_v52 = vpack.c.bf16 %v332_v51, %v331_v50  ;;  %v4893_v61 = vld [vmem:[%s5538_s6] ss:$0 sm:$0xff] }
  0x3e   :  { %4028 = vmatpush3.bf16.msra.mxu1 %v4786_v10  ;;  %4031 = vmatpush3.bf16.msra.mxu0 %v4838_v47 }
  0x3f   :  { %4041 = vmatprep.subr.bf16.mxu1 %v4624_v0  ;;  %4032 = vmatprep.subr.bf16.mxu0 %v4624_v0 }
  0x41   :  { %3620 = vmatmul.mubr.f32.vlgmr.msra.gmra.mrb[0].mxu1 %v4626_v1 }
  0x42   :  { %4043 = vmatpush3.bf16.msra.mxu1 %v4774_v5  ;;  %3649 = vmatprep.mubr.msk.f32.mxu1 %vm4625_vm0, %v4626_v1 }
  0x43   :  { %4044 = vmatprep.subr.bf16.mxu1 %v4624_v0  ;;  %4034 = vmatpush3.bf16.msra.mxu0 %v4844_v49 }
  0x44   :  { %4035 = vmatprep.subr.bf16.mxu0 %v4624_v0 }
  0x46   :  { %4046 = vmatpush3.bf16.msra.mxu1 %v4786_v10 }
  0x47   :  { %4047 = vmatprep.subr.bf16.mxu1 %v4624_v0  ;;  %4037 = vmatpush3.bf16.msra.mxu0 %v4854_v52 }
  0x48   :  { %4038 = vmatprep.subr.bf16.mxu0 %v4624_v0 }
  0x4b   :  { %4040 = vmatpush3.bf16.msra.mxu0 %v4865_v56 }
  0x4c   :  { %4059 = vmatprep.subr.bf16.mxu0 %v4624_v0 }
 0x10e   :  { %v4802_v11 = vpop.f32.mrb[0].mxu0 }
 0x10f   :  { %v4804_v12 = vpop.f32.mrb[1].mxu0 }
 0x114   :  { %v260_v13 = vpop.f32.mrb[0].mxu1 }
 0x115   :  { %v265_v15 = vrot.slane %v260_v13, 1  ;;  %v268_v16 = vadd.f32 %v260_v13, %v4804_v12  ;;  %v3621_v17 = vpop.f32.mrb[1].mxu1 }
 0x117   :  { %v269_v18 = vadd.f32 %v4802_v11, %v265_v15  ;;  %v277_v19 = vadd.f32 %v4809_v14, %v268_v16 }
 0x119   :  { %v278_v20 = vadd.f32 %v4809_v14, %v269_v18  ;;  %v3343_v21 = vmul.f32 -1.442695, %v277_v19  ;;  %4283 = vtanh.f32 %v277_v19 }
 0x11b   :  { %4285 = vtanh.f32 %v278_v20  ;;  %v3344_v22 = vmul.f32 -1.442695, %v278_v20 }
 0x11c   :  { %4287 = vpow2.f32 %v3343_v21 }
 0x11d   :  { %4289 = vpow2.f32 %v3344_v22 }
 0x123   :  { %v4284_v23 = vpop.eup %4283 }
 0x125   :  { %v4286_v24 = vpop.eup %4285 }
 0x126   :  { %v4288_v25 = vpop.eup %4287  ;;  %v295_v26 = vrot.slane %v4286_v24, 7 }
 0x127   :  { %v4290_v27 = vpop.eup %4289  ;;  %v287_v28 = vadd.f32 1.0, %v4288_v25 }
 0x128   :  { %v288_v29 = vadd.f32 1.0, %v4290_v27  ;;  %v297_v30 = vsel %vm296_vm3, %v295_v26, %v4284_v23 }
 0x12a   :  { %4291 = vrcp.f32 %v288_v29 }
 0x12b   :  { %4293 = vrcp.f32 %v287_v28 }
 0x134   :  { %v4292_v33 = vpop.eup %4291 }
 0x135   :  { %v301_v35 = vrot.slane %v4292_v33, 7  ;;  %v4294_v36 = vpop.eup %4293 }
 0x137   :  { %v302_v37 = vsel %vm296_vm3, %v301_v35, %v4294_v36 }
 0x138   :  { %v304_v38 = vsel %vm4817_vm6, %v297_v30, %v302_v37 }
 0x139   :  { %307 = vrot.lane.b32.xlu0 %v304_v38, %s4627_s29  ;;  %v305_v41 = vmul.f32 0.0, %v304_v38 }
 0x1ab   :  { %v308_v39 = vpop.permute.xlu0 %307 }
 0x1ac   :  { %v310_v40 = vmul.f32 %v308_v39, %v304_v38 }
 0x1ae   :  { %312 = vrot.lane.b32.xlu0 %v310_v40, %s4628_s17 }
 0x220   :  { %v313_v42 = vpop.permute.xlu0 %312 }
 0x221   :  { %v4826_v43 = vadd.f32 %v313_v42, %v305_v41 }
 0x223   :  { %4295 = vtanh.f32 %v4826_v43 }
 0x22d   :  { %v4296_v55 = vpop.eup %4295 }
 0x22e   :  { %318 = vrot.lane.b32.xlu1 %v4296_v55, %s4627_s29 }
 0x2a0   :  { %v319_v57 = vpop.permute.xlu1 %318 }
 0x2a1   :  { %v321_v58 = vmul.f32 %v319_v57, %v304_v38 }
 0x2a3   :  { %323 = vrot.lane.b32.xlu1 %v321_v58, %s4628_s17 }
 0x315   :  { %v324_v59 = vpop.permute.xlu1 %323 }
 0x316   :  { %v326_v60 = vsel %vm190_vm7, %v324_v59, 0.0  ;;  %3650 = vmatmul.mubr.msk.f32.vlgmr.msra.gmra.mrb[2].mxu1 %vm190_vm7, %v324_v59 }
 0x317   :  { %3639 = vmatmul.mubr.msk.f32.vlgmr.msra.gmra.mrb[2].mxu0 %vm342_vm8, %v326_v60  ;;  %4049 = vmatpush3.bf16.msra.mxu1 %v4838_v47 }
 0x318   :  { %4050 = vmatprep.subr.bf16.mxu1 %v4624_v0  ;;  %4061 = vmatpush3.bf16.msra.mxu0 %v4774_v5 }
 0x319   :  { %4062 = vmatprep.subr.bf16.mxu0 %v4624_v0  ;;  %3679 = vmatprep.mubr.msk.f32.mxu0 %vm4625_vm0, %v4626_v1 }
 0x31a   :  { %3668 = vmatprep.mubr.msk.f32.mxu1 %vm4625_vm0, %v4626_v1 }
 0x31b   :  { %4052 = vmatpush3.bf16.msra.mxu1 %v4844_v49 }
 0x31c   :  { %4053 = vmatprep.subr.bf16.mxu1 %v4624_v0  ;;  %4064 = vmatpush3.bf16.msra.mxu0 %v4786_v10 }
 0x31d   :  { %4065 = vmatprep.subr.bf16.mxu0 %v4624_v0 }
 0x31f   :  { %4055 = vmatpush3.bf16.msra.mxu1 %v4854_v52 }
 0x320   :  { %4056 = vmatprep.subr.bf16.mxu1 %v4624_v0 }
 0x323   :  { %4058 = vmatpush3.bf16.msra.mxu1 %v4865_v56 }
 0x324   :  { %4077 = vmatprep.subr.bf16.mxu1 %v4624_v0 }
 0x3e9   :  { %v509_v62 = vpop.f32.mrb[2].mxu1 }
 0x3ea   :  { %v514_v63 = vrot.slane %v509_v62, 7  ;;  %v518_v2 = vadd.f32 %v4802_v11, %v509_v62  ;;  %v412_v3 = vpop.f32.mrb[2].mxu0  ;;  %v3651_v4 = vpop.f32.mrb[3].mxu1 }
 0x3eb   :  { %v413_v6 = vadd.f32 %v4893_v61, %v412_v3  ;;  %v3640_v7 = vpop.f32.mrb[3].mxu0 }
 0x3ec   :  { %v517_v8 = vadd.f32 %v514_v63, %v4804_v12  ;;  %v520_v9 = vadd.f32 %v4809_v14, %v518_v2 }
 0x3ed   :  { %v3347_v13 = vmul.f32 -1.442695, %v413_v6 }
 0x3ee   :  { %v519_v15 = vadd.f32 %v4809_v14, %v517_v8  ;;  %4297 = vtanh.f32 %v520_v9  ;;  %v3350_v16 = vmul.f32 -1.442695, %v520_v9 }
 0x3ef   :  { %4299 = vpow2.f32 %v3347_v13 }
 0x3f0   :  { %4301 = vtanh.f32 %v519_v15  ;;  %v3349_v17 = vmul.f32 -1.442695, %v519_v15 }
 0x3f1   :  { %4303 = vpow2.f32 %v3350_v16 }
 0x3f2   :  { %4305 = vpow2.f32 %v3349_v17 }
 0x3f3   :  { %4307 = vtanh.f32 %v413_v6 }
 0x3f8   :  { %v4298_v18 = vpop.eup %4297 }
 0x3f9   :  { %v4300_v19 = vpop.eup %4299 }
 0x3fa   :  { %v4302_v20 = vpop.eup %4301  ;;  %v420_v21 = vadd.f32 1.0, %v4300_v19 }
 0x3fb   :  { %v4304_v22 = vpop.eup %4303  ;;  %v537_v23 = vrot.slane %v4302_v20, 1 }
 0x3fc   :  { %v4306_v24 = vpop.eup %4305  ;;  %4309 = vrcp.f32 %v420_v21  ;;  %v530_v26 = vadd.f32 1.0, %v4304_v22 }
 0x3fd   :  { %v529_v25 = vadd.f32 1.0, %v4306_v24  ;;  %v538_v27 = vsel %vm296_vm3, %v4298_v18, %v537_v23  ;;  %v4308_v28 = vpop.eup %4307 }
 0x3ff   :  { %4311 = vrcp.f32 %v529_v25 }
 0x400   :  { %4313 = vrcp.f32 %v530_v26 }
 0x406   :  { %v4310_v29 = vpop.eup %4309 }
 0x407   :  { %v423_v30 = vsel %vm4817_vm6, %v4308_v28, %v4310_v29 }
 0x408   :  { %426 = vrot.lane.b32.xlu1 %v423_v30, %s4627_s29  ;;  %v424_v42 = vmul.f32 0.0, %v423_v30 }
 0x409   :  { %v4312_v32 = vpop.eup %4311 }
 0x40a   :  { %v542_v33 = vrot.slane %v4312_v32, 1  ;;  %v4314_v35 = vpop.eup %4313 }
 0x40c   :  { %v543_v36 = vsel %vm296_vm3, %v4314_v35, %v542_v33 }
 0x40d   :  { %v545_v37 = vsel %vm4817_vm6, %v538_v27, %v543_v36 }
 0x40e   :  { %548 = vrot.lane.b32.xlu0 %v545_v37, %s4627_s29  ;;  %v546_v46 = vmul.f32 %v545_v37, %v4826_v43 }
 0x47a   :  { %v427_v38 = vpop.permute.xlu1 %426 }
 0x47b   :  { %v429_v39 = vmul.f32 %v427_v38, %v423_v30 }
 0x47d   :  { %431 = vrot.lane.b32.xlu1 %v429_v39, %s4628_s17 }
 0x480   :  { %v549_v40 = vpop.permute.xlu0 %548 }
 0x481   :  { %v551_v41 = vmul.f32 %v549_v40, %v545_v37 }
 0x483   :  { %553 = vrot.lane.b32.xlu0 %v551_v41, %s4628_s17 }
 0x4ef   :  { %v432_v44 = vpop.permute.xlu1 %431 }
 0x4f0   :  { %v4910_v45 = vadd.f32 %v432_v44, %v424_v42 }
 0x4f2   :  { %4315 = vtanh.f32 %v4910_v45 }
 0x4f5   :  { %v554_v48 = vpop.permute.xlu0 %553 }
 0x4f6   :  { %v4914_v50 = vadd.f32 %v554_v48, %v546_v46 }
 0x4f8   :  { %4317 = vtanh.f32 %v4914_v50 }
 0x4fc   :  { %v4316_v51 = vpop.eup %4315 }
 0x4fd   :  { %437 = vrot.lane.b32.xlu1 %v4316_v51, %s4627_s29 }
 0x502   :  { %v4318_v53 = vpop.eup %4317 }
 0x503   :  { %559 = vrot.lane.b32.xlu0 %v4318_v53, %s4627_s29 }
 0x56f   :  { %v438_v54 = vpop.permute.xlu1 %437 }
 0x570   :  { %v440_v55 = vmul.f32 %v438_v54, %v423_v30 }
 0x572   :  { %568 = vrot.lane.b32.xlu1 %v440_v55, %s4627_s29 }
 0x575   :  { %v560_v57 = vpop.permute.xlu0 %559 }
 0x576   :  { %v562_v58 = vmul.f32 %v560_v57, %v545_v37 }
 0x578   :  { %564 = vrot.lane.b32.xlu0 %v562_v58, %s4628_s17 }
 0x5e4   :  { %v569_v43 = vpop.permute.xlu1 %568 }
 0x5ea   :  { %v565_v59 = vpop.permute.xlu0 %564 }
 0x5eb   :  { %v571_v60 = vsel %vm190_vm7, %v565_v59, %v569_v43  ;;  %3680 = vmatmul.mubr.msk.f32.vlgmr.msra.gmra.mrb[4].mxu0 %vm190_vm7, %v565_v59 }
 0x5ec   :  { %3669 = vmatmul.mubr.msk.f32.vlgmr.msra.gmra.mrb[4].mxu1 %vm342_vm8, %v571_v60  ;;  %4067 = vmatpush3.bf16.msra.mxu0 %v4838_v47 }
 0x5ed   :  { %4068 = vmatprep.subr.bf16.mxu0 %v4624_v0  ;;  %4079 = vmatpush3.bf16.msra.mxu1 %v4774_v5 }
 0x5ee   :  { %4080 = vmatprep.subr.bf16.mxu1 %v4624_v0  ;;  %3709 = vmatprep.mubr.msk.f32.mxu1 %vm4625_vm0, %v4626_v1 }
 0x5ef   :  { %3698 = vmatprep.mubr.msk.f32.mxu0 %vm4625_vm0, %v4626_v1 }
 0x5f0   :  { %4070 = vmatpush3.bf16.msra.mxu0 %v4844_v49 }
 0x5f1   :  { %4071 = vmatprep.subr.bf16.mxu0 %v4624_v0  ;;  %4082 = vmatpush3.bf16.msra.mxu1 %v4786_v10 }
 0x5f2   :  { %4083 = vmatprep.subr.bf16.mxu1 %v4624_v0 }
 0x5f4   :  { %4073 = vmatpush3.bf16.msra.mxu0 %v4854_v52 }
 0x5f5   :  { %4074 = vmatprep.subr.bf16.mxu0 %v4624_v0 }
 0x5f8   :  { %4076 = vmatpush3.bf16.msra.mxu0 %v4865_v56 }
 0x5f9   :  { %4095 = vmatprep.subr.bf16.mxu0 %v4624_v0 }
 0x6be   :  { %v738_v62 = vpop.f32.mrb[4].mxu0 }
 0x6bf   :  { %v743_v63 = vrot.slane %v738_v62, 6  ;;  %v744_v2 = vrot.slane %v738_v62, 7  ;;  %v641_v3 = vpop.f32.mrb[4].mxu1  ;;  %v3681_v4 = vpop.f32.mrb[5].mxu0 }
 0x6c0   :  { %v642_v6 = vadd.f32 %v4893_v61, %v641_v3  ;;  %v3670_v7 = vpop.f32.mrb[5].mxu1 }
 0x6c1   :  { %v747_v8 = vadd.f32 %v743_v63, %v4804_v12  ;;  %v748_v9 = vadd.f32 %v4802_v11, %v744_v2 }
 0x6c2   :  { %v3352_v13 = vmul.f32 -1.442695, %v642_v6 }
 0x6c3   :  { %v749_v15 = vadd.f32 %v4809_v14, %v747_v8  ;;  %v750_v16 = vadd.f32 %v4809_v14, %v748_v9 }
 0x6c4   :  { %4319 = vpow2.f32 %v3352_v13 }
 0x6c5   :  { %4321 = vtanh.f32 %v749_v15  ;;  %v3354_v17 = vmul.f32 -1.442695, %v749_v15  ;;  %v3355_v18 = vmul.f32 -1.442695, %v750_v16 }
 0x6c6   :  { %4323 = vtanh.f32 %v750_v16 }
 0x6c7   :  { %4325 = vpow2.f32 %v3354_v17 }
 0x6c8   :  { %4327 = vpow2.f32 %v3355_v18 }
 0x6c9   :  { %4329 = vtanh.f32 %v642_v6 }
 0x6ce   :  { %v4320_v19 = vpop.eup %4319 }
 0x6cf   :  { %v4322_v20 = vpop.eup %4321  ;;  %v649_v21 = vadd.f32 1.0, %v4320_v19 }
 0x6d0   :  { %v4324_v22 = vpop.eup %4323  ;;  %v767_v23 = vrot.slane %v4322_v20, 2 }
 0x6d1   :  { %v4326_v24 = vpop.eup %4325  ;;  %4331 = vrcp.f32 %v649_v21  ;;  %v768_v25 = vrot.slane %v4324_v22, 1 }
 0x6d2   :  { %v4328_v26 = vpop.eup %4327  ;;  %v759_v27 = vadd.f32 1.0, %v4326_v24 }
 0x6d3   :  { %v760_v28 = vadd.f32 1.0, %v4328_v26  ;;  %v769_v29 = vsel %vm296_vm3, %v768_v25, %v767_v23  ;;  %v4330_v30 = vpop.eup %4329 }
 0x6d4   :  { %4333 = vrcp.f32 %v759_v27 }
 0x6d5   :  { %4335 = vrcp.f32 %v760_v28 }
 0x6db   :  { %v4332_v32 = vpop.eup %4331 }
 0x6dc   :  { %v652_v33 = vsel %vm4817_vm6, %v4330_v30, %v4332_v32 }
 0x6dd   :  { %655 = vrot.lane.b32.xlu1 %v652_v33, %s4627_s29  ;;  %v653_v48 = vmul.f32 %v652_v33, %v4910_v45 }
 0x6de   :  { %v4334_v35 = vpop.eup %4333 }
 0x6df   :  { %v4336_v36 = vpop.eup %4335  ;;  %v773_v37 = vrot.slane %v4334_v35, 2 }
 0x6e0   :  { %v774_v38 = vrot.slane %v4336_v36, 1 }
 0x6e2   :  { %v775_v39 = vsel %vm296_vm3, %v774_v38, %v773_v37 }
 0x6e3   :  { %v777_v40 = vsel %vm4817_vm6, %v769_v29, %v775_v39 }
 0x6e4   :  { %780 = vrot.lane.b32.xlu0 %v777_v40, %s4627_s29  ;;  %v778_v54 = vmul.f32 %v777_v40, %v4914_v50 }
 0x74f   :  { %v656_v41 = vpop.permute.xlu1 %655 }
 0x750   :  { %v658_v42 = vmul.f32 %v656_v41, %v652_v33 }
 0x752   :  { %660 = vrot.lane.b32.xlu1 %v658_v42, %s4628_s17 }
 0x756   :  { %v781_v44 = vpop.permute.xlu0 %780 }
 0x757   :  { %v783_v46 = vmul.f32 %v781_v44, %v777_v40 }
 0x759   :  { %785 = vrot.lane.b32.xlu0 %v783_v46, %s4628_s17 }
 0x7c4   :  { %v661_v51 = vpop.permute.xlu1 %660 }
 0x7c5   :  { %v4956_v53 = vadd.f32 %v661_v51, %v653_v48 }
 0x7c7   :  { %4337 = vtanh.f32 %v4956_v53 }
 0x7cb   :  { %v786_v55 = vpop.permute.xlu0 %785 }
 0x7cc   :  { %v4960_v57 = vadd.f32 %v786_v55, %v778_v54 }
 0x7ce   :  { %4339 = vtanh.f32 %v4960_v57 }
 0x7d1   :  { %v4338_v58 = vpop.eup %4337 }
 0x7d2   :  { %666 = vrot.lane.b32.xlu1 %v4338_v58, %s4627_s29 }
 0x7d8   :  { %v4340_v43 = vpop.eup %4339 }
 0x7d9   :  { %791 = vrot.lane.b32.xlu0 %v4340_v43, %s4627_s29 }
 0x844   :  { %v667_v59 = vpop.permute.xlu1 %666 }
 0x845   :  { %v669_v45 = vmul.f32 %v667_v59, %v652_v33 }
 0x847   :  { %800 = vrot.lane.b32.xlu1 %v669_v45, %s4627_s29 }
 0x84b   :  { %v792_v60 = vpop.permute.xlu0 %791 }
 0x84c   :  { %v794_v62 = vmul.f32 %v792_v60, %v777_v40 }
 0x84e   :  { %796 = vrot.lane.b32.xlu0 %v794_v62, %s4628_s17 }
 0x8b9   :  { %v801_v50 = vpop.permute.xlu1 %800 }
 0x8c0   :  { %v797_v63 = vpop.permute.xlu0 %796 }
 0x8c1   :  { %v803_v2 = vsel %vm190_vm7, %v797_v63, %v801_v50  ;;  %3710 = vmatmul.mubr.msk.f32.vlgmr.msra.gmra.mrb[6].mxu1 %vm190_vm7, %v797_v63 }
 0x8c2   :  { %3699 = vmatmul.mubr.msk.f32.vlgmr.msra.gmra.mrb[6].mxu0 %vm342_vm8, %v803_v2  ;;  %4085 = vmatpush3.bf16.msra.mxu1 %v4838_v47 }
 0x8c3   :  { %4086 = vmatprep.subr.bf16.mxu1 %v4624_v0  ;;  %4097 = vmatpush3.bf16.msra.mxu0 %v4774_v5 }
 0x8c4   :  { %4098 = vmatprep.subr.bf16.mxu0 %v4624_v0  ;;  %3739 = vmatprep.mubr.msk.f32.mxu0 %vm4625_vm0, %v4626_v1 }
 0x8c5   :  { %3728 = vmatprep.mubr.msk.f32.mxu1 %vm4625_vm0, %v4626_v1 }
 0x8c6   :  { %4088 = vmatpush3.bf16.msra.mxu1 %v4844_v49 }
 0x8c7   :  { %4089 = vmatprep.subr.bf16.mxu1 %v4624_v0  ;;  %4100 = vmatpush3.bf16.msra.mxu0 %v4786_v10 }
 0x8c8   :  { %4101 = vmatprep.subr.bf16.mxu0 %v4624_v0 }
 0x8ca   :  { %4091 = vmatpush3.bf16.msra.mxu1 %v4854_v52 }
 0x8cb   :  { %4092 = vmatprep.subr.bf16.mxu1 %v4624_v0 }
 0x8ce   :  { %4094 = vmatpush3.bf16.msra.mxu1 %v4865_v56 }
 0x8cf   :  { %4113 = vmatprep.subr.bf16.mxu1 %v4624_v0 }
 0x994   :  { %v970_v3 = vpop.f32.mrb[6].mxu1 }
 0x995   :  { %v975_v4 = vrot.slane %v970_v3, 5  ;;  %v976_v6 = vrot.slane %v970_v3, 6  ;;  %v873_v7 = vpop.f32.mrb[6].mxu0  ;;  %v3711_v8 = vpop.f32.mrb[7].mxu1 }
 0x996   :  { %v874_v9 = vadd.f32 %v4893_v61, %v873_v7  ;;  %v3700_v13 = vpop.f32.mrb[7].mxu0 }
 0x997   :  { %v979_v15 = vadd.f32 %v975_v4, %v4804_v12  ;;  %v980_v16 = vadd.f32 %v4802_v11, %v976_v6 }
 0x998   :  { %v3357_v17 = vmul.f32 -1.442695, %v874_v9 }
 0x999   :  { %v981_v18 = vadd.f32 %v4809_v14, %v979_v15  ;;  %v982_v19 = vadd.f32 %v4809_v14, %v980_v16 }
 0x99a   :  { %4341 = vpow2.f32 %v3357_v17 }
 0x99b   :  { %4343 = vtanh.f32 %v981_v18  ;;  %v3359_v20 = vmul.f32 -1.442695, %v981_v18  ;;  %v3360_v21 = vmul.f32 -1.442695, %v982_v19 }
 0x99c   :  { %4345 = vtanh.f32 %v982_v19 }
 0x99d   :  { %4347 = vpow2.f32 %v3359_v20 }
 0x99e   :  { %4349 = vpow2.f32 %v3360_v21 }
 0x99f   :  { %4351 = vtanh.f32 %v874_v9 }
 0x9a4   :  { %v4342_v22 = vpop.eup %4341 }
 0x9a5   :  { %v4344_v23 = vpop.eup %4343  ;;  %v881_v24 = vadd.f32 1.0, %v4342_v22 }
 0x9a6   :  { %v4346_v25 = vpop.eup %4345  ;;  %v999_v26 = vrot.slane %v4344_v23, 3 }
 0x9a7   :  { %v4348_v27 = vpop.eup %4347  ;;  %4353 = vrcp.f32 %v881_v24  ;;  %v1000_v28 = vrot.slane %v4346_v25, 2 }
 0x9a8   :  { %v4350_v29 = vpop.eup %4349  ;;  %v991_v30 = vadd.f32 1.0, %v4348_v27 }
 0x9a9   :  { %v992_v32 = vadd.f32 1.0, %v4350_v29  ;;  %v1001_v33 = vsel %vm296_vm3, %v1000_v28, %v999_v26  ;;  %v4352_v35 = vpop.eup %4351 }
 0x9aa   :  { %4355 = vrcp.f32 %v991_v30 }
 0x9ab   :  { %4357 = vrcp.f32 %v992_v32 }
 0x9b1   :  { %v4354_v36 = vpop.eup %4353 }
 0x9b2   :  { %v884_v37 = vsel %vm4817_vm6, %v4352_v35, %v4354_v36 }
 0x9b3   :  { %887 = vrot.lane.b32.xlu1 %v884_v37, %s4627_s29  ;;  %v885_v55 = vmul.f32 %v884_v37, %v4956_v53 }
 0x9b4   :  { %v4356_v38 = vpop.eup %4355 }
 0x9b5   :  { %v4358_v39 = vpop.eup %4357  ;;  %v1005_v40 = vrot.slane %v4356_v38, 3 }
 0x9b6   :  { %v1006_v41 = vrot.slane %v4358_v39, 2 }
 0x9b8   :  { %v1007_v42 = vsel %vm296_vm3, %v1006_v41, %v1005_v40 }
 0x9b9   :  { %v1009_v44 = vsel %vm4817_vm6, %v1001_v33, %v1007_v42 }
 0x9ba   :  { %1012 = vrot.lane.b32.xlu0 %v1009_v44, %s4627_s29  ;;  %v1010_v59 = vmul.f32 %v1009_v44, %v4960_v57 }
 0xa25   :  { %v888_v46 = vpop.permute.xlu1 %887 }
 0xa26   :  { %v890_v48 = vmul.f32 %v888_v46, %v884_v37 }
 0xa28   :  { %892 = vrot.lane.b32.xlu1 %v890_v48, %s4628_s17 }
 0xa2c   :  { %v1013_v51 = vpop.permute.xlu0 %1012 }
 0xa2d   :  { %v1015_v54 = vmul.f32 %v1013_v51, %v1009_v44 }
 0xa2f   :  { %1017 = vrot.lane.b32.xlu0 %v1015_v54, %s4628_s17 }
 0xa9a   :  { %v893_v58 = vpop.permute.xlu1 %892 }
 0xa9b   :  { %v5002_v43 = vadd.f32 %v893_v58, %v885_v55 }
 0xa9d   :  { %4359 = vtanh.f32 %v5002_v43 }
 0xaa1   :  { %v1018_v45 = vpop.permute.xlu0 %1017 }
 0xaa2   :  { %v5006_v60 = vadd.f32 %v1018_v45, %v1010_v59 }
 0xaa4   :  { %4361 = vtanh.f32 %v5006_v60 }
 0xaa7   :  { %v4360_v62 = vpop.eup %4359 }
 0xaa8   :  { %898 = vrot.lane.b32.xlu1 %v4360_v62, %s4627_s29 }
 0xaae   :  { %v4362_v50 = vpop.eup %4361 }
 0xaaf   :  { %1023 = vrot.lane.b32.xlu0 %v4362_v50, %s4627_s29 }
 0xb1a   :  { %v899_v63 = vpop.permute.xlu1 %898 }
 0xb1b   :  { %v901_v53 = vmul.f32 %v899_v63, %v884_v37 }
 0xb1d   :  { %1032 = vrot.lane.b32.xlu1 %v901_v53, %s4627_s29 }
 0xb21   :  { %v1024_v2 = vpop.permute.xlu0 %1023 }
 0xb22   :  { %v1026_v3 = vmul.f32 %v1024_v2, %v1009_v44 }
 0xb24   :  { %1028 = vrot.lane.b32.xlu0 %v1026_v3, %s4628_s17 }
 0xb8f   :  { %v1033_v57 = vpop.permute.xlu1 %1032 }
 0xb96   :  { %v1029_v4 = vpop.permute.xlu0 %1028 }
 0xb97   :  { %v1035_v6 = vsel %vm190_vm7, %v1029_v4, %v1033_v57  ;;  %3740 = vmatmul.mubr.msk.f32.vlgmr.msra.gmra.mrb[8].mxu0 %vm190_vm7, %v1029_v4 }
 0xb98   :  { %3729 = vmatmul.mubr.msk.f32.vlgmr.msra.gmra.mrb[8].mxu1 %vm342_vm8, %v1035_v6  ;;  %4103 = vmatpush3.bf16.msra.mxu0 %v4838_v47 }
 0xb99   :  { %4104 = vmatprep.subr.bf16.mxu0 %v4624_v0  ;;  %4115 = vmatpush3.bf16.msra.mxu1 %v4774_v5 }
 0xb9a   :  { %4116 = vmatprep.subr.bf16.mxu1 %v4624_v0  ;;  %3769 = vmatprep.mubr.msk.f32.mxu1 %vm4625_vm0, %v4626_v1 }
 0xb9b   :  { %3758 = vmatprep.mubr.msk.f32.mxu0 %vm4625_vm0, %v4626_v1 }
 0xb9c   :  { %4106 = vmatpush3.bf16.msra.mxu0 %v4844_v49 }
 0xb9d   :  { %4107 = vmatprep.subr.bf16.mxu0 %v4624_v0  ;;  %4118 = vmatpush3.bf16.msra.mxu1 %v4786_v10 }
 0xb9e   :  { %4119 = vmatprep.subr.bf16.mxu1 %v4624_v0 }
 0xba0   :  { %4109 = vmatpush3.bf16.msra.mxu0 %v4854_v52 }
 0xba1   :  { %4110 = vmatprep.subr.bf16.mxu0 %v4624_v0 }
 0xba4   :  { %4112 = vmatpush3.bf16.msra.mxu0 %v4865_v56 }
 0xba5   :  { %4131 = vmatprep.subr.bf16.mxu0 %v4624_v0 }
 0xc6a   :  { %v1202_v7 = vpop.f32.mrb[8].mxu0 }
 0xc6b   :  { %v1207_v8 = vrot.slane %v1202_v7, 4  ;;  %v1208_v9 = vrot.slane %v1202_v7, 5  ;;  %v1105_v13 = vpop.f32.mrb[8].mxu1  ;;  %v3741_v15 = vpop.f32.mrb[9].mxu0 }
 0xc6c   :  { %v1106_v16 = vadd.f32 %v4893_v61, %v1105_v13  ;;  %v3730_v17 = vpop.f32.mrb[9].mxu1 }
 0xc6d   :  { %v1211_v18 = vadd.f32 %v1207_v8, %v4804_v12  ;;  %v1212_v19 = vadd.f32 %v4802_v11, %v1208_v9 }
 0xc6e   :  { %v3362_v20 = vmul.f32 -1.442695, %v1106_v16 }
 0xc6f   :  { %v1213_v21 = vadd.f32 %v4809_v14, %v1211_v18  ;;  %v1214_v22 = vadd.f32 %v4809_v14, %v1212_v19 }
 0xc70   :  { %4363 = vpow2.f32 %v3362_v20 }
 0xc71   :  { %4365 = vtanh.f32 %v1213_v21  ;;  %v3364_v23 = vmul.f32 -1.442695, %v1213_v21  ;;  %v3365_v24 = vmul.f32 -1.442695, %v1214_v22 }
 0xc72   :  { %4367 = vtanh.f32 %v1214_v22 }
 0xc73   :  { %4369 = vpow2.f32 %v3364_v23 }
 0xc74   :  { %4371 = vpow2.f32 %v3365_v24 }
 0xc75   :  { %4373 = vtanh.f32 %v1106_v16 }
 0xc7a   :  { %v4364_v25 = vpop.eup %4363 }
 0xc7b   :  { %v4366_v26 = vpop.eup %4365  ;;  %v1113_v27 = vadd.f32 1.0, %v4364_v25 }
 0xc7c   :  { %v4368_v28 = vpop.eup %4367  ;;  %v1231_v29 = vrot.slane %v4366_v26, 4 }
 0xc7d   :  { %v4370_v30 = vpop.eup %4369  ;;  %4375 = vrcp.f32 %v1113_v27  ;;  %v1232_v32 = vrot.slane %v4368_v28, 3 }
 0xc7e   :  { %v4372_v33 = vpop.eup %4371  ;;  %v1223_v35 = vadd.f32 1.0, %v4370_v30 }
 0xc7f   :  { %v1224_v36 = vadd.f32 1.0, %v4372_v33  ;;  %v1233_v37 = vsel %vm296_vm3, %v1232_v32, %v1231_v29  ;;  %v4374_v38 = vpop.eup %4373 }
 0xc80   :  { %4377 = vrcp.f32 %v1223_v35 }
 0xc81   :  { %4379 = vrcp.f32 %v1224_v36 }
 0xc87   :  { %v4376_v39 = vpop.eup %4375 }
 0xc88   :  { %v1116_v40 = vsel %vm4817_vm6, %v4374_v38, %v4376_v39 }
 0xc89   :  { %1119 = vrot.lane.b32.xlu1 %v1116_v40, %s4627_s29  ;;  %v1117_v45 = vmul.f32 %v1116_v40, %v5002_v43 }
 0xc8a   :  { %v4378_v41 = vpop.eup %4377 }
 0xc8b   :  { %v4380_v42 = vpop.eup %4379  ;;  %v1237_v44 = vrot.slane %v4378_v41, 4 }
 0xc8c   :  { %v1238_v46 = vrot.slane %v4380_v42, 3 }
 0xc8e   :  { %v1239_v48 = vsel %vm296_vm3, %v1238_v46, %v1237_v44 }
 0xc8f   :  { %v1241_v51 = vsel %vm4817_vm6, %v1233_v37, %v1239_v48 }
 0xc90   :  { %1244 = vrot.lane.b32.xlu0 %v1241_v51, %s4627_s29  ;;  %v1242_v63 = vmul.f32 %v1241_v51, %v5006_v60 }
 0xcfb   :  { %v1120_v54 = vpop.permute.xlu1 %1119 }
 0xcfc   :  { %v1122_v55 = vmul.f32 %v1120_v54, %v1116_v40 }
 0xcfe   :  { %1124 = vrot.lane.b32.xlu1 %v1122_v55, %s4628_s17 }
 0xd02   :  { %v1245_v58 = vpop.permute.xlu0 %1244 }
 0xd03   :  { %v1247_v59 = vmul.f32 %v1245_v58, %v1241_v51 }
 0xd05   :  { %1249 = vrot.lane.b32.xlu0 %v1247_v59, %s4628_s17 }
 0xd70   :  { %v1125_v62 = vpop.permute.xlu1 %1124 }
 0xd71   :  { %v5048_v50 = vadd.f32 %v1125_v62, %v1117_v45 }
 0xd73   :  { %4381 = vtanh.f32 %v5048_v50 }
 0xd77   :  { %v1250_v53 = vpop.permute.xlu0 %1249 }
 0xd78   :  { %v5052_v2 = vadd.f32 %v1250_v53, %v1242_v63 }
 0xd7a   :  { %4383 = vtanh.f32 %v5052_v2 }
 0xd7d   :  { %v4382_v3 = vpop.eup %4381 }
 0xd7e   :  { %1130 = vrot.lane.b32.xlu1 %v4382_v3, %s4627_s29 }
 0xd84   :  { %v4384_v57 = vpop.eup %4383 }
 0xd85   :  { %1255 = vrot.lane.b32.xlu0 %v4384_v57, %s4627_s29 }
 0xdf0   :  { %v1131_v4 = vpop.permute.xlu1 %1130 }
 0xdf1   :  { %v1133_v43 = vmul.f32 %v1131_v4, %v1116_v40 }
 0xdf3   :  { %1264 = vrot.lane.b32.xlu1 %v1133_v43, %s4627_s29 }
 0xdf7   :  { %v1256_v6 = vpop.permute.xlu0 %1255 }
 0xdf8   :  { %v1258_v7 = vmul.f32 %v1256_v6, %v1241_v51 }
 0xdfa   :  { %1260 = vrot.lane.b32.xlu0 %v1258_v7, %s4628_s17 }
 0xe65   :  { %v1265_v60 = vpop.permute.xlu1 %1264 }
 0xe6c   :  { %v1261_v8 = vpop.permute.xlu0 %1260 }
 0xe6d   :  { %v1267_v9 = vsel %vm190_vm7, %v1261_v8, %v1265_v60  ;;  %3770 = vmatmul.mubr.msk.f32.vlgmr.msra.gmra.mrb[10].mxu1 %vm190_vm7, %v1261_v8 }
 0xe6e   :  { %3759 = vmatmul.mubr.msk.f32.vlgmr.msra.gmra.mrb[10].mxu0 %vm342_vm8, %v1267_v9  ;;  %4121 = vmatpush3.bf16.msra.mxu1 %v4838_v47 }
 0xe6f   :  { %4122 = vmatprep.subr.bf16.mxu1 %v4624_v0  ;;  %4133 = vmatpush3.bf16.msra.mxu0 %v4774_v5 }
 0xe70   :  { %4134 = vmatprep.subr.bf16.mxu0 %v4624_v0  ;;  %3799 = vmatprep.mubr.msk.f32.mxu0 %vm4625_vm0, %v4626_v1 }
 0xe71   :  { %3788 = vmatprep.mubr.msk.f32.mxu1 %vm4625_vm0, %v4626_v1 }
 0xe72   :  { %4124 = vmatpush3.bf16.msra.mxu1 %v4844_v49 }
 0xe73   :  { %4125 = vmatprep.subr.bf16.mxu1 %v4624_v0  ;;  %4136 = vmatpush3.bf16.msra.mxu0 %v4786_v10 }
 0xe74   :  { %4137 = vmatprep.subr.bf16.mxu0 %v4624_v0 }
 0xe76   :  { %4127 = vmatpush3.bf16.msra.mxu1 %v4854_v52 }
 0xe77   :  { %4128 = vmatprep.subr.bf16.mxu1 %v4624_v0 }
 0xe7a   :  { %4130 = vmatpush3.bf16.msra.mxu1 %v4865_v56 }
 0xe7b   :  { %4149 = vmatprep.subr.bf16.mxu1 %v4624_v0 }
 0xf40   :  { %v1434_v13 = vpop.f32.mrb[10].mxu1 }
 0xf41   :  { %v1439_v15 = vrot.slane %v1434_v13, 3  ;;  %v1440_v16 = vrot.slane %v1434_v13, 4  ;;  %v1337_v17 = vpop.f32.mrb[10].mxu0  ;;  %v3771_v18 = vpop.f32.mrb[11].mxu1 }
 0xf42   :  { %v1338_v19 = vadd.f32 %v4893_v61, %v1337_v17  ;;  %v3760_v20 = vpop.f32.mrb[11].mxu0 }
 0xf43   :  { %v1443_v21 = vadd.f32 %v1439_v15, %v4804_v12  ;;  %v1444_v22 = vadd.f32 %v4802_v11, %v1440_v16 }
 0xf44   :  { %v3367_v23 = vmul.f32 -1.442695, %v1338_v19 }
 0xf45   :  { %v1445_v24 = vadd.f32 %v4809_v14, %v1443_v21  ;;  %v1446_v25 = vadd.f32 %v4809_v14, %v1444_v22 }
 0xf46   :  { %4385 = vpow2.f32 %v3367_v23 }
 0xf47   :  { %4387 = vtanh.f32 %v1445_v24  ;;  %v3369_v26 = vmul.f32 -1.442695, %v1445_v24  ;;  %v3370_v27 = vmul.f32 -1.442695, %v1446_v25  ;;  %v5130_v24 = vld [vmem:[%s5536_s4] ss:$0 sm:$0xff] }
 0xf48   :  { %4389 = vtanh.f32 %v1446_v25 }
 0xf49   :  { %4391 = vpow2.f32 %v3369_v26 }
 0xf4a   :  { %4393 = vpow2.f32 %v3370_v27 }
 0xf4b   :  { %4395 = vtanh.f32 %v1338_v19 }
 0xf50   :  { %v4386_v28 = vpop.eup %4385 }
 0xf51   :  { %v4388_v29 = vpop.eup %4387  ;;  %v1345_v30 = vadd.f32 1.0, %v4386_v28 }
 0xf52   :  { %v4390_v32 = vpop.eup %4389  ;;  %v1463_v33 = vrot.slane %v4388_v29, 5 }
 0xf53   :  { %v4392_v35 = vpop.eup %4391  ;;  %4397 = vrcp.f32 %v1345_v30  ;;  %v1464_v36 = vrot.slane %v4390_v32, 4 }
 0xf54   :  { %v4394_v37 = vpop.eup %4393  ;;  %v1455_v38 = vadd.f32 1.0, %v4392_v35 }
 0xf55   :  { %v1456_v39 = vadd.f32 1.0, %v4394_v37  ;;  %v1465_v14 = vsel %vm296_vm3, %v1464_v36, %v1463_v33  ;;  %v4396_v40 = vpop.eup %4395 }
 0xf56   :  { %4399 = vrcp.f32 %v1455_v38 }
 0xf57   :  { %4401 = vrcp.f32 %v1456_v39 }
 0xf5d   :  { %v4398_v41 = vpop.eup %4397 }
 0xf5e   :  { %v1348_v42 = vsel %vm4817_vm6, %v4396_v40, %v4398_v41 }
 0xf5f   :  { %1351 = vrot.lane.b32.xlu1 %v1348_v42, %s4627_s29  ;;  %v1349_v63 = vmul.f32 %v1348_v42, %v5048_v50 }
 0xf60   :  { %v4400_v44 = vpop.eup %4399 }
 0xf61   :  { %v4402_v46 = vpop.eup %4401  ;;  %v1469_v48 = vrot.slane %v4400_v44, 5 }
 0xf62   :  { %v1470_v51 = vrot.slane %v4402_v46, 4 }
 0xf64   :  { %v1471_v54 = vsel %vm296_vm3, %v1470_v51, %v1469_v48 }
 0xf65   :  { %v1473_v55 = vsel %vm4817_vm6, %v1465_v14, %v1471_v54 }
 0xf66   :  { %1476 = vrot.lane.b32.xlu0 %v1473_v55, %s4627_s29  ;;  %v1474_v57 = vmul.f32 %v1473_v55, %v5052_v2 }
 0xfd1   :  { %v1352_v58 = vpop.permute.xlu1 %1351 }
 0xfd2   :  { %v1354_v59 = vmul.f32 %v1352_v58, %v1348_v42 }
 0xfd4   :  { %1356 = vrot.lane.b32.xlu1 %v1354_v59, %s4628_s17 }
 0xfd8   :  { %v1477_v45 = vpop.permute.xlu0 %1476 }
 0xfd9   :  { %v1479_v62 = vmul.f32 %v1477_v45, %v1473_v55 }
 0xfdb   :  { %1481 = vrot.lane.b32.xlu0 %v1479_v62, %s4628_s17 }
0x1046   :  { %v1357_v53 = vpop.permute.xlu1 %1356 }
0x1047   :  { %v5094_v3 = vadd.f32 %v1357_v53, %v1349_v63 }
0x1049   :  { %4403 = vtanh.f32 %v5094_v3 }
0x104d   :  { %v1482_v4 = vpop.permute.xlu0 %1481 }
0x104e   :  { %v5098_v43 = vadd.f32 %v1482_v4, %v1474_v57 }
0x1050   :  { %4405 = vtanh.f32 %v5098_v43 }
0x1053   :  { %v4404_v6 = vpop.eup %4403 }
0x1054   :  { %1362 = vrot.lane.b32.xlu1 %v4404_v6, %s4627_s29 }
0x105a   :  { %v4406_v7 = vpop.eup %4405 }
0x105b   :  { %1487 = vrot.lane.b32.xlu0 %v4406_v7, %s4627_s29 }
0x10c6   :  { %v1363_v60 = vpop.permute.xlu1 %1362 }
0x10c7   :  { %v1365_v50 = vmul.f32 %v1363_v60, %v1348_v42 }
0x10c9   :  { %1496 = vrot.lane.b32.xlu1 %v1365_v50, %s4627_s29 }
0x10cd   :  { %v1488_v8 = vpop.permute.xlu0 %1487 }
0x10ce   :  { %v1490_v9 = vmul.f32 %v1488_v8, %v1473_v55 }
0x10d0   :  { %1492 = vrot.lane.b32.xlu0 %v1490_v9, %s4628_s17 }
0x113b   :  { %v1497_v2 = vpop.permute.xlu1 %1496 }
0x1142   :  { %v1493_v13 = vpop.permute.xlu0 %1492 }
0x1143   :  { %v1499_v15 = vsel %vm190_vm7, %v1493_v13, %v1497_v2  ;;  %3800 = vmatmul.mubr.msk.f32.vlgmr.msra.gmra.mrb[12].mxu0 %vm190_vm7, %v1493_v13 }
0x1144   :  { %3789 = vmatmul.mubr.msk.f32.vlgmr.msra.gmra.mrb[12].mxu1 %vm342_vm8, %v1499_v15  ;;  %4139 = vmatpush3.bf16.msra.mxu0 %v4838_v47 }
0x1145   :  { %4140 = vmatprep.subr.bf16.mxu0 %v4624_v0  ;;  %4151 = vmatpush3.bf16.msra.mxu1 %v4774_v5 }
0x1146   :  { %4152 = vmatprep.subr.bf16.mxu1 %v4624_v0  ;;  %3829 = vmatprep.mubr.msk.f32.mxu1 %vm4625_vm0, %v4626_v1 }
0x1147   :  { %3818 = vmatprep.mubr.msk.f32.mxu0 %vm4625_vm0, %v4626_v1 }
0x1148   :  { %4142 = vmatpush3.bf16.msra.mxu0 %v4844_v49 }
0x1149   :  { %4143 = vmatprep.subr.bf16.mxu0 %v4624_v0  ;;  %4154 = vmatpush3.bf16.msra.mxu1 %v4786_v10 }
0x114a   :  { %4155 = vmatprep.subr.bf16.mxu1 %v4624_v0 }
0x114c   :  { %4145 = vmatpush3.bf16.msra.mxu0 %v4854_v52 }
0x114d   :  { %4146 = vmatprep.subr.bf16.mxu0 %v4624_v0 }
0x1150   :  { %4148 = vmatpush3.bf16.msra.mxu0 %v4865_v56 }
0x1151   :  { %4167 = vmatprep.subr.bf16.mxu0 %v4624_v0 }
0x1216   :  { %v1666_v5 = vpop.f32.mrb[12].mxu0 }
0x1217   :  { %v1671_v16 = vrot.slane %v1666_v5, 2  ;;  %v1672_v17 = vrot.slane %v1666_v5, 3  ;;  %v1569_v18 = vpop.f32.mrb[12].mxu1  ;;  %v3801_v19 = vpop.f32.mrb[13].mxu0 }
0x1218   :  { %v1570_v20 = vadd.f32 %v4893_v61, %v1569_v18  ;;  %v3790_v21 = vpop.f32.mrb[13].mxu1  ;;  %v5174_v19 = vld [vmem:[%s5538_s6] ss:$0 sm:$0xff] }
0x1219   :  { %v1675_v10 = vadd.f32 %v1671_v16, %v4804_v12  ;;  %v1676_v22 = vadd.f32 %v4802_v11, %v1672_v17 }
0x121a   :  { %v3372_v23 = vmul.f32 -1.442695, %v1570_v20 }
0x121b   :  { %v1677_v25 = vadd.f32 %v5130_v24, %v1675_v10  ;;  %v1678_v26 = vadd.f32 %v5130_v24, %v1676_v22 }
0x121c   :  { %4407 = vpow2.f32 %v3372_v23 }
0x121d   :  { %4409 = vtanh.f32 %v1677_v25  ;;  %v3374_v27 = vmul.f32 -1.442695, %v1677_v25  ;;  %v3375_v28 = vmul.f32 -1.442695, %v1678_v26 }
0x121e   :  { %4411 = vtanh.f32 %v1678_v26 }
0x121f   :  { %4413 = vpow2.f32 %v3374_v27 }
0x1220   :  { %4415 = vpow2.f32 %v3375_v28 }
0x1221   :  { %4417 = vtanh.f32 %v1570_v20 }
0x1226   :  { %v4408_v61 = vpop.eup %4407 }
0x1227   :  { %v4410_v29 = vpop.eup %4409  ;;  %v1577_v30 = vadd.f32 1.0, %v4408_v61 }
0x1228   :  { %v4412_v32 = vpop.eup %4411  ;;  %v1695_v33 = vrot.slane %v4410_v29, 6 }
0x1229   :  { %v4414_v35 = vpop.eup %4413  ;;  %4419 = vrcp.f32 %v1577_v30  ;;  %v1696_v36 = vrot.slane %v4412_v32, 5 }
0x122a   :  { %v4416_v37 = vpop.eup %4415  ;;  %v1687_v38 = vadd.f32 1.0, %v4414_v35 }
0x122b   :  { %v1688_v39 = vadd.f32 1.0, %v4416_v37  ;;  %v1697_v14 = vsel %vm296_vm3, %v1696_v36, %v1695_v33  ;;  %v4418_v40 = vpop.eup %4417 }
0x122c   :  { %4421 = vrcp.f32 %v1687_v38 }
0x122d   :  { %4423 = vrcp.f32 %v1688_v39 }
0x1233   :  { %v4420_v41 = vpop.eup %4419 }
0x1234   :  { %v1580_v42 = vsel %vm4817_vm6, %v4418_v40, %v4420_v41 }
0x1235   :  { %1583 = vrot.lane.b32.xlu1 %v1580_v42, %s4627_s29  ;;  %v1581_v63 = vmul.f32 %v1580_v42, %v5094_v3 }
0x1236   :  { %v4422_v44 = vpop.eup %4421 }
0x1237   :  { %v4424_v46 = vpop.eup %4423  ;;  %v1701_v48 = vrot.slane %v4422_v44, 6 }
0x1238   :  { %v1702_v51 = vrot.slane %v4424_v46, 5 }
0x123a   :  { %v1703_v54 = vsel %vm296_vm3, %v1702_v51, %v1701_v48 }
0x123b   :  { %v1705_v55 = vsel %vm4817_vm6, %v1697_v14, %v1703_v54  ;;  %v4629_v54 = vmov 0  }
0x123c   :  { %1708 = vrot.lane.b32.xlu0 %v1705_v55, %s4627_s29  ;;  %v1706_v4 = vmul.f32 %v1705_v55, %v5098_v43 }
0x123d   :  { %4280 = vset.pattern.permute.xlu0 %v4629_v54 }
0x12a7   :  { %v1584_v58 = vpop.permute.xlu1 %1583 }
0x12a8   :  { %v1586_v59 = vmul.f32 %v1584_v58, %v1580_v42 }
0x12aa   :  { %1588 = vrot.lane.b32.xlu1 %v1586_v59, %s4628_s17 }
0x12ae   :  { %v1709_v45 = vpop.permute.xlu0 %1708 }
0x12af   :  { %v1711_v62 = vmul.f32 %v1709_v45, %v1705_v55 }
0x12b1   :  { %1713 = vrot.lane.b32.xlu0 %v1711_v62, %s4628_s17 }
0x131c   :  { %v1589_v53 = vpop.permute.xlu1 %1588 }
0x131d   :  { %v5145_v57 = vadd.f32 %v1589_v53, %v1581_v63 }
0x131f   :  { %4425 = vtanh.f32 %v5145_v57 }
0x1323   :  { %v1714_v6 = vpop.permute.xlu0 %1713 }
0x1324   :  { %v5149_v7 = vadd.f32 %v1714_v6, %v1706_v4  ;;  %v2062_v6 = vld [vmem:[%s5533_s1] sm:$0x3]  ;;  %s4631_s1 = smov 36  }
0x1326   :  { %4427 = vtanh.f32 %v5149_v7 }
0x1329   :  { %v4426_v60 = vpop.eup %4425 }
0x132a   :  { %1594 = vrot.lane.b32.xlu1 %v4426_v60, %s4627_s29  ;;  %v2096_v60 = vld [vmem:[#allocation5] sm:$0xff] }
0x1330   :  { %v4428_v50 = vpop.eup %4427 }
0x1331   :  { %1719 = vrot.lane.b32.xlu0 %v4428_v50, %s4627_s29  ;;  %v2097_v50 = vld [vmem:[#allocation5 + $0x8] sm:$0xff] }
0x139c   :  { %v1595_v8 = vpop.permute.xlu1 %1594 }
0x139d   :  { %v1597_v3 = vmul.f32 %v1595_v8, %v1580_v42  ;;  %v2098_v8 = vld [vmem:[#allocation5 + $0x10] sm:$0xff] }
0x139f   :  { %1728 = vrot.lane.b32.xlu1 %v1597_v3, %s4627_s29  ;;  %v2099_v3 = vld [vmem:[#allocation5 + $0x18] sm:$0xff] }
0x13a3   :  { %v1720_v9 = vpop.permute.xlu0 %1719 }
0x13a4   :  { %v1722_v2 = vmul.f32 %v1720_v9, %v1705_v55  ;;  %v4630_v55 = vmov 1   ;;  %v5209_v9 = vpack.c.bf16 %v2099_v3, %v2098_v8  ;;  %v2221_v8 = vld [vmem:[#allocation7 + $0x10] sm:$0xff] }
0x13a5   :  { %4281 = vset.pattern.permute.xlu1 %v4630_v55 }
0x13a6   :  { %1724 = vrot.lane.b32.xlu0 %v1722_v2, %s4628_s17 }
0x1411   :  { %v1729_v43 = vpop.permute.xlu1 %1728 }
0x1418   :  { %v1725_v13 = vpop.permute.xlu0 %1724 }
0x1419   :  { %v1731_v15 = vsel %vm190_vm7, %v1725_v13, %v1729_v43  ;;  %3830 = vmatmul.mubr.msk.f32.vlgmr.msra.gmra.mrb[14].mxu1 %vm190_vm7, %v1725_v13  ;;  %v5213_v43 = vld [vmem:[#allocation5 + $0x20] sm:$0xf] }
0x141a   :  { %3819 = vmatmul.mubr.msk.f32.vlgmr.msra.gmra.mrb[14].mxu0 %vm342_vm8, %v1731_v15  ;;  %4157 = vmatpush3.bf16.msra.mxu1 %v4838_v47 }
0x141b   :  { %4158 = vmatprep.subr.bf16.mxu1 %v4624_v0  ;;  %3848 = vmatprep.mubr.msk.f32.mxu1 %vm4625_vm0, %v4626_v1 }
0x141c   :  { %3861 = vmatprep.mubr.msk.f32.mxu0 %vm4625_vm0, %v4626_v1 }
0x141e   :  { %4160 = vmatpush3.bf16.msra.mxu1 %v4844_v49 }
0x141f   :  { %4161 = vmatprep.subr.bf16.mxu1 %v4624_v0 }
0x1422   :  { %4163 = vmatpush3.bf16.msra.mxu1 %v4854_v52 }
0x1423   :  { %4164 = vmatprep.subr.bf16.mxu1 %v4624_v0 }
0x1426   :  { %4166 = vmatpush3.bf16.msra.mxu1 %v4865_v56 }
0x1427   :  { %4185 = vmatprep.subr.bf16.mxu1 %v4624_v0 }
0x14ec   :  { %v1898_v47 = vpop.f32.mrb[14].mxu1 }
0x14ed   :  { %v1903_v5 = vrot.slane %v1898_v47, 1  ;;  %v1904_v16 = vrot.slane %v1898_v47, 2  ;;  %v1801_v17 = vpop.f32.mrb[14].mxu0  ;;  %v3831_v18 = vpop.f32.mrb[15].mxu1 }
0x14ee   :  { %v1802_v49 = vadd.f32 %v5174_v19, %v1801_v17  ;;  %v3820_v20 = vpop.f32.mrb[15].mxu0  ;;  %v2063_v17 = vld [vmem:[%s5545_s13] sm:$0x3] }
0x14ef   :  { %v1907_v52 = vadd.f32 %v1903_v5, %v4804_v12  ;;  %v1908_v21 = vadd.f32 %v4802_v11, %v1904_v16  ;;  %v2071_v5 = vshrl.u32 %v92_v31, 7 }
0x14f0   :  { %v3377_v56 = vmul.f32 -1.442695, %v1802_v49 }
0x14f1   :  { %v1909_v10 = vadd.f32 %v5130_v24, %v1907_v52  ;;  %v1910_v22 = vadd.f32 %v5130_v24, %v1908_v21  ;;  %v2072_v16 = vsub.s32 0, %v2071_v5 }
0x14f2   :  { %4429 = vpow2.f32 %v3377_v56 }
0x14f3   :  { %4431 = vtanh.f32 %v1909_v10  ;;  %v3379_v23 = vmul.f32 -1.442695, %v1909_v10  ;;  %v3380_v25 = vmul.f32 -1.442695, %v1910_v22  ;;  %v5225_v18 = vrot.slane %v2063_v17, %v2072_v16  ;;  %v5233_v10 = vld [vmem:[%s5546_s14] ss:$0 sm:$0xff] }
0x14f4   :  { %4433 = vtanh.f32 %v1910_v22  ;;  %v2225_v16 = vld [vmem:[#allocation7 + $0x30] sm:$0xff] }
0x14f5   :  { %4435 = vpow2.f32 %v3379_v23 }
0x14f6   :  { %4437 = vpow2.f32 %v3380_v25 }
0x14f7   :  { %4439 = vtanh.f32 %v1802_v49  ;;  %v2088_v49 = vsub.s32 1, %v2071_v5 }
0x14f9   :  { %v5228_v56 = vrot.slane %v2063_v17, %v2088_v49  ;;  %v2226_v17 = vld [vmem:[#allocation7 + $0x38] sm:$0xff] }
0x14fa   :  { %v5282_v49 = vpack.c.bf16 %v2226_v17, %v2225_v16 }
0x14fc   :  { %v4430_v26 = vpop.eup %4429 }
0x14fd   :  { %v4432_v27 = vpop.eup %4431  ;;  %v1809_v28 = vadd.f32 1.0, %v4430_v26 }
0x14fe   :  { %v4434_v61 = vpop.eup %4433  ;;  %v1927_v12 = vrot.slane %v4432_v27, 7 }
0x14ff   :  { %v4436_v29 = vpop.eup %4435  ;;  %4441 = vrcp.f32 %v1809_v28  ;;  %v1928_v11 = vrot.slane %v4434_v61, 6 }
0x1500   :  { %v4438_v30 = vpop.eup %4437  ;;  %v1919_v32 = vadd.f32 1.0, %v4436_v29 }
0x1501   :  { %v1920_v33 = vadd.f32 1.0, %v4438_v30  ;;  %v1929_v24 = vsel %vm296_vm3, %v1928_v11, %v1927_v12  ;;  %v4440_v35 = vpop.eup %4439  ;;  %v5249_v30 = vld [vmem:[%s5540_s8] ss:$0 sm:$0xff] }
0x1502   :  { %4443 = vrcp.f32 %v1919_v32 }
0x1503   :  { %4445 = vrcp.f32 %v1920_v33 }
0x1509   :  { %v4442_v36 = vpop.eup %4441 }
0x150a   :  { %v1812_v37 = vsel %vm4817_vm6, %v4440_v35, %v4442_v36 }
0x150b   :  { %1815 = vrot.lane.b32.xlu0 %v1812_v37, %s4627_s29  ;;  %v1813_v58 = vmul.f32 %v1812_v37, %v5145_v57 }
0x150c   :  { %v4444_v38 = vpop.eup %4443 }
0x150d   :  { %v4446_v39 = vpop.eup %4445  ;;  %v1933_v14 = vrot.slane %v4444_v38, 7 }
0x150e   :  { %v1934_v40 = vrot.slane %v4446_v39, 6 }
0x1510   :  { %v1935_v41 = vsel %vm296_vm3, %v1934_v40, %v1933_v14 }
0x1511   :  { %v1937_v42 = vsel %vm4817_vm6, %v1929_v24, %v1935_v41 }
0x1512   :  { %1940 = vrot.lane.b32.xlu1 %v1937_v42, %s4627_s29  ;;  %v1938_v62 = vmul.f32 %v1937_v42, %v5149_v7  ;;  %v5205_v7 = vpack.c.bf16 %v2097_v50, %v2096_v60  ;;  %v2219_v60 = vld [vmem:[#allocation7] sm:$0xff]  ;;  %v2220_v50 = vld [vmem:[#allocation7 + $0x8] sm:$0xff] }
0x1513   :  { %v5268_v3 = vpack.c.bf16 %v2220_v50, %v2219_v60 }
0x1514   :  { %4169 = vmatpush3.bf16.msra.mxu0 %v5205_v7 }
0x1515   :  { %4170 = vmatprep.subr.bf16.mxu0 %v4624_v0 }
0x1518   :  { %4172 = vmatpush3.bf16.msra.mxu0 %v5209_v9 }
0x1519   :  { %3859 = vmatprep.subr.mxu0 %v4626_v1 }
0x151c   :  { %3860 = vmatpush3.msk.msra.mxu0 %vm107_vm1, %v5213_v43 }
0x151d   :  { %4173 = vmatprep.subr.bf16.mxu0 %v4624_v0 }
0x157d   :  { %v1816_v44 = vpop.permute.xlu0 %1815 }
0x157e   :  { %v1818_v46 = vmul.f32 %v1816_v44, %v1812_v37 }
0x1580   :  { %1820 = vrot.lane.b32.xlu0 %v1818_v46, %s4628_s17 }
0x1584   :  { %v1941_v48 = vpop.permute.xlu1 %1940 }
0x1585   :  { %v1943_v51 = vmul.f32 %v1941_v48, %v1937_v42 }
0x1587   :  { %1945 = vrot.lane.b32.xlu1 %v1943_v51, %s4628_s17 }
0x15f2   :  { %v1821_v59 = vpop.permute.xlu0 %1820 }
0x15f3   :  { %v5193_v45 = vadd.f32 %v1821_v59, %v1813_v58 }
0x15f5   :  { %4447 = vtanh.f32 %v5193_v45 }
0x15f9   :  { %v1946_v63 = vpop.permute.xlu1 %1945 }
0x15fa   :  { %v5197_v53 = vadd.f32 %v1946_v63, %v1938_v62 }
0x15fc   :  { %4449 = vtanh.f32 %v5197_v53 }
0x15ff   :  { %v4448_v4 = vpop.eup %4447 }
0x1600   :  { %1826 = vrot.lane.b32.xlu0 %v4448_v4, %s4627_s29 }
0x1604   :  { %2067 = vperm.xlu0 %4280, %v2062_v6  }
0x1606   :  { %v4450_v57 = vpop.eup %4449 }
0x1607   :  { %1951 = vrot.lane.b32.xlu1 %v4450_v57, %s4627_s29 }
0x160b   :  { %2083 = vperm.xlu1 %4281, %v2062_v6  }
0x1672   :  { %v1827_v2 = vpop.permute.xlu0 %1826 }
0x1673   :  { %v1829_v13 = vmul.f32 %v1827_v2, %v1812_v37  ;;  %v2222_v2 = vld [vmem:[#allocation7 + $0x18] sm:$0xff] }
0x1675   :  { %1960 = vrot.lane.b32.xlu0 %v1829_v13, %s4627_s29  ;;  %v2223_v13 = vld [vmem:[#allocation7 + $0x20] sm:$0xff] }
0x1679   :  { %v1952_v15 = vpop.permute.xlu1 %1951 }
0x167a   :  { %v1954_v47 = vmul.f32 %v1952_v15, %v1937_v42  ;;  %v2224_v15 = vld [vmem:[#allocation7 + $0x28] sm:$0xff] }
0x167c   :  { %1956 = vrot.lane.b32.xlu1 %v1954_v47, %s4628_s17 }
0x1680   :  { %2092 = vrot.lane.b32.xlu1 %v1954_v47, %s4631_s1  ;;  %v5276_v47 = vpack.c.bf16 %v2224_v15, %v2223_v13 }
0x1683   :  { %v2068_v20 = vpop.permute.xlu0 %2067 }
0x1684   :  { %v2074_v21 = vmul.f32 %v5225_v18, %v2068_v20 }
0x1686   :  { %v2081_v31 = vadd.f32 %v5233_v10, %v2074_v21 }
0x168a   :  { %v2084_v52 = vpop.permute.xlu1 %2083 }
0x168b   :  { %v2090_v22 = vmul.f32 %v5228_v56, %v2084_v52 }
0x168d   :  { %v2091_v27 = vadd.f32 %v2090_v22, %v2081_v31 }
0x16e7   :  { %v1961_v23 = vpop.permute.xlu0 %1960 }
0x16ee   :  { %v1957_v25 = vpop.permute.xlu1 %1956 }
0x16ef   :  { %v1963_v26 = vsel %vm190_vm7, %v1957_v25, %v1961_v23 }
0x16f0   :  { %3849 = vmatmul.mubr.msk.f32.vlgmr.msra.gmra.mrb[16].mxu1 %vm342_vm8, %v1963_v26  ;;  %v5306_v26 = vld [vmem:[%s5542_s10] ss:$0 sm:$0xff] }
0x16f1   :  { %3891 = vmatprep.mubr.msk.f32.mxu1 %vm4625_vm0, %v4626_v1 }
0x16f2   :  { %v2093_v28 = vpop.permute.xlu1 %2092 }
0x16f3   :  { %v2095_v61 = vsel %vm100_vm2, %v2091_v27, %v2093_v28 }
0x16f4   :  { %3862 = vmatmul.mubr.msk.f32.vlgmr.msra.gmra.mrb[16].mxu0 %vm2108_vm9, %v2095_v61 }
0x16f5   :  { %3880 = vmatprep.mubr.msk.f32.mxu0 %vm4625_vm0, %v4626_v1  ;;  %4175 = vmatpush3.bf16.msra.mxu0 %v5268_v3 }
0x16f6   :  { %4176 = vmatprep.subr.bf16.mxu0 %v4624_v0 }
0x17c3   :  { %v2033_v12 = vpop.f32.mrb[16].mxu1 }
0x17c4   :  { %v2034_v29 = vadd.f32 %v5174_v19, %v2033_v12  ;;  %v3850_v11 = vpop.f32.mrb[17].mxu1 }
0x17c6   :  { %v3382_v32 = vmul.f32 -1.442695, %v2034_v29 }
0x17c7   :  { %v2181_v33 = vpop.f32.mrb[16].mxu0 }
0x17c8   :  { %4451 = vpow2.f32 %v3382_v32  ;;  %v2182_v24 = vadd.f32 %v5249_v30, %v2181_v33  ;;  %v3863_v35 = vpop.f32.mrb[17].mxu0 }
0x17ca   :  { %v3387_v36 = vmul.f32 -1.442695, %v2182_v24 }
0x17cc   :  { %4453 = vpow2.f32 %v3387_v36 }
0x17cd   :  { %4455 = vtanh.f32 %v2034_v29 }
0x17d2   :  { %v4452_v37 = vpop.eup %4451 }
0x17d3   :  { %v2041_v38 = vadd.f32 1.0, %v4452_v37 }
0x17d5   :  { %4457 = vrcp.f32 %v2041_v38 }
0x17d6   :  { %v4454_v39 = vpop.eup %4453  ;;  %4459 = vtanh.f32 %v2182_v24 }
0x17d7   :  { %v2189_v19 = vadd.f32 1.0, %v4454_v39  ;;  %v4456_v14 = vpop.eup %4455 }
0x17d9   :  { %4461 = vrcp.f32 %v2189_v19  ;;  %v2332_v19 = vld [vmem:[%s5543_s11] sm:$0xff] }
0x17df   :  { %v4458_v40 = vpop.eup %4457 }
0x17e0   :  { %v2044_v41 = vsel %vm4817_vm6, %v4456_v14, %v4458_v40  ;;  %v4460_v42 = vpop.eup %4459  ;;  %v2333_v14 = vld [vmem:[%s5543_s11 + $0x8] sm:$0xff]  ;;  %v2334_v40 = vld [vmem:[%s5543_s11 + $0x10] sm:$0xff] }
0x17e1   :  { %2047 = vrot.lane.b32.xlu0 %v2044_v41, %s4627_s29  ;;  %v2045_v59 = vmul.f32 %v2044_v41, %v5193_v45  ;;  %v5271_v45 = vpack.c.bf16 %v2222_v2, %v2221_v8 }
0x17e3   :  { %v4462_v44 = vpop.eup %4461  ;;  %4178 = vmatpush3.bf16.msra.mxu0 %v5271_v45 }
0x17e4   :  { %v2192_v46 = vsel %vm4817_vm6, %v4460_v42, %v4462_v44  ;;  %4179 = vmatprep.subr.bf16.mxu0 %v4624_v0  ;;  %v2335_v42 = vld [vmem:[%s5543_s11 + $0x18] sm:$0xff] }
0x17e5   :  { %2195 = vrot.lane.b32.xlu1 %v2192_v46, %s4627_s29  ;;  %v2193_v4 = vmul.f32 %v2192_v46, %v5197_v53  ;;  %v5332_v44 = vpack.c.bf16 %v2335_v42, %v2334_v40 }
0x17e7   :  { %4181 = vmatpush3.bf16.msra.mxu0 %v5276_v47 }
0x17e8   :  { %4182 = vmatprep.subr.bf16.mxu0 %v4624_v0 }
0x17eb   :  { %4184 = vmatpush3.bf16.msra.mxu0 %v5282_v49 }
0x17ec   :  { %4197 = vmatprep.subr.bf16.mxu0 %v4624_v0 }
0x1853   :  { %v2048_v48 = vpop.permute.xlu0 %2047 }
0x1854   :  { %v2050_v51 = vmul.f32 %v2048_v48, %v2044_v41 }
0x1856   :  { %2052 = vrot.lane.b32.xlu0 %v2050_v51, %s4628_s17 }
0x1857   :  { %v2196_v54 = vpop.permute.xlu1 %2195 }
0x1858   :  { %v2198_v58 = vmul.f32 %v2196_v54, %v2192_v46 }
0x185a   :  { %2200 = vrot.lane.b32.xlu1 %v2198_v58, %s4628_s17  ;;  %v5352_v58 = vld [vmem:[%s5544_s12] ss:$0 sm:$0xff]  ;;  %s4632_s12 = smov 2  }
0x18c8   :  { %v2053_v62 = vpop.permute.xlu0 %2052 }
0x18c9   :  { %v5261_v63 = vadd.f32 %v2053_v62, %v2045_v59 }
0x18cb   :  { %4463 = vtanh.f32 %v5261_v63 }
0x18cc   :  { %v2201_v6 = vpop.permute.xlu1 %2200 }
0x18cd   :  { %v5265_v57 = vadd.f32 %v2201_v6, %v2193_v4 }
0x18cf   :  { %4465 = vtanh.f32 %v5265_v57 }
0x18d5   :  { %v4464_v53 = vpop.eup %4463 }
0x18d6   :  { %2058 = vrot.lane.b32.xlu0 %v4464_v53, %s4627_s29 }
0x18d9   :  { %v4466_v5 = vpop.eup %4465 }
0x18da   :  { %2206 = vrot.lane.b32.xlu1 %v4466_v5, %s4627_s29 }
0x1948   :  { %v2059_v20 = vpop.permute.xlu0 %2058 }
0x1949   :  { %v2061_v52 = vmul.f32 %v2059_v20, %v2044_v41  ;;  %v5326_v41 = vpack.c.bf16 %v2333_v14, %v2332_v19 }
0x194b   :  { %2215 = vrot.lane.b32.xlu1 %v2061_v52, %s4627_s29  ;;  %4187 = vmatpush3.bf16.msra.mxu1 %v5326_v41 }
0x194c   :  { %v2207_v21 = vpop.permute.xlu1 %2206  ;;  %4188 = vmatprep.subr.bf16.mxu1 %v4624_v0 }
0x194d   :  { %v5287_v31 = vmul.f32 %v2207_v21, %v2192_v46 }
0x194f   :  { %2211 = vrot.lane.b32.xlu0 %v5287_v31, %s4628_s17  ;;  %4190 = vmatpush3.bf16.msra.mxu1 %v5332_v44 }
0x1950   :  { %4191 = vmatprep.subr.bf16.mxu1 %v4624_v0 }
0x19bd   :  { %v2216_v22 = vpop.permute.xlu1 %2215 }
0x19c1   :  { %v2212_v23 = vpop.permute.xlu0 %2211 }
0x19c2   :  { %v2218_v25 = vsel %vm190_vm7, %v2212_v23, %v2216_v22 }
0x19c3   :  { %3881 = vmatmul.mubr.msk.f32.vlgmr.msra.gmra.mrb[18].mxu0 %vm342_vm8, %v2218_v25 }
0x19c4   :  { %4199 = vmatpush3.bf16.msra.mxu0 %v5268_v3  ;;  %3923 = vmatprep.mubr.msk.f32.mxu0 %vm4625_vm0, %v4626_v1 }
0x19c5   :  { %4200 = vmatprep.subr.bf16.mxu0 %v4624_v0 }
0x19c8   :  { %4202 = vmatpush3.bf16.msra.mxu0 %v5271_v45 }
0x19c9   :  { %4203 = vmatprep.subr.bf16.mxu0 %v4624_v0 }
0x19cc   :  { %4205 = vmatpush3.bf16.msra.mxu0 %v5276_v47 }
0x19cd   :  { %4206 = vmatprep.subr.bf16.mxu0 %v4624_v0 }
0x19d0   :  { %4208 = vmatpush3.bf16.msra.mxu0 %v5282_v49 }
0x19d1   :  { %4221 = vmatprep.subr.bf16.mxu0 %v4624_v0 }
0x1a96   :  { %v2303_v27 = vpop.f32.mrb[18].mxu0 }
0x1a97   :  { %v2304_v28 = vadd.f32 %v5306_v26, %v2303_v27  ;;  %v3882_v61 = vpop.f32.mrb[19].mxu0 }
0x1a99   :  { %v3390_v12 = vmul.f32 -1.442695, %v2304_v28 }
0x1a9b   :  { %4467 = vpow2.f32 %v3390_v12 }
0x1a9c   :  { %4469 = vtanh.f32 %v2304_v28 }
0x1aa5   :  { %v4468_v29 = vpop.eup %4467 }
0x1aa6   :  { %v2311_v11 = vadd.f32 1.0, %v4468_v29  ;;  %v4470_v32 = vpop.eup %4469 }
0x1aa8   :  { %4471 = vrcp.f32 %v2311_v11 }
0x1ab2   :  { %v4472_v33 = vpop.eup %4471 }
0x1ab3   :  { %v2314_v24 = vsel %vm4817_vm6, %v4470_v32, %v4472_v33 }
0x1ab4   :  { %2317 = vrot.lane.b32.xlu0 %v2314_v24, %s4627_s29  ;;  %v2315_v37 = vmul.f32 %v2314_v24, %v5261_v63 }
0x1b26   :  { %v2318_v35 = vpop.permute.xlu0 %2317 }
0x1b27   :  { %v2320_v36 = vmul.f32 %v2318_v35, %v2314_v24 }
0x1b29   :  { %2322 = vrot.lane.b32.xlu1 %v2320_v36, %s4628_s17 }
0x1b9b   :  { %v2323_v38 = vpop.permute.xlu1 %2322 }
0x1b9c   :  { %v5314_v39 = vadd.f32 %v2323_v38, %v2315_v37 }
0x1b9e   :  { %4473 = vtanh.f32 %v5314_v39 }
0x1ba8   :  { %v4474_v46 = vpop.eup %4473 }
0x1ba9   :  { %2328 = vrot.lane.b32.xlu0 %v4474_v46, %s4627_s29 }
0x1c1b   :  { %v2329_v48 = vpop.permute.xlu0 %2328 }
0x1c1c   :  { %v2331_v51 = vmul.f32 %v2329_v48, %v2314_v24 }
0x1c1e   :  { %2344 = vrot.lane.b32.xlu1 %v2331_v51, %s4628_s17 }
0x1c90   :  { %v2345_v54 = vpop.permute.xlu1 %2344 }
0x1c91   :  { %3892 = vmatmul.mubr.msk.f32.vlgmr.msra.gmra.mrb[18].mxu1 %vm190_vm7, %v2345_v54 }
0x1c92   :  { %4193 = vmatpush3.bf16.msra.mxu1 %v5205_v7  ;;  %3904 = vmatprep.mubr.msk.f32.mxu1 %vm4625_vm0, %v4626_v1 }
0x1c93   :  { %4194 = vmatprep.subr.bf16.mxu1 %v4624_v0 }
0x1c96   :  { %4196 = vmatpush3.bf16.msra.mxu1 %v5209_v9 }
0x1c97   :  { %3902 = vmatprep.subr.mxu1 %v4626_v1 }
0x1c9a   :  { %3903 = vmatpush3.msk.msra.mxu1 %vm107_vm1, %v5213_v43 }
0x1c9b   :  { %4209 = vmatprep.subr.bf16.mxu1 %v4624_v0 }
0x1d64   :  { %v2414_v59 = vpop.f32.mrb[18].mxu1 }
0x1d65   :  { %v5355_v62 = vadd.f32 %v5352_v58, %v2414_v59  ;;  %v3893_v63 = vpop.f32.mrb[19].mxu1 }
0x1d67   :  { %2426 = vperm.xlu1 %4281, %v5355_v62   ;;  %2420 = vperm.xlu0 %4280, %v5355_v62  }
0x1d6b   :  { %2431 = vrot.lane.b32.xlu0 %v5287_v31, %s4631_s1 }
0x1de6   :  { %v2427_v4 = vpop.permute.xlu1 %2426  ;;  %v2421_v6 = vpop.permute.xlu0 %2420 }
0x1de7   :  { %v2423_v60 = vmul.f32 %v2421_v6, %v5225_v18  ;;  %v2429_v50 = vmul.f32 %v2427_v4, %v5228_v56 }
0x1de9   :  { %v2424_v8 = vadd.f32 %v5233_v10, %v2423_v60 }
0x1dea   :  { %v2432_v13 = vpop.permute.xlu0 %2431 }
0x1deb   :  { %v2430_v2 = vadd.f32 %v2429_v50, %v2424_v8 }
0x1ded   :  { %v2434_v15 = vsel %vm100_vm2, %v2430_v2, %v2432_v13 }
0x1dee   :  { %3905 = vmatmul.mubr.msk.f32.vlgmr.msra.gmra.mrb[20].mxu1 %vm2108_vm9, %v2434_v15 }
0x1def   :  { %4211 = vmatpush3.bf16.msra.mxu1 %v5326_v41  ;;  %3934 = vmatprep.mubr.msk.f32.mxu1 %vm4625_vm0, %v4626_v1 }
0x1df0   :  { %4212 = vmatprep.subr.bf16.mxu1 %v4624_v0 }
0x1df3   :  { %4214 = vmatpush3.bf16.msra.mxu1 %v5332_v44 }
0x1df4   :  { %4215 = vmatprep.subr.bf16.mxu1 %v4624_v0 }
0x1ec1   :  { %v2504_v53 = vpop.f32.mrb[20].mxu1 }
0x1ec2   :  { %v2505_v5 = vadd.f32 %v5249_v30, %v2504_v53  ;;  %v3906_v16 = vpop.f32.mrb[21].mxu1 }
0x1ec4   :  { %v3395_v17 = vmul.f32 -1.442695, %v2505_v5 }
0x1ec6   :  { %4475 = vpow2.f32 %v3395_v17 }
0x1ec7   :  { %4477 = vtanh.f32 %v2505_v5 }
0x1ed0   :  { %v4476_v20 = vpop.eup %4475 }
0x1ed1   :  { %v2512_v52 = vadd.f32 1.0, %v4476_v20  ;;  %v4478_v21 = vpop.eup %4477 }
0x1ed3   :  { %4479 = vrcp.f32 %v2512_v52 }
0x1edd   :  { %v4480_v31 = vpop.eup %4479 }
0x1ede   :  { %v2515_v22 = vsel %vm4817_vm6, %v4478_v21, %v4480_v31 }
0x1edf   :  { %2518 = vrot.lane.b32.xlu1 %v2515_v22, %s4627_s29  ;;  %v2516_v27 = vmul.f32 %v2515_v22, %v5265_v57 }
0x1f51   :  { %v2519_v23 = vpop.permute.xlu1 %2518 }
0x1f52   :  { %v2521_v25 = vmul.f32 %v2519_v23, %v2515_v22 }
0x1f54   :  { %2523 = vrot.lane.b32.xlu0 %v2521_v25, %s4628_s17 }
0x1fc6   :  { %v2524_v28 = vpop.permute.xlu0 %2523 }
0x1fc7   :  { %v5378_v61 = vadd.f32 %v2524_v28, %v2516_v27 }
0x1fc9   :  { %4481 = vtanh.f32 %v5378_v61 }
0x1fd3   :  { %v4482_v12 = vpop.eup %4481 }
0x1fd4   :  { %2529 = vrot.lane.b32.xlu1 %v4482_v12, %s4627_s29 }
0x1fd8   :  { %2537 = vrot.lane.b32.xlu1 %v2331_v51, %s4627_s29 }
0x2046   :  { %v2530_v29 = vpop.permute.xlu1 %2529 }
0x2047   :  { %v2532_v11 = vmul.f32 %v2530_v29, %v2515_v22 }
0x2049   :  { %2534 = vrot.lane.b32.xlu0 %v2532_v11, %s4628_s17 }
0x204a   :  { %v2538_v32 = vpop.permute.xlu1 %2537 }
0x20bb   :  { %v2535_v33 = vpop.permute.xlu0 %2534 }
0x20bc   :  { %v2540_v24 = vsel %vm190_vm7, %v2535_v33, %v2538_v32 }
0x20bd   :  { %3924 = vmatmul.mubr.msk.f32.vlgmr.msra.gmra.mrb[20].mxu0 %vm342_vm8, %v2540_v24 }
0x20be   :  { %4223 = vmatpush3.bf16.msra.mxu0 %v5268_v3  ;;  %3966 = vmatprep.mubr.msk.f32.mxu0 %vm4625_vm0, %v4626_v1 }
0x20bf   :  { %4224 = vmatprep.subr.bf16.mxu0 %v4624_v0 }
0x20c2   :  { %4226 = vmatpush3.bf16.msra.mxu0 %v5271_v45 }
0x20c3   :  { %4227 = vmatprep.subr.bf16.mxu0 %v4624_v0 }
0x20c6   :  { %4229 = vmatpush3.bf16.msra.mxu0 %v5276_v47 }
0x20c7   :  { %4230 = vmatprep.subr.bf16.mxu0 %v4624_v0 }
0x20ca   :  { %4232 = vmatpush3.bf16.msra.mxu0 %v5282_v49 }
0x20cb   :  { %4239 = vmatprep.subr.bf16.mxu0 %v4624_v0 }
0x2190   :  { %v2610_v57 = vpop.f32.mrb[20].mxu0 }
0x2191   :  { %v2611_v35 = vadd.f32 %v5306_v26, %v2610_v57  ;;  %v3925_v36 = vpop.f32.mrb[21].mxu0 }
0x2193   :  { %v3397_v37 = vmul.f32 -1.442695, %v2611_v35 }
0x2195   :  { %4483 = vpow2.f32 %v3397_v37 }
0x2196   :  { %4485 = vtanh.f32 %v2611_v35 }
0x219f   :  { %v4484_v38 = vpop.eup %4483 }
0x21a0   :  { %v2618_v19 = vadd.f32 1.0, %v4484_v38  ;;  %v4486_v14 = vpop.eup %4485 }
0x21a2   :  { %4487 = vrcp.f32 %v2618_v19 }
0x21ac   :  { %v4488_v40 = vpop.eup %4487 }
0x21ad   :  { %v2621_v42 = vsel %vm4817_vm6, %v4486_v14, %v4488_v40 }
0x21ae   :  { %2624 = vrot.lane.b32.xlu0 %v2621_v42, %s4627_s29  ;;  %v2622_v51 = vmul.f32 %v2621_v42, %v5314_v39 }
0x2220   :  { %v2625_v46 = vpop.permute.xlu0 %2624 }
0x2221   :  { %v2627_v48 = vmul.f32 %v2625_v46, %v2621_v42 }
0x2223   :  { %2629 = vrot.lane.b32.xlu1 %v2627_v48, %s4628_s17 }
0x2295   :  { %v2630_v54 = vpop.permute.xlu1 %2629 }
0x2296   :  { %v5402_v59 = vadd.f32 %v2630_v54, %v2622_v51 }
0x2298   :  { %4489 = vtanh.f32 %v5402_v59 }
0x22a2   :  { %v4490_v63 = vpop.eup %4489 }
0x22a3   :  { %2635 = vrot.lane.b32.xlu0 %v4490_v63, %s4627_s29 }
0x2315   :  { %v2636_v4 = vpop.permute.xlu0 %2635 }
0x2316   :  { %v2638_v6 = vmul.f32 %v2636_v4, %v2621_v42 }
0x2318   :  { %2640 = vrot.lane.b32.xlu1 %v2638_v6, %s4628_s17 }
0x238a   :  { %v2641_v60 = vpop.permute.xlu1 %2640 }
0x238b   :  { %3935 = vmatmul.mubr.msk.f32.vlgmr.msra.gmra.mrb[22].mxu1 %vm190_vm7, %v2641_v60 }
0x238c   :  { %4217 = vmatpush3.bf16.msra.mxu1 %v5205_v7  ;;  %3947 = vmatprep.mubr.msk.f32.mxu1 %vm4625_vm0, %v4626_v1 }
0x238d   :  { %4218 = vmatprep.subr.bf16.mxu1 %v4624_v0 }
0x2390   :  { %4220 = vmatpush3.bf16.msra.mxu1 %v5209_v9 }
0x2391   :  { %3945 = vmatprep.subr.mxu1 %v4626_v1 }
0x2394   :  { %3946 = vmatpush3.msk.msra.mxu1 %vm107_vm1, %v5213_v43 }
0x2395   :  { %4233 = vmatprep.subr.bf16.mxu1 %v4624_v0 }
0x245e   :  { %v2710_v39 = vpop.f32.mrb[22].mxu1 }
0x245f   :  { %v5418_v50 = vadd.f32 %v5352_v58, %v2710_v39  ;;  %v3936_v8 = vpop.f32.mrb[23].mxu1 }
0x2461   :  { %2722 = vperm.xlu1 %4281, %v5418_v50   ;;  %2716 = vperm.xlu0 %4280, %v5418_v50  }
0x2465   :  { %2727 = vrot.lane.b32.xlu0 %v2532_v11, %s4631_s1 }
0x24e0   :  { %v2723_v2 = vpop.permute.xlu1 %2722  ;;  %v2717_v13 = vpop.permute.xlu0 %2716 }
0x24e1   :  { %v2719_v15 = vmul.f32 %v2717_v13, %v5225_v18  ;;  %v2725_v53 = vmul.f32 %v2723_v2, %v5228_v56 }
0x24e3   :  { %v2720_v5 = vadd.f32 %v5233_v10, %v2719_v15 }
0x24e4   :  { %v2728_v17 = vpop.permute.xlu0 %2727 }
0x24e5   :  { %v2726_v16 = vadd.f32 %v2725_v53, %v2720_v5 }
0x24e7   :  { %v2730_v20 = vsel %vm100_vm2, %v2726_v16, %v2728_v17 }
0x24e8   :  { %3948 = vmatmul.mubr.msk.f32.vlgmr.msra.gmra.mrb[24].mxu1 %vm2108_vm9, %v2730_v20 }
0x24e9   :  { %4235 = vmatpush3.bf16.msra.mxu1 %v5326_v41  ;;  %3977 = vmatprep.mubr.msk.f32.mxu1 %vm4625_vm0, %v4626_v1 }
0x24ea   :  { %4236 = vmatprep.subr.bf16.mxu1 %v4624_v0 }
0x24ed   :  { %4238 = vmatpush3.bf16.msra.mxu1 %v5332_v44 }
0x24ee   :  { %4245 = vmatprep.subr.bf16.mxu1 %v4624_v0 }
0x25bb   :  { %v2800_v52 = vpop.f32.mrb[24].mxu1 }
0x25bc   :  { %v2801_v21 = vadd.f32 %v5249_v30, %v2800_v52  ;;  %v3949_v31 = vpop.f32.mrb[25].mxu1 }
0x25be   :  { %v3401_v22 = vmul.f32 -1.442695, %v2801_v21 }
0x25c0   :  { %4491 = vpow2.f32 %v3401_v22 }
0x25c1   :  { %4493 = vtanh.f32 %v2801_v21 }
0x25ca   :  { %v4492_v23 = vpop.eup %4491 }
0x25cb   :  { %v2808_v25 = vadd.f32 1.0, %v4492_v23  ;;  %v4494_v27 = vpop.eup %4493 }
0x25cd   :  { %4495 = vrcp.f32 %v2808_v25 }
0x25d7   :  { %v4496_v28 = vpop.eup %4495 }
0x25d8   :  { %v2811_v12 = vsel %vm4817_vm6, %v4494_v27, %v4496_v28 }
0x25d9   :  { %2814 = vrot.lane.b32.xlu1 %v2811_v12, %s4627_s29  ;;  %v2812_v32 = vmul.f32 %v2811_v12, %v5378_v61 }
0x264b   :  { %v2815_v29 = vpop.permute.xlu1 %2814 }
0x264c   :  { %v2817_v11 = vmul.f32 %v2815_v29, %v2811_v12 }
0x264e   :  { %2819 = vrot.lane.b32.xlu0 %v2817_v11, %s4628_s17 }
0x26c0   :  { %v2820_v33 = vpop.permute.xlu0 %2819 }
0x26c1   :  { %v5440_v24 = vadd.f32 %v2820_v33, %v2812_v32 }
0x26c3   :  { %4497 = vtanh.f32 %v5440_v24 }
0x26cd   :  { %v4498_v57 = vpop.eup %4497 }
0x26ce   :  { %2825 = vrot.lane.b32.xlu1 %v4498_v57, %s4627_s29 }
0x26d2   :  { %2833 = vrot.lane.b32.xlu1 %v2638_v6, %s4627_s29 }
0x2740   :  { %v2826_v35 = vpop.permute.xlu1 %2825 }
0x2741   :  { %v2828_v36 = vmul.f32 %v2826_v35, %v2811_v12 }
0x2743   :  { %2830 = vrot.lane.b32.xlu0 %v2828_v36, %s4628_s17 }
0x2744   :  { %v2834_v37 = vpop.permute.xlu1 %2833 }
0x27b5   :  { %v2831_v38 = vpop.permute.xlu0 %2830 }
0x27b6   :  { %v2836_v19 = vsel %vm190_vm7, %v2831_v38, %v2834_v37 }
0x27b7   :  { %3967 = vmatmul.mubr.msk.f32.vlgmr.msra.gmra.mrb[22].mxu0 %vm342_vm8, %v2836_v19 }
0x27b8   :  { %4241 = vmatpush3.bf16.msra.mxu0 %v5205_v7  ;;  %3990 = vmatprep.mubr.msk.f32.mxu0 %vm4625_vm0, %v4626_v1 }
0x27b9   :  { %4242 = vmatprep.subr.bf16.mxu0 %v4624_v0 }
0x27bc   :  { %4244 = vmatpush3.bf16.msra.mxu0 %v5209_v9 }
0x27bd   :  { %3988 = vmatprep.subr.mxu0 %v4626_v1 }
0x27c0   :  { %3989 = vmatpush3.msk.msra.mxu0 %vm107_vm1, %v5213_v43 }
0x27c1   :  { %4257 = vmatprep.subr.bf16.mxu0 %v4624_v0 }
0x288a   :  { %v2906_v61 = vpop.f32.mrb[22].mxu0 }
0x288b   :  { %v2907_v14 = vadd.f32 %v5306_v26, %v2906_v61  ;;  %v3968_v40 = vpop.f32.mrb[23].mxu0 }
0x288d   :  { %v3403_v42 = vmul.f32 -1.442695, %v2907_v14 }
0x288f   :  { %4499 = vpow2.f32 %v3403_v42 }
0x2890   :  { %4501 = vtanh.f32 %v2907_v14 }
0x2899   :  { %v4500_v7 = vpop.eup %4499 }
0x289a   :  { %v2914_v46 = vadd.f32 1.0, %v4500_v7  ;;  %v4502_v48 = vpop.eup %4501 }
0x289c   :  { %4503 = vrcp.f32 %v2914_v46 }
0x28a6   :  { %v4504_v51 = vpop.eup %4503 }
0x28a7   :  { %v2917_v9 = vsel %vm4817_vm6, %v4502_v48, %v4504_v51 }
0x28a8   :  { %2920 = vrot.lane.b32.xlu0 %v2917_v9, %s4627_s29  ;;  %v2918_v63 = vmul.f32 %v2917_v9, %v5402_v59 }
0x291a   :  { %v2921_v43 = vpop.permute.xlu0 %2920 }
0x291b   :  { %v2923_v54 = vmul.f32 %v2921_v43, %v2917_v9 }
0x291d   :  { %2925 = vrot.lane.b32.xlu1 %v2923_v54, %s4628_s17 }
0x298f   :  { %v2926_v4 = vpop.permute.xlu1 %2925 }
0x2990   :  { %v5463_v6 = vadd.f32 %v2926_v4, %v2918_v63 }
0x2992   :  { %4505 = vtanh.f32 %v5463_v6 }
0x299c   :  { %v4506_v60 = vpop.eup %4505 }
0x299d   :  { %2931 = vrot.lane.b32.xlu0 %v4506_v60, %s4627_s29 }
0x2a0f   :  { %v2932_v39 = vpop.permute.xlu0 %2931 }
0x2a10   :  { %v2934_v8 = vmul.f32 %v2932_v39, %v2917_v9 }
0x2a12   :  { %2936 = vrot.lane.b32.xlu1 %v2934_v8, %s4628_s17 }
0x2a84   :  { %v2937_v2 = vpop.permute.xlu1 %2936 }
0x2a85   :  { %3978 = vmatmul.mubr.msk.f32.vlgmr.msra.gmra.mrb[26].mxu1 %vm190_vm7, %v2937_v2 }
0x2a86   :  { %4247 = vmatpush3.bf16.msra.mxu1 %v5268_v3  ;;  %4009 = vmatprep.mubr.msk.f32.mxu1 %vm4625_vm0, %v4626_v1 }
0x2a87   :  { %4248 = vmatprep.subr.bf16.mxu1 %v4624_v0 }
0x2a8a   :  { %4250 = vmatpush3.bf16.msra.mxu1 %v5271_v45 }
0x2a8b   :  { %4251 = vmatprep.subr.bf16.mxu1 %v4624_v0 }
0x2a8e   :  { %4253 = vmatpush3.bf16.msra.mxu1 %v5276_v47 }
0x2a8f   :  { %4254 = vmatprep.subr.bf16.mxu1 %v4624_v0 }
0x2a92   :  { %4256 = vmatpush3.bf16.msra.mxu1 %v5282_v49 }
0x2b58   :  { %v3006_v59 = vpop.f32.mrb[26].mxu1 }
0x2b59   :  { %v5479_v13 = vadd.f32 %v5352_v58, %v3006_v59  ;;  %v3979_v3 = vpop.f32.mrb[27].mxu1 }
0x2b5b   :  { %3018 = vperm.xlu1 %4281, %v5479_v13   ;;  %3012 = vperm.xlu0 %4280, %v5479_v13  }
0x2b5f   :  { %3023 = vrot.lane.b32.xlu0 %v2828_v36, %s4631_s1 }
0x2b60   :  { %4282 = vset.pattern.permute.xlu0 %v4630_v55 }
0x2bda   :  { %v3019_v45 = vpop.permute.xlu1 %3018  ;;  %v3013_v15 = vpop.permute.xlu0 %3012 }
0x2bdb   :  { %v3015_v47 = vmul.f32 %v3013_v15, %v5225_v18  ;;  %v3021_v53 = vmul.f32 %v3019_v45, %v5228_v56 }
0x2bdd   :  { %v3016_v49 = vadd.f32 %v5233_v10, %v3015_v47 }
0x2bde   :  { %v3024_v16 = vpop.permute.xlu0 %3023 }
0x2bdf   :  { %v3022_v5 = vadd.f32 %v3021_v53, %v3016_v49 }
0x2be1   :  { %v3026_v17 = vsel %vm100_vm2, %v3022_v5, %v3024_v16 }
0x2be2   :  { %3991 = vmatmul.mubr.msk.f32.vlgmr.msra.gmra.mrb[24].mxu0 %vm2108_vm9, %v3026_v17 }
0x2be3   :  { %4259 = vmatpush3.bf16.msra.mxu0 %v5326_v41  ;;  %4020 = vmatprep.mubr.msk.f32.mxu0 %vm4625_vm0, %v4626_v1 }
0x2be4   :  { %4260 = vmatprep.subr.bf16.mxu0 %v4624_v0 }
0x2be7   :  { %4262 = vmatpush3.bf16.msra.mxu0 %v5332_v44 }
0x2cb5   :  { %v3096_v55 = vpop.f32.mrb[24].mxu0 }
0x2cb6   :  { %v3097_v18 = vadd.f32 %v5249_v30, %v3096_v55  ;;  %v3992_v56 = vpop.f32.mrb[25].mxu0 }
0x2cb8   :  { %v3407_v10 = vmul.f32 -1.442695, %v3097_v18 }
0x2cba   :  { %4507 = vpow2.f32 %v3407_v10 }
0x2cbb   :  { %4509 = vtanh.f32 %v3097_v18 }
0x2cc4   :  { %v4508_v20 = vpop.eup %4507 }
0x2cc5   :  { %v3104_v52 = vadd.f32 1.0, %v4508_v20  ;;  %v4510_v21 = vpop.eup %4509 }
0x2cc7   :  { %4511 = vrcp.f32 %v3104_v52 }
0x2cd1   :  { %v4512_v31 = vpop.eup %4511 }
0x2cd2   :  { %v3107_v41 = vsel %vm4817_vm6, %v4510_v21, %v4512_v31 }
0x2cd3   :  { %3110 = vrot.lane.b32.xlu1 %v3107_v41, %s4627_s29  ;;  %v3108_v30 = vmul.f32 %v3107_v41, %v5440_v24 }
0x2d45   :  { %v3111_v0 = vpop.permute.xlu1 %3110 }
0x2d46   :  { %v3113_v1 = vmul.f32 %v3111_v0, %v3107_v41 }
0x2d48   :  { %3115 = vrot.lane.b32.xlu0 %v3113_v1, %s4628_s17 }
0x2dba   :  { %v3116_v44 = vpop.permute.xlu0 %3115 }
0x2dbb   :  { %v3118_v22 = vadd.f32 %v3116_v44, %v3108_v30 }
0x2dbd   :  { %4513 = vtanh.f32 %v3118_v22 }
0x2dc7   :  { %v4514_v23 = vpop.eup %4513 }
0x2dc8   :  { %3121 = vrot.lane.b32.xlu1 %v4514_v23, %s4627_s29 }
0x2dcc   :  { %3129 = vrot.lane.b32.xlu1 %v2934_v8, %s4627_s29 }
0x2e3a   :  { %v3122_v25 = vpop.permute.xlu1 %3121 }
0x2e3b   :  { %v3124_v27 = vmul.f32 %v3122_v25, %v3107_v41 }
0x2e3d   :  { %3126 = vrot.lane.b32.xlu0 %v3124_v27, %s4628_s17 }
0x2e3e   :  { %v3130_v28 = vpop.permute.xlu1 %3129 }
0x2eaf   :  { %v3127_v12 = vpop.permute.xlu0 %3126 }
0x2eb0   :  { %v3132_v29 = vsel %vm190_vm7, %v3127_v12, %v3130_v28 }
0x2eb1   :  { %4010 = vmatmul.mubr.msk.f32.vlgmr.msra.gmra.mrb[28].mxu1 %vm342_vm8, %v3132_v29 }
0x2f84   :  { %v3202_v11 = vpop.f32.mrb[28].mxu1 }
0x2f85   :  { %v3203_v32 = vadd.f32 %v5306_v26, %v3202_v11  ;;  %v4011_v33 = vpop.f32.mrb[29].mxu1 }
0x2f87   :  { %v3409_v24 = vmul.f32 -1.442695, %v3203_v32 }
0x2f89   :  { %4515 = vpow2.f32 %v3409_v24 }
0x2f8a   :  { %4517 = vtanh.f32 %v3203_v32 }
0x2f93   :  { %v4516_v57 = vpop.eup %4515 }
0x2f94   :  { %v3210_v35 = vadd.f32 1.0, %v4516_v57  ;;  %v4518_v36 = vpop.eup %4517 }
0x2f96   :  { %4519 = vrcp.f32 %v3210_v35 }
0x2fa0   :  { %v4520_v37 = vpop.eup %4519 }
0x2fa1   :  { %v3213_v38 = vsel %vm4817_vm6, %v4518_v36, %v4520_v37 }
0x2fa2   :  { %3216 = vrot.lane.b32.xlu0 %v3213_v38, %s4627_s29  ;;  %v3214_v26 = vmul.f32 %v3213_v38, %v5463_v6 }
0x3014   :  { %v3217_v19 = vpop.permute.xlu0 %3216 }
0x3015   :  { %v3219_v61 = vmul.f32 %v3217_v19, %v3213_v38 }
0x3017   :  { %3221 = vrot.lane.b32.xlu1 %v3219_v61, %s4628_s17 }
0x3089   :  { %v3222_v14 = vpop.permute.xlu1 %3221 }
0x308a   :  { %v3224_v40 = vadd.f32 %v3222_v14, %v3214_v26 }
0x308c   :  { %4521 = vtanh.f32 %v3224_v40 }
0x3096   :  { %v4522_v42 = vpop.eup %4521 }
0x3097   :  { %3227 = vrot.lane.b32.xlu0 %v4522_v42, %s4627_s29  ;;  %s4635_s29 = smov [#allocation8]  }
0x3098   :  { %s3329_s2 = sshll.u32 %s4635_s29, 4  ;;  %s3330_s2 = int_to_ptr.vmem [resolvable:$true] %s3329_s2 }
0x3099   :  { %p4596_p11 = scmp.lt.s32.totalorder %s3330_s2, %s3330_s2 }
0x309b   :  { %3306 = vrot.lane.b32.xlu0 %v5418_v50, %s4632_s12 }
0x3109   :  { %v3228_v7 = vpop.permute.xlu0 %3227 }
0x310a   :  { %v3230_v34 = vmul.f32 %v3228_v7, %v3213_v38 }
0x310c   :  { %3232 = vrot.lane.b32.xlu1 %v3230_v34, %s4628_s17  ;;  %s4591_s17 = scalar_lea.vmem %s3330_s2, 32 }
0x310d   :  { %v3307_v43 = vpop.permute.xlu0 %3306  ;;  %p4592_p10 = scmp.ne.s32.totalorder %s3330_s2, %s4591_s17  ;;  %p4597_p12 = scmp.lt.s32.totalorder %s4591_s17, %s4591_s17 }
0x310e   :  { %v3317_v50 = vsel %vm3316_vm10, %v5355_v62, %v3307_v43 }
0x310f   :  { %p4598_p13 = por %p4597_p12, %p4596_p11 }
0x3110   :  { %3309 = vrot.lane.b32.xlu1 %v5479_v13, %s4633_s5 }
0x3111   :  { %p4599_p0 = pnand %p4598_p13, %p4592_p10 }
0x317e   :  { %v3233_v46 = vpop.permute.xlu1 %3232 }
0x317f   :  { %4021 = vmatmul.mubr.msk.f32.vlgmr.msra.gmra.mrb[26].mxu0 %vm190_vm7, %v3233_v46 }
0x3182   :  { %v3310_v54 = vpop.permute.xlu1 %3309 }
0x3183   :  { %v3318_v63 = vsel %vm100_vm2, %v3317_v50, %v3310_v54 }
0x3252   :  { %v3302_v48 = vpop.f32.mrb[26].mxu0 }
0x3253   :  { %v3303_v51 = vadd.f32 %v5352_v58, %v3302_v48  ;;  %v4022_v9 = vpop.f32.mrb[27].mxu0 }
0x3255   :  { %3313 = vrot.lane.b32.xlu0 %v3303_v51, %s4634_s0 }
0x32c7   :  { %v3314_v4 = vpop.permute.xlu0 %3313 }
0x32c8   :  { %v3320_v6 = vsel %vm3319_vm11, %v3318_v63, %v3314_v4 }
0x32c9   :  { %3322 = vst.msk [vmem:[#allocation8] sm:$0x3] %vm3321_vm12, %v3320_v6 }
0x32ca   :  { %4602 = shalt.err (!%p4599_p0)
}
0x32cb   :  { %s4603_s20 = scalar_lea.hbm %s5547_s15, 32 }
0x32cc   :  { %p4604_p1 = scmp.ne.s32.totalorder %s5547_s15, %s4603_s20  ;;  %p4607_p2 = scmp.lt.u32.totalorder %s4603_s20, %s5547_s15 }
0x32ce   :  { %p4609_p3 = pnand %p4607_p2, %p4604_p1 }
0x32d0   :  { %4612 = shalt.err (!%p4609_p3)
}
0x32d1   :  { %3332 = dma.vmem_to_hbm [thread:$0]  %s3330_s2, 32, %s5547_s15, [#allocation4]  }
0x32d2   :  { %4617 = dma.done.wait [#allocation4], 32  }
0x32d3   :  { %4618 = vsyncadd [#allocation4], 4294967264 }
0x32d4   :  { %3336 = vsyncpa [#allocation3], 1 }
0x32d5   :  { %3337 = vsyncpa [#allocation6], 1 }
0x32d6   :  { %3338 = vsyncpa [#allocation4], 1 }

</bundles_post_ra>
